<compile_context>
chip_gen: v6e
topology: v6e:2x2x1
jax: 0.10.0
libtpu: 0.0.40
codegen_flags: <defaults>
</compile_context>

<pallas_src>
import numpy as np
import jax
import jax.numpy as jnp
from jax.experimental import pallas as pl
from jax.experimental.pallas import tpu as pltpu

# make the pure-JAX reference dots full f32 precision (kernel already is)
jax.config.update("jax_default_matmul_precision", "highest")

# ----------------------------- configuration --------------------------------
INPUT_RES = 16          # input_resolution
PATCH = 8               # patch_size
WIDTH = 32              # d_model
LAYERS = 2
HEADS = 4
OUT_DIM = 16            # output_dim
HEAD_DIM = WIDTH // HEADS
GRID_HW = INPUT_RES // PATCH
N_PATCH = GRID_HW * GRID_HW
SEQ = N_PATCH + 1                       # CLS + patch tokens (= 5)
SEQ_PAD = ((SEQ + 7) // 8) * 8          # pad token axis to a sublane multiple
PATCH_DIM = 3 * PATCH * PATCH
EPS = 1e-5                              # torch.nn.LayerNorm default
NEG_INF = -1e30

# MXU operand dtype.  jnp.float32 == bit-exact vs the PyTorch module; set to
# jnp.bfloat16 on v6e/v7x for real CLIP sizes (re-validate tolerance).
MATMUL_DTYPE = jnp.float32


def _mm(a, b):
    """MXU matmul with operands cast to MATMUL_DTYPE, f32 accumulation."""
    return jnp.dot(a.astype(MATMUL_DTYPE), b.astype(MATMUL_DTYPE),
                   preferred_element_type=jnp.float32)


def _layernorm(x, g, b):
    """LayerNorm over the last dim in float32 (matches CLIP's LayerNorm)."""
    x = x.astype(jnp.float32)
    mu = jnp.mean(x, axis=-1, keepdims=True)
    var = jnp.mean(jnp.square(x - mu), axis=-1, keepdims=True)
    return (x - mu) * jax.lax.rsqrt(var + EPS) * g.astype(jnp.float32) + b.astype(jnp.float32)


# ------------------------------ fused kernel --------------------------------
def _vit_kernel(patches_ref, cls_pos_ref, patch_w_ref,
                ln_pre_g_ref, ln_pre_b_ref,
                ln1_g_ref, ln1_b_ref, in_w_ref, in_b_ref, out_w_ref, out_b_ref,
                ln2_g_ref, ln2_b_ref, fc_w_ref, fc_b_ref, cproj_w_ref, cproj_b_ref,
                ln_post_g_ref, ln_post_b_ref, proj_ref,
                out_ref, x_scr):
    f32 = jnp.float32
    layer = pl.program_id(1)                    # grid = (batch_tiles, LAYERS)
    bt, seq_pad, width = x_scr.shape
    rows = bt * seq_pad
    scale = HEAD_DIM ** -0.5

    # ---- prologue (first layer only): patch embed + cls/pos + ln_pre --------
    @pl.when(layer == 0)
    def _():
        p2 = patches_ref[...].reshape(rows, PATCH_DIM)
        emb = _mm(p2, patch_w_ref[...]).reshape(bt, seq_pad, width)
        emb = emb + cls_pos_ref[...][None]          # broadcast over batch tile
        x_scr[...] = _layernorm(emb, ln_pre_g_ref[...], ln_pre_b_ref[...])

    x2 = x_scr[...].reshape(rows, width)            # (rows, WIDTH) carried state

    # =============================== attention ================================
    h = _layernorm(x2, ln1_g_ref[0], ln1_b_ref[0])
    qkv = _mm(h, in_w_ref[0]) + in_b_ref[0]         # (rows, 3*WIDTH)
    qkv3 = qkv.reshape(bt, seq_pad, 3 * width)
    # pad-key mask built in-kernel (no HBM bias array); pad queries are benign.
    key_ok = jax.lax.broadcasted_iota(jnp.int32, (bt, seq_pad, seq_pad), 2) < SEQ

    o_heads = []
    for hd in range(HEADS):
        lo = hd * HEAD_DIM
        q = qkv3[:, :, lo:lo + HEAD_DIM] * scale
        k = qkv3[:, :, width + lo:width + lo + HEAD_DIM]
        v = qkv3[:, :, 2 * width + lo:2 * width + lo + HEAD_DIM]
        s = jnp.einsum("bqd,bkd->bqk", q, k, preferred_element_type=f32)
        s = jnp.where(key_ok, s, NEG_INF)
        s = s - jnp.max(s, axis=-1, keepdims=True)
        e = jnp.exp(s)
        p = e * pl.reciprocal(jnp.sum(e, axis=-1, keepdims=True), approx=True)
        o_heads.append(jnp.einsum("bqk,bkd->bqd", p, v, preferred_element_type=f32))
    # concat heads once, single full-width output projection matmul
    o = jnp.concatenate(o_heads, axis=-1).reshape(rows, width)
    x2 = x2 + _mm(o, out_w_ref[0]) + out_b_ref[0]

    # ================================= MLP ====================================
    h2 = _layernorm(x2, ln2_g_ref[0], ln2_b_ref[0])
    h2 = _mm(h2, fc_w_ref[0]) + fc_b_ref[0]
    h2 = h2 * jax.nn.sigmoid(1.702 * h2)            # QuickGELU (f32, EUP)
    x2 = x2 + _mm(h2, cproj_w_ref[0]) + cproj_b_ref[0]

    x3 = x2.reshape(bt, seq_pad, width)
    x_scr[...] = x3                                  # carry to next layer

    # ---- epilogue (last layer only): ln_post on CLS rows + projection -------
    @pl.when(layer == LAYERS - 1)
    def _():
        cls = _layernorm(x3[:, 0, :], ln_post_g_ref[...], ln_post_b_ref[...])
        out_ref[0] = _mm(cls, proj_ref[...]).astype(out_ref.dtype)


# ------------------------------ host wrapper ---------------------------------
def vit_forward(x, kp, *, batch_tile=1):
    """x: (B, 3, H, W) float32 NCHW; kp: kernel-ready parameter dict."""
    B, C, H, W_img = x.shape
    assert B % batch_tile == 0
    nb = B // batch_tile
    gh, gw = H // PATCH, W_img // PATCH

    # conv1 (stride == kernel) == patch extraction; channel-major inside each
    # patch to match Conv2d weight flattening.  Row 0 of each image is the
    # (zero) CLS slot, rows >= SEQ are zero padding.
    patches = (x.reshape(B, C, gh, PATCH, gw, PATCH)
                 .transpose(0, 2, 4, 1, 3, 5)
                 .reshape(B, gh * gw, C * PATCH * PATCH))
    patches = jnp.pad(patches, ((0, 0), (1, SEQ_PAD - SEQ), (0, 0)))  # (B,SEQ_PAD,PATCH_DIM)

    def lyr(shape):   # per-layer streamed weight block (auto double-buffered)
        return pl.BlockSpec((1,) + shape, lambda b, l: (l, 0, 0))

    def cst(shape):   # resident block (fetched once, constant index)
        return pl.BlockSpec(shape, lambda b, l: (0,) * len(shape))

    in_specs = [
        pl.BlockSpec((batch_tile, SEQ_PAD, PATCH_DIM), lambda b, l: (b, 0, 0)),  # patches
        cst((SEQ_PAD, WIDTH)),                     # cls_pos
        cst((PATCH_DIM, WIDTH)),                   # patch_w
        cst((1, WIDTH)), cst((1, WIDTH)),          # ln_pre g/b
        lyr((1, WIDTH)), lyr((1, WIDTH)),          # ln1 g/b
        lyr((WIDTH, 3 * WIDTH)), lyr((1, 3 * WIDTH)),    # in_w / in_b
        lyr((WIDTH, WIDTH)), lyr((1, WIDTH)),            # out_w / out_b
        lyr((1, WIDTH)), lyr((1, WIDTH)),                # ln2 g/b
        lyr((WIDTH, 4 * WIDTH)), lyr((1, 4 * WIDTH)),    # fc_w / fc_b
        lyr((4 * WIDTH, WIDTH)), lyr((1, WIDTH)),        # cproj_w / cproj_b
        cst((1, WIDTH)), cst((1, WIDTH)),          # ln_post g/b
        cst((WIDTH, OUT_DIM)),                     # proj
    ]

    out = pl.pallas_call(
        _vit_kernel,
        out_shape=jax.ShapeDtypeStruct((nb, batch_tile, OUT_DIM), x.dtype),
        grid_spec=pltpu.PrefetchScalarGridSpec(
            num_scalar_prefetch=0,
            grid=(nb, LAYERS),
            in_specs=in_specs,
            out_specs=pl.BlockSpec((1, batch_tile, OUT_DIM), lambda b, l: (b, 0, 0)),
            scratch_shapes=[pltpu.VMEM((batch_tile, SEQ_PAD, WIDTH), jnp.float32)]),
        compiler_params=pltpu.CompilerParams(
            dimension_semantics=("parallel", "arbitrary")),
    )(patches, kp["cls_pos"], kp["patch_w"],
      kp["ln_pre_g"], kp["ln_pre_b"],
      kp["ln1_g"], kp["ln1_b"], kp["in_w"], kp["in_b"], kp["out_w"], kp["out_b"],
      kp["ln2_g"], kp["ln2_b"], kp["fc_w"], kp["fc_b"], kp["cproj_w"], kp["cproj_b"],
      kp["ln_post_g"], kp["ln_post_b"], kp["proj"])
    return out.reshape(B, OUT_DIM)


# ------------------------ parameters (PyTorch layout) ------------------------
def init_params(key):
    keys = iter(jax.random.split(key, 128))

    def nrm(shape, scale):
        return scale * jax.random.normal(next(keys), shape, dtype=jnp.float32)

    scale = WIDTH ** -0.5
    params = {
        # conv1 weight (width, 3, ps, ps) flattened to (3*ps*ps, width)
        "patch_w": nrm((PATCH_DIM, WIDTH), 0.02),
        "cls": nrm((WIDTH,), scale),
        "pos": nrm((SEQ, WIDTH), scale),
        "ln_pre_g": jnp.ones((WIDTH,), jnp.float32),
        "ln_pre_b": jnp.zeros((WIDTH,), jnp.float32),
        "ln_post_g": jnp.ones((WIDTH,), jnp.float32),
        "ln_post_b": jnp.zeros((WIDTH,), jnp.float32),
        "proj": nrm((WIDTH, OUT_DIM), scale),
        "layers": [],
    }
    for _ in range(LAYERS):
        params["layers"].append({
            "ln1_g": jnp.ones((WIDTH,), jnp.float32),
            "ln1_b": jnp.zeros((WIDTH,), jnp.float32),
            "in_w": nrm((WIDTH, 3 * WIDTH), 0.02),     # in_proj_weight.T
            "in_b": nrm((3 * WIDTH,), 0.02),
            "out_w": nrm((WIDTH, WIDTH), 0.02),        # out_proj.weight.T
            "out_b": nrm((WIDTH,), 0.02),
            "ln2_g": jnp.ones((WIDTH,), jnp.float32),
            "ln2_b": jnp.zeros((WIDTH,), jnp.float32),
            "fc_w": nrm((WIDTH, 4 * WIDTH), 0.02),     # c_fc.weight.T
            "fc_b": nrm((4 * WIDTH,), 0.02),
            "cproj_w": nrm((4 * WIDTH, WIDTH), 0.02),  # c_proj.weight.T
            "cproj_b": nrm((WIDTH,), 0.02),
        })
    return params


def prepare_params(p):
    """Repack PyTorch-style params into the stacked (L, ...) kernel layout."""
    # For v6e/v7x at real CLIP sizes, also cast the stacked weights to bf16 here
    # (halves HBM DMA + VMEM) and set MATMUL_DTYPE = jnp.bfloat16.
    def stack(name, shape=None):
        a = jnp.stack([lp[name] for lp in p["layers"]])
        return a if shape is None else a.reshape(shape)

    cls_pos = p["pos"].at[0].add(p["cls"])                       # fuse cls + pos[0]
    cls_pos = jnp.pad(cls_pos, ((0, SEQ_PAD - SEQ), (0, 0)))     # (SEQ_PAD, WIDTH)
    L = LAYERS
    return {
        "patch_w": p["patch_w"],
        "cls_pos": cls_pos,
        "ln_pre_g": p["ln_pre_g"].reshape(1, WIDTH),
        "ln_pre_b": p["ln_pre_b"].reshape(1, WIDTH),
        "ln1_g": stack("ln1_g", (L, 1, WIDTH)),
        "ln1_b": stack("ln1_b", (L, 1, WIDTH)),
        "in_w": stack("in_w"),
        "in_b": stack("in_b", (L, 1, 3 * WIDTH)),
        "out_w": stack("out_w"),
        "out_b": stack("out_b", (L, 1, WIDTH)),
        "ln2_g": stack("ln2_g", (L, 1, WIDTH)),
        "ln2_b": stack("ln2_b", (L, 1, WIDTH)),
        "fc_w": stack("fc_w"),
        "fc_b": stack("fc_b", (L, 1, 4 * WIDTH)),
        "cproj_w": stack("cproj_w"),
        "cproj_b": stack("cproj_b", (L, 1, WIDTH)),
        "ln_post_g": p["ln_post_g"].reshape(1, WIDTH),
        "ln_post_b": p["ln_post_b"].reshape(1, WIDTH),
        "proj": p["proj"],
    }


# ---------------------- pure-JAX reference (validation) ----------------------
def _layernorm_ref(x, g, b):
    x = x.astype(jnp.float32)
    mu = jnp.mean(x, axis=-1, keepdims=True)
    var = jnp.mean(jnp.square(x - mu), axis=-1, keepdims=True)
    return (x - mu) * jax.lax.rsqrt(var + EPS) * g + b


def vit_reference(x, p):
    B = x.shape[0]
    patches = (x.reshape(B, 3, GRID_HW, PATCH, GRID_HW, PATCH)
                 .transpose(0, 2, 4, 1, 3, 5)
                 .reshape(B, N_PATCH, PATCH_DIM))
    tok = jnp.einsum("bpk,kw->bpw", patches, p["patch_w"])
    cls = jnp.broadcast_to(p["cls"], (B, 1, WIDTH))
    h = jnp.concatenate([cls, tok], axis=1) + p["pos"][None]
    h = _layernorm_ref(h, p["ln_pre_g"], p["ln_pre_b"])
    scale = HEAD_DIM ** -0.5
    for lp in p["layers"]:
        a = _layernorm_ref(h, lp["ln1_g"], lp["ln1_b"])
        qkv = jnp.einsum("bsw,wn->bsn", a, lp["in_w"]) + lp["in_b"]
        q, k, v = jnp.split(qkv, 3, axis=-1)
        q = q.reshape(B, SEQ, HEADS, HEAD_DIM).transpose(0, 2, 1, 3) * scale
        k = k.reshape(B, SEQ, HEADS, HEAD_DIM).transpose(0, 2, 1, 3)
        v = v.reshape(B, SEQ, HEADS, HEAD_DIM).transpose(0, 2, 1, 3)
        s = jnp.einsum("bhqd,bhkd->bhqk", q, k)
        w = jax.nn.softmax(s, axis=-1)
        o = jnp.einsum("bhqk,bhkd->bhqd", w, v).transpose(0, 2, 1, 3).reshape(B, SEQ, WIDTH)
        h = h + jnp.einsum("bsw,wn->bsn", o, lp["out_w"]) + lp["out_b"]
        m = _layernorm_ref(h, lp["ln2_g"], lp["ln2_b"])
        m = jnp.einsum("bsw,wn->bsn", m, lp["fc_w"]) + lp["fc_b"]
        m = m * jax.nn.sigmoid(1.702 * m)
        h = h + jnp.einsum("bsn,nw->bsw", m, lp["cproj_w"]) + lp["cproj_b"]
    cls_out = _layernorm_ref(h[:, 0, :], p["ln_post_g"], p["ln_post_b"])
    return jnp.einsum("bw,wo->bo", cls_out, p["proj"])


# ----------------------------------- main ------------------------------------
if __name__ == "__main__":
    key = jax.random.PRNGKey(0)
    k_params, k_x = jax.random.split(key)
    params = init_params(k_params)
    kparams = prepare_params(params)
    x = jax.random.normal(k_x, (2, 3, INPUT_RES, INPUT_RES), dtype=jnp.float32)

    out = jax.block_until_ready(jax.jit(vit_forward)(x, kparams))

    assert out.shape == (2, OUT_DIM), out.shape
    assert bool(jnp.all(jnp.isfinite(out)))

    # validate the fused kernel against a pure-JAX reference of the module
    ref = jax.block_until_ready(jax.jit(vit_reference)(x, params))
    np.testing.assert_allclose(np.asarray(out), np.asarray(ref), rtol=2e-3, atol=2e-3)

    print("KERNEL_OK")
</pallas_src>

<mosaic_0001>
module attributes {stable_mosaic.version = 11 : i64} {
  func.func @_vit_kernel(%arg0: i32, %arg1: i32, %arg2: memref<1x8x192xf32, #tpu.memory_space<vmem>>, %arg3: memref<8x32xf32, #tpu.memory_space<vmem>>, %arg4: memref<192x32xf32, #tpu.memory_space<vmem>>, %arg5: memref<1x32xf32, #tpu.memory_space<vmem>>, %arg6: memref<1x32xf32, #tpu.memory_space<vmem>>, %arg7: memref<1x1x32xf32, #tpu.memory_space<vmem>>, %arg8: memref<1x1x32xf32, #tpu.memory_space<vmem>>, %arg9: memref<1x32x96xf32, #tpu.memory_space<vmem>>, %arg10: memref<1x1x96xf32, #tpu.memory_space<vmem>>, %arg11: memref<1x32x32xf32, #tpu.memory_space<vmem>>, %arg12: memref<1x1x32xf32, #tpu.memory_space<vmem>>, %arg13: memref<1x1x32xf32, #tpu.memory_space<vmem>>, %arg14: memref<1x1x32xf32, #tpu.memory_space<vmem>>, %arg15: memref<1x32x128xf32, #tpu.memory_space<vmem>>, %arg16: memref<1x1x128xf32, #tpu.memory_space<vmem>>, %arg17: memref<1x128x32xf32, #tpu.memory_space<vmem>>, %arg18: memref<1x1x32xf32, #tpu.memory_space<vmem>>, %arg19: memref<1x32xf32, #tpu.memory_space<vmem>>, %arg20: memref<1x32xf32, #tpu.memory_space<vmem>>, %arg21: memref<32x16xf32, #tpu.memory_space<vmem>>, %arg22: memref<1x1x16xf32, #tpu.memory_space<vmem>>, %arg23: memref<1x8x32xf32, #tpu.memory_space<vmem>>) attributes {dimension_semantics = [#tpu.dimension_semantics<parallel>, #tpu.dimension_semantics<arbitrary>], iteration_bounds = array<i64: 2, 2>, scalar_prefetch = 0 : i64, scratch_operands = 1 : i64, tpu.core_type = #tpu.core_type<tc>, window_params = [{transform_indices = @transform_0, window_bounds = array<i64: 1, 8, 192>}, {pipeline_mode = #tpu.pipeline_mode<synchronous>, transform_indices = @transform_1, window_bounds = array<i64: 8, 32>}, {pipeline_mode = #tpu.pipeline_mode<synchronous>, transform_indices = @transform_2, window_bounds = array<i64: 192, 32>}, {pipeline_mode = #tpu.pipeline_mode<synchronous>, transform_indices = @transform_3, window_bounds = array<i64: 1, 32>}, {pipeline_mode = #tpu.pipeline_mode<synchronous>, transform_indices = @transform_4, window_bounds = array<i64: 1, 32>}, {transform_indices = @transform_5, window_bounds = array<i64: 1, 1, 32>}, {transform_indices = @transform_6, window_bounds = array<i64: 1, 1, 32>}, {transform_indices = @transform_7, window_bounds = array<i64: 1, 32, 96>}, {transform_indices = @transform_8, window_bounds = array<i64: 1, 1, 96>}, {transform_indices = @transform_9, window_bounds = array<i64: 1, 32, 32>}, {transform_indices = @transform_10, window_bounds = array<i64: 1, 1, 32>}, {transform_indices = @transform_11, window_bounds = array<i64: 1, 1, 32>}, {transform_indices = @transform_12, window_bounds = array<i64: 1, 1, 32>}, {transform_indices = @transform_13, window_bounds = array<i64: 1, 32, 128>}, {transform_indices = @transform_14, window_bounds = array<i64: 1, 1, 128>}, {transform_indices = @transform_15, window_bounds = array<i64: 1, 128, 32>}, {transform_indices = @transform_16, window_bounds = array<i64: 1, 1, 32>}, {pipeline_mode = #tpu.pipeline_mode<synchronous>, transform_indices = @transform_17, window_bounds = array<i64: 1, 32>}, {pipeline_mode = #tpu.pipeline_mode<synchronous>, transform_indices = @transform_18, window_bounds = array<i64: 1, 32>}, {pipeline_mode = #tpu.pipeline_mode<synchronous>, transform_indices = @transform_19, window_bounds = array<i64: 32, 16>}, {transform_indices = @transform_20, window_bounds = array<i64: 1, 1, 16>}]} {
    %c0_i32 = arith.constant 0 : i32
    %0 = arith.cmpi eq, %arg1, %c0_i32 : i32
    %1 = arith.extui %0 : i1 to i32
    %c0_i32_0 = arith.constant 0 : i32
    %2 = arith.cmpi ne, %1, %c0_i32_0 : i32
    scf.if %2 {
      %c0_82 = arith.constant 0 : index
      %c0_83 = arith.constant 0 : index
      %c0_84 = arith.constant 0 : index
      %182 = vector.load %arg2[%c0_82, %c0_83, %c0_84] : memref<1x8x192xf32, #tpu.memory_space<vmem>>, vector<1x8x192xf32>
      %183 = vector.shape_cast %182 : vector<1x8x192xf32> to vector<8x192xf32>
      %c0_85 = arith.constant 0 : index
      %c0_86 = arith.constant 0 : index
      %184 = vector.load %arg4[%c0_85, %c0_86] : memref<192x32xf32, #tpu.memory_space<vmem>>, vector<192x32xf32>
      %cst_87 = arith.constant dense<0.000000e+00> : vector<8x32xf32>
      %185 = tpu.matmul %183, %184, %cst_87 {dimension_numbers = #tpu.dot_dimension_numbers<[1], [0], [0], [1], [0, 0, 1, 1], [], []>, precision = #tpu.contract_precision<fp32>} : vector<8x192xf32>, vector<192x32xf32>, vector<8x32xf32> -> vector<8x32xf32>
      %186 = vector.shape_cast %185 : vector<8x32xf32> to vector<1x8x32xf32>
      %c0_88 = arith.constant 0 : index
      %c0_89 = arith.constant 0 : index
      %187 = vector.load %arg3[%c0_88, %c0_89] : memref<8x32xf32, #tpu.memory_space<vmem>>, vector<8x32xf32>
      %188 = vector.shape_cast %187 : vector<8x32xf32> to vector<1x8x32xf32>
      %189 = arith.addf %186, %188 : vector<1x8x32xf32>
      %c0_90 = arith.constant 0 : index
      %c0_91 = arith.constant 0 : index
      %190 = vector.load %arg5[%c0_90, %c0_91] : memref<1x32xf32, #tpu.memory_space<vmem>>, vector<1x32xf32>
      %c0_92 = arith.constant 0 : index
      %c0_93 = arith.constant 0 : index
      %191 = vector.load %arg6[%c0_92, %c0_93] : memref<1x32xf32, #tpu.memory_space<vmem>>, vector<1x32xf32>
      %cst_94 = arith.constant dense<0.000000e+00> : vector<1x8xf32>
      %192 = vector.multi_reduction <add>, %189, %cst_94 [2] : vector<1x8x32xf32> to vector<1x8xf32>
      %193 = vector.shape_cast %192 : vector<1x8xf32> to vector<1x8x1xf32>
      %cst_95 = arith.constant 3.200000e+01 : f32
      %194 = vector.broadcast %cst_95 : f32 to vector<1x8x1xf32>
      %195 = arith.divf %193, %194 : vector<1x8x1xf32>
      %196 = vector.broadcast %195 : vector<1x8x1xf32> to vector<1x8x32xf32>
      %197 = arith.subf %189, %196 : vector<1x8x32xf32>
      %198 = arith.mulf %197, %197 : vector<1x8x32xf32>
      %cst_96 = arith.constant dense<0.000000e+00> : vector<1x8xf32>
      %199 = vector.multi_reduction <add>, %198, %cst_96 [2] : vector<1x8x32xf32> to vector<1x8xf32>
      %200 = vector.shape_cast %199 : vector<1x8xf32> to vector<1x8x1xf32>
      %cst_97 = arith.constant 3.200000e+01 : f32
      %201 = vector.broadcast %cst_97 : f32 to vector<1x8x1xf32>
      %202 = arith.divf %200, %201 : vector<1x8x1xf32>
      %203 = vector.broadcast %195 : vector<1x8x1xf32> to vector<1x8x32xf32>
      %204 = arith.subf %189, %203 : vector<1x8x32xf32>
      %cst_98 = arith.constant 9.99999974E-6 : f32
      %205 = vector.broadcast %cst_98 : f32 to vector<1x8x1xf32>
      %206 = arith.addf %202, %205 : vector<1x8x1xf32>
      %207 = math.rsqrt %206 : vector<1x8x1xf32>
      %208 = vector.broadcast %207 : vector<1x8x1xf32> to vector<1x8x32xf32>
      %209 = arith.mulf %204, %208 : vector<1x8x32xf32>
      %210 = vector.shape_cast %190 : vector<1x32xf32> to vector<1x1x32xf32>
      %211 = vector.broadcast %210 : vector<1x1x32xf32> to vector<1x8x32xf32>
      %212 = arith.mulf %209, %211 : vector<1x8x32xf32>
      %213 = vector.shape_cast %191 : vector<1x32xf32> to vector<1x1x32xf32>
      %214 = vector.broadcast %213 : vector<1x1x32xf32> to vector<1x8x32xf32>
      %215 = arith.addf %212, %214 : vector<1x8x32xf32>
      %c0_99 = arith.constant 0 : index
      %c0_100 = arith.constant 0 : index
      %c0_101 = arith.constant 0 : index
      %216 = vector.load %arg23[%c0_99, %c0_100, %c0_101] : memref<1x8x32xf32, #tpu.memory_space<vmem>>, vector<1x8x32xf32>
      tpu.vector_store %arg23[%c0_99, %c0_100, %c0_101], %215 {strides = array<i32>} : memref<1x8x32xf32, #tpu.memory_space<vmem>>, vector<1x8x32xf32>,
    } else {
    }
    %c0 = arith.constant 0 : index
    %c0_1 = arith.constant 0 : index
    %c0_2 = arith.constant 0 : index
    %3 = vector.load %arg23[%c0, %c0_1, %c0_2] : memref<1x8x32xf32, #tpu.memory_space<vmem>>, vector<1x8x32xf32>
    %4 = vector.shape_cast %3 : vector<1x8x32xf32> to vector<8x32xf32>
    %c0_3 = arith.constant 0 : index
    %c0_4 = arith.constant 0 : index
    %c0_5 = arith.constant 0 : index
    %5 = vector.load %arg7[%c0_3, %c0_4, %c0_5] : memref<1x1x32xf32, #tpu.memory_space<vmem>>, vector<1x1x32xf32>
    %6 = vector.shape_cast %5 : vector<1x1x32xf32> to vector<1x32xf32>
    %c0_6 = arith.constant 0 : index
    %c0_7 = arith.constant 0 : index
    %c0_8 = arith.constant 0 : index
    %7 = vector.load %arg8[%c0_6, %c0_7, %c0_8] : memref<1x1x32xf32, #tpu.memory_space<vmem>>, vector<1x1x32xf32>
    %8 = vector.shape_cast %7 : vector<1x1x32xf32> to vector<1x32xf32>
    %cst = arith.constant dense<0.000000e+00> : vector<8xf32>
    %9 = vector.multi_reduction <add>, %4, %cst [1] : vector<8x32xf32> to vector<8xf32>
    %10 = vector.shape_cast %9 : vector<8xf32> to vector<8x1xf32>
    %cst_9 = arith.constant 3.200000e+01 : f32
    %11 = vector.broadcast %cst_9 : f32 to vector<8x1xf32>
    %12 = arith.divf %10, %11 : vector<8x1xf32>
    %13 = vector.broadcast %12 : vector<8x1xf32> to vector<8x32xf32>
    %14 = arith.subf %4, %13 : vector<8x32xf32>
    %15 = arith.mulf %14, %14 : vector<8x32xf32>
    %cst_10 = arith.constant dense<0.000000e+00> : vector<8xf32>
    %16 = vector.multi_reduction <add>, %15, %cst_10 [1] : vector<8x32xf32> to vector<8xf32>
    %17 = vector.shape_cast %16 : vector<8xf32> to vector<8x1xf32>
    %cst_11 = arith.constant 3.200000e+01 : f32
    %18 = vector.broadcast %cst_11 : f32 to vector<8x1xf32>
    %19 = arith.divf %17, %18 : vector<8x1xf32>
    %20 = vector.broadcast %12 : vector<8x1xf32> to vector<8x32xf32>
    %21 = arith.subf %4, %20 : vector<8x32xf32>
    %cst_12 = arith.constant 9.99999974E-6 : f32
    %22 = vector.broadcast %cst_12 : f32 to vector<8x1xf32>
    %23 = arith.addf %19, %22 : vector<8x1xf32>
    %24 = math.rsqrt %23 : vector<8x1xf32>
    %25 = vector.broadcast %24 : vector<8x1xf32> to vector<8x32xf32>
    %26 = arith.mulf %21, %25 : vector<8x32xf32>
    %27 = vector.broadcast %6 : vector<1x32xf32> to vector<8x32xf32>
    %28 = arith.mulf %26, %27 : vector<8x32xf32>
    %29 = vector.broadcast %8 : vector<1x32xf32> to vector<8x32xf32>
    %30 = arith.addf %28, %29 : vector<8x32xf32>
    %c0_13 = arith.constant 0 : index
    %c0_14 = arith.constant 0 : index
    %c0_15 = arith.constant 0 : index
    %31 = vector.load %arg9[%c0_13, %c0_14, %c0_15] : memref<1x32x96xf32, #tpu.memory_space<vmem>>, vector<1x32x96xf32>
    %32 = vector.shape_cast %31 : vector<1x32x96xf32> to vector<32x96xf32>
    %cst_16 = arith.constant dense<0.000000e+00> : vector<8x96xf32>
    %33 = tpu.matmul %30, %32, %cst_16 {dimension_numbers = #tpu.dot_dimension_numbers<[1], [0], [0], [1], [0, 0, 1, 1], [], []>, precision = #tpu.contract_precision<fp32>} : vector<8x32xf32>, vector<32x96xf32>, vector<8x96xf32> -> vector<8x96xf32>
    %c0_17 = arith.constant 0 : index
    %c0_18 = arith.constant 0 : index
    %c0_19 = arith.constant 0 : index
    %34 = vector.load %arg10[%c0_17, %c0_18, %c0_19] : memref<1x1x96xf32, #tpu.memory_space<vmem>>, vector<1x1x96xf32>
    %35 = vector.shape_cast %34 : vector<1x1x96xf32> to vector<1x96xf32>
    %36 = vector.broadcast %35 : vector<1x96xf32> to vector<8x96xf32>
    %37 = arith.addf %33, %36 : vector<8x96xf32>
    %38 = vector.shape_cast %37 : vector<8x96xf32> to vector<1x8x96xf32>
    %39 = tpu.iota {dimensions = array<i32: 2>} : vector<1x8x8xi32>
    %c5_i32 = arith.constant 5 : i32
    %40 = vector.broadcast %c5_i32 : i32 to vector<1x8x8xi32>
    %41 = arith.cmpi slt, %39, %40 : vector<1x8x8xi32>
    %42 = vector.extract_strided_slice %38 {offsets = [0, 0, 0], sizes = [1, 8, 8], strides = [1, 1, 1]} : vector<1x8x96xf32> to vector<1x8x8xf32>
    %cst_20 = arith.constant 0.353553385 : f32
    %43 = vector.broadcast %cst_20 : f32 to vector<1x8x8xf32>
    %44 = arith.mulf %42, %43 : vector<1x8x8xf32>
    %45 = vector.extract_strided_slice %38 {offsets = [0, 0, 32], sizes = [1, 8, 8], strides = [1, 1, 1]} : vector<1x8x96xf32> to vector<1x8x8xf32>
    %46 = vector.extract_strided_slice %38 {offsets = [0, 0, 64], sizes = [1, 8, 8], strides = [1, 1, 1]} : vector<1x8x96xf32> to vector<1x8x8xf32>
    "tpu.trace_start"() <{level = 10 : i32, message = "bqd,bkd->bqk"}> : () -> ()
    %cst_21 = arith.constant dense<0.000000e+00> : vector<1x8x8xf32>
    %47 = tpu.matmul %44, %45, %cst_21 {dimension_numbers = #tpu.dot_dimension_numbers<[2], [2], [1], [1], [0, 0, 0, 1, 1, 1], [0], [0]>, precision = #tpu.contract_precision<fp32>} : vector<1x8x8xf32>, vector<1x8x8xf32>, vector<1x8x8xf32> -> vector<1x8x8xf32>
    %cst_22 = arith.constant -1.000000e+30 : f32
    "tpu.trace_stop"() : () -> ()
    %48 = vector.broadcast %cst_22 : f32 to vector<1x8x8xf32>
    %49 = arith.select %41, %47, %48 : vector<1x8x8xi1>, vector<1x8x8xf32>
    %cst_23 = arith.constant dense<0xFF800000> : vector<1x8xf32>
    %50 = vector.multi_reduction <maximumf>, %49, %cst_23 [2] : vector<1x8x8xf32> to vector<1x8xf32>
    %51 = vector.shape_cast %50 : vector<1x8xf32> to vector<1x8x1xf32>
    %52 = vector.broadcast %51 : vector<1x8x1xf32> to vector<1x8x8xf32>
    %53 = arith.subf %49, %52 : vector<1x8x8xf32>
    %54 = math.exp %53 : vector<1x8x8xf32>
    %cst_24 = arith.constant dense<0.000000e+00> : vector<1x8xf32>
    %55 = vector.multi_reduction <add>, %54, %cst_24 [2] : vector<1x8x8xf32> to vector<1x8xf32>
    %56 = vector.shape_cast %55 : vector<1x8xf32> to vector<1x8x1xf32>
    %57 = tpu.reciprocal %56 {approx = true} : vector<1x8x1xf32> -> vector<1x8x1xf32>
    %58 = vector.broadcast %57 : vector<1x8x1xf32> to vector<1x8x8xf32>
    %59 = arith.mulf %54, %58 : vector<1x8x8xf32>
    "tpu.trace_start"() <{level = 10 : i32, message = "bqk,bkd->bqd"}> : () -> ()
    %cst_25 = arith.constant dense<0.000000e+00> : vector<1x8x8xf32>
    %60 = tpu.matmul %59, %46, %cst_25 {dimension_numbers = #tpu.dot_dimension_numbers<[2], [1], [1], [2], [0, 0, 0, 1, 1, 2], [0], [0]>, precision = #tpu.contract_precision<fp32>} : vector<1x8x8xf32>, vector<1x8x8xf32>, vector<1x8x8xf32> -> vector<1x8x8xf32>
    "tpu.trace_stop"() : () -> ()
    %61 = vector.extract_strided_slice %38 {offsets = [0, 0, 8], sizes = [1, 8, 8], strides = [1, 1, 1]} : vector<1x8x96xf32> to vector<1x8x8xf32>
    %cst_26 = arith.constant 0.353553385 : f32
    %62 = vector.broadcast %cst_26 : f32 to vector<1x8x8xf32>
    %63 = arith.mulf %61, %62 : vector<1x8x8xf32>
    %64 = vector.extract_strided_slice %38 {offsets = [0, 0, 40], sizes = [1, 8, 8], strides = [1, 1, 1]} : vector<1x8x96xf32> to vector<1x8x8xf32>
    %65 = vector.extract_strided_slice %38 {offsets = [0, 0, 72], sizes = [1, 8, 8], strides = [1, 1, 1]} : vector<1x8x96xf32> to vector<1x8x8xf32>
    "tpu.trace_start"() <{level = 10 : i32, message = "bqd,bkd->bqk"}> : () -> ()
    %cst_27 = arith.constant dense<0.000000e+00> : vector<1x8x8xf32>
    %66 = tpu.matmul %63, %64, %cst_27 {dimension_numbers = #tpu.dot_dimension_numbers<[2], [2], [1], [1], [0, 0, 0, 1, 1, 1], [0], [0]>, precision = #tpu.contract_precision<fp32>} : vector<1x8x8xf32>, vector<1x8x8xf32>, vector<1x8x8xf32> -> vector<1x8x8xf32>
    %cst_28 = arith.constant -1.000000e+30 : f32
    "tpu.trace_stop"() : () -> ()
    %67 = vector.broadcast %cst_28 : f32 to vector<1x8x8xf32>
    %68 = arith.select %41, %66, %67 : vector<1x8x8xi1>, vector<1x8x8xf32>
    %cst_29 = arith.constant dense<0xFF800000> : vector<1x8xf32>
    %69 = vector.multi_reduction <maximumf>, %68, %cst_29 [2] : vector<1x8x8xf32> to vector<1x8xf32>
    %70 = vector.shape_cast %69 : vector<1x8xf32> to vector<1x8x1xf32>
    %71 = vector.broadcast %70 : vector<1x8x1xf32> to vector<1x8x8xf32>
    %72 = arith.subf %68, %71 : vector<1x8x8xf32>
    %73 = math.exp %72 : vector<1x8x8xf32>
    %cst_30 = arith.constant dense<0.000000e+00> : vector<1x8xf32>
    %74 = vector.multi_reduction <add>, %73, %cst_30 [2] : vector<1x8x8xf32> to vector<1x8xf32>
    %75 = vector.shape_cast %74 : vector<1x8xf32> to vector<1x8x1xf32>
    %76 = tpu.reciprocal %75 {approx = true} : vector<1x8x1xf32> -> vector<1x8x1xf32>
    %77 = vector.broadcast %76 : vector<1x8x1xf32> to vector<1x8x8xf32>
    %78 = arith.mulf %73, %77 : vector<1x8x8xf32>
    "tpu.trace_start"() <{level = 10 : i32, message = "bqk,bkd->bqd"}> : () -> ()
    %cst_31 = arith.constant dense<0.000000e+00> : vector<1x8x8xf32>
    %79 = tpu.matmul %78, %65, %cst_31 {dimension_numbers = #tpu.dot_dimension_numbers<[2], [1], [1], [2], [0, 0, 0, 1, 1, 2], [0], [0]>, precision = #tpu.contract_precision<fp32>} : vector<1x8x8xf32>, vector<1x8x8xf32>, vector<1x8x8xf32> -> vector<1x8x8xf32>
    "tpu.trace_stop"() : () -> ()
    %80 = vector.extract_strided_slice %38 {offsets = [0, 0, 16], sizes = [1, 8, 8], strides = [1, 1, 1]} : vector<1x8x96xf32> to vector<1x8x8xf32>
    %cst_32 = arith.constant 0.353553385 : f32
    %81 = vector.broadcast %cst_32 : f32 to vector<1x8x8xf32>
    %82 = arith.mulf %80, %81 : vector<1x8x8xf32>
    %83 = vector.extract_strided_slice %38 {offsets = [0, 0, 48], sizes = [1, 8, 8], strides = [1, 1, 1]} : vector<1x8x96xf32> to vector<1x8x8xf32>
    %84 = vector.extract_strided_slice %38 {offsets = [0, 0, 80], sizes = [1, 8, 8], strides = [1, 1, 1]} : vector<1x8x96xf32> to vector<1x8x8xf32>
    "tpu.trace_start"() <{level = 10 : i32, message = "bqd,bkd->bqk"}> : () -> ()
    %cst_33 = arith.constant dense<0.000000e+00> : vector<1x8x8xf32>
    %85 = tpu.matmul %82, %83, %cst_33 {dimension_numbers = #tpu.dot_dimension_numbers<[2], [2], [1], [1], [0, 0, 0, 1, 1, 1], [0], [0]>, precision = #tpu.contract_precision<fp32>} : vector<1x8x8xf32>, vector<1x8x8xf32>, vector<1x8x8xf32> -> vector<1x8x8xf32>
    %cst_34 = arith.constant -1.000000e+30 : f32
    "tpu.trace_stop"() : () -> ()
    %86 = vector.broadcast %cst_34 : f32 to vector<1x8x8xf32>
    %87 = arith.select %41, %85, %86 : vector<1x8x8xi1>, vector<1x8x8xf32>
    %cst_35 = arith.constant dense<0xFF800000> : vector<1x8xf32>
    %88 = vector.multi_reduction <maximumf>, %87, %cst_35 [2] : vector<1x8x8xf32> to vector<1x8xf32>
    %89 = vector.shape_cast %88 : vector<1x8xf32> to vector<1x8x1xf32>
    %90 = vector.broadcast %89 : vector<1x8x1xf32> to vector<1x8x8xf32>
    %91 = arith.subf %87, %90 : vector<1x8x8xf32>
    %92 = math.exp %91 : vector<1x8x8xf32>
    %cst_36 = arith.constant dense<0.000000e+00> : vector<1x8xf32>
    %93 = vector.multi_reduction <add>, %92, %cst_36 [2] : vector<1x8x8xf32> to vector<1x8xf32>
    %94 = vector.shape_cast %93 : vector<1x8xf32> to vector<1x8x1xf32>
    %95 = tpu.reciprocal %94 {approx = true} : vector<1x8x1xf32> -> vector<1x8x1xf32>
    %96 = vector.broadcast %95 : vector<1x8x1xf32> to vector<1x8x8xf32>
    %97 = arith.mulf %92, %96 : vector<1x8x8xf32>
    "tpu.trace_start"() <{level = 10 : i32, message = "bqk,bkd->bqd"}> : () -> ()
    %cst_37 = arith.constant dense<0.000000e+00> : vector<1x8x8xf32>
    %98 = tpu.matmul %97, %84, %cst_37 {dimension_numbers = #tpu.dot_dimension_numbers<[2], [1], [1], [2], [0, 0, 0, 1, 1, 2], [0], [0]>, precision = #tpu.contract_precision<fp32>} : vector<1x8x8xf32>, vector<1x8x8xf32>, vector<1x8x8xf32> -> vector<1x8x8xf32>
    "tpu.trace_stop"() : () -> ()
    %99 = vector.extract_strided_slice %38 {offsets = [0, 0, 24], sizes = [1, 8, 8], strides = [1, 1, 1]} : vector<1x8x96xf32> to vector<1x8x8xf32>
    %cst_38 = arith.constant 0.353553385 : f32
    %100 = vector.broadcast %cst_38 : f32 to vector<1x8x8xf32>
    %101 = arith.mulf %99, %100 : vector<1x8x8xf32>
    %102 = vector.extract_strided_slice %38 {offsets = [0, 0, 56], sizes = [1, 8, 8], strides = [1, 1, 1]} : vector<1x8x96xf32> to vector<1x8x8xf32>
    %103 = vector.extract_strided_slice %38 {offsets = [0, 0, 88], sizes = [1, 8, 8], strides = [1, 1, 1]} : vector<1x8x96xf32> to vector<1x8x8xf32>
    "tpu.trace_start"() <{level = 10 : i32, message = "bqd,bkd->bqk"}> : () -> ()
    %cst_39 = arith.constant dense<0.000000e+00> : vector<1x8x8xf32>
    %104 = tpu.matmul %101, %102, %cst_39 {dimension_numbers = #tpu.dot_dimension_numbers<[2], [2], [1], [1], [0, 0, 0, 1, 1, 1], [0], [0]>, precision = #tpu.contract_precision<fp32>} : vector<1x8x8xf32>, vector<1x8x8xf32>, vector<1x8x8xf32> -> vector<1x8x8xf32>
    %cst_40 = arith.constant -1.000000e+30 : f32
    "tpu.trace_stop"() : () -> ()
    %105 = vector.broadcast %cst_40 : f32 to vector<1x8x8xf32>
    %106 = arith.select %41, %104, %105 : vector<1x8x8xi1>, vector<1x8x8xf32>
    %cst_41 = arith.constant dense<0xFF800000> : vector<1x8xf32>
    %107 = vector.multi_reduction <maximumf>, %106, %cst_41 [2] : vector<1x8x8xf32> to vector<1x8xf32>
    %108 = vector.shape_cast %107 : vector<1x8xf32> to vector<1x8x1xf32>
    %109 = vector.broadcast %108 : vector<1x8x1xf32> to vector<1x8x8xf32>
    %110 = arith.subf %106, %109 : vector<1x8x8xf32>
    %111 = math.exp %110 : vector<1x8x8xf32>
    %cst_42 = arith.constant dense<0.000000e+00> : vector<1x8xf32>
    %112 = vector.multi_reduction <add>, %111, %cst_42 [2] : vector<1x8x8xf32> to vector<1x8xf32>
    %113 = vector.shape_cast %112 : vector<1x8xf32> to vector<1x8x1xf32>
    %114 = tpu.reciprocal %113 {approx = true} : vector<1x8x1xf32> -> vector<1x8x1xf32>
    %115 = vector.broadcast %114 : vector<1x8x1xf32> to vector<1x8x8xf32>
    %116 = arith.mulf %111, %115 : vector<1x8x8xf32>
    "tpu.trace_start"() <{level = 10 : i32, message = "bqk,bkd->bqd"}> : () -> ()
    %cst_43 = arith.constant dense<0.000000e+00> : vector<1x8x8xf32>
    %117 = tpu.matmul %116, %103, %cst_43 {dimension_numbers = #tpu.dot_dimension_numbers<[2], [1], [1], [2], [0, 0, 0, 1, 1, 2], [0], [0]>, precision = #tpu.contract_precision<fp32>} : vector<1x8x8xf32>, vector<1x8x8xf32>, vector<1x8x8xf32> -> vector<1x8x8xf32>
    "tpu.trace_stop"() : () -> ()
    %118 = tpu.concatenate %60, %79, %98, %117 in 2 : vector<1x8x8xf32>, vector<1x8x8xf32>, vector<1x8x8xf32>, vector<1x8x8xf32> -> vector<1x8x32xf32>
    %119 = vector.shape_cast %118 : vector<1x8x32xf32> to vector<8x32xf32>
    %c0_44 = arith.constant 0 : index
    %c0_45 = arith.constant 0 : index
    %c0_46 = arith.constant 0 : index
    %120 = vector.load %arg11[%c0_44, %c0_45, %c0_46] : memref<1x32x32xf32, #tpu.memory_space<vmem>>, vector<1x32x32xf32>
    %121 = vector.shape_cast %120 : vector<1x32x32xf32> to vector<32x32xf32>
    %cst_47 = arith.constant dense<0.000000e+00> : vector<8x32xf32>
    %122 = tpu.matmul %119, %121, %cst_47 {dimension_numbers = #tpu.dot_dimension_numbers<[1], [0], [0], [1], [0, 0, 1, 1], [], []>, precision = #tpu.contract_precision<fp32>} : vector<8x32xf32>, vector<32x32xf32>, vector<8x32xf32> -> vector<8x32xf32>
    %123 = arith.addf %4, %122 : vector<8x32xf32>
    %c0_48 = arith.constant 0 : index
    %c0_49 = arith.constant 0 : index
    %c0_50 = arith.constant 0 : index
    %124 = vector.load %arg12[%c0_48, %c0_49, %c0_50] : memref<1x1x32xf32, #tpu.memory_space<vmem>>, vector<1x1x32xf32>
    %125 = vector.shape_cast %124 : vector<1x1x32xf32> to vector<1x32xf32>
    %126 = vector.broadcast %125 : vector<1x32xf32> to vector<8x32xf32>
    %127 = arith.addf %123, %126 : vector<8x32xf32>
    %c0_51 = arith.constant 0 : index
    %c0_52 = arith.constant 0 : index
    %c0_53 = arith.constant 0 : index
    %128 = vector.load %arg13[%c0_51, %c0_52, %c0_53] : memref<1x1x32xf32, #tpu.memory_space<vmem>>, vector<1x1x32xf32>
    %129 = vector.shape_cast %128 : vector<1x1x32xf32> to vector<1x32xf32>
    %c0_54 = arith.constant 0 : index
    %c0_55 = arith.constant 0 : index
    %c0_56 = arith.constant 0 : index
    %130 = vector.load %arg14[%c0_54, %c0_55, %c0_56] : memref<1x1x32xf32, #tpu.memory_space<vmem>>, vector<1x1x32xf32>
    %131 = vector.shape_cast %130 : vector<1x1x32xf32> to vector<1x32xf32>
    %cst_57 = arith.constant dense<0.000000e+00> : vector<8xf32>
    %132 = vector.multi_reduction <add>, %127, %cst_57 [1] : vector<8x32xf32> to vector<8xf32>
    %133 = vector.shape_cast %132 : vector<8xf32> to vector<8x1xf32>
    %cst_58 = arith.constant 3.200000e+01 : f32
    %134 = vector.broadcast %cst_58 : f32 to vector<8x1xf32>
    %135 = arith.divf %133, %134 : vector<8x1xf32>
    %136 = vector.broadcast %135 : vector<8x1xf32> to vector<8x32xf32>
    %137 = arith.subf %127, %136 : vector<8x32xf32>
    %138 = arith.mulf %137, %137 : vector<8x32xf32>
    %cst_59 = arith.constant dense<0.000000e+00> : vector<8xf32>
    %139 = vector.multi_reduction <add>, %138, %cst_59 [1] : vector<8x32xf32> to vector<8xf32>
    %140 = vector.shape_cast %139 : vector<8xf32> to vector<8x1xf32>
    %cst_60 = arith.constant 3.200000e+01 : f32
    %141 = vector.broadcast %cst_60 : f32 to vector<8x1xf32>
    %142 = arith.divf %140, %141 : vector<8x1xf32>
    %143 = vector.broadcast %135 : vector<8x1xf32> to vector<8x32xf32>
    %144 = arith.subf %127, %143 : vector<8x32xf32>
    %cst_61 = arith.constant 9.99999974E-6 : f32
    %145 = vector.broadcast %cst_61 : f32 to vector<8x1xf32>
    %146 = arith.addf %142, %145 : vector<8x1xf32>
    %147 = math.rsqrt %146 : vector<8x1xf32>
    %148 = vector.broadcast %147 : vector<8x1xf32> to vector<8x32xf32>
    %149 = arith.mulf %144, %148 : vector<8x32xf32>
    %150 = vector.broadcast %129 : vector<1x32xf32> to vector<8x32xf32>
    %151 = arith.mulf %149, %150 : vector<8x32xf32>
    %152 = vector.broadcast %131 : vector<1x32xf32> to vector<8x32xf32>
    %153 = arith.addf %151, %152 : vector<8x32xf32>
    %c0_62 = arith.constant 0 : index
    %c0_63 = arith.constant 0 : index
    %c0_64 = arith.constant 0 : index
    %154 = vector.load %arg15[%c0_62, %c0_63, %c0_64] : memref<1x32x128xf32, #tpu.memory_space<vmem>>, vector<1x32x128xf32>
    %155 = vector.shape_cast %154 : vector<1x32x128xf32> to vector<32x128xf32>
    %cst_65 = arith.constant dense<0.000000e+00> : vector<8x128xf32>
    %156 = tpu.matmul %153, %155, %cst_65 {dimension_numbers = #tpu.dot_dimension_numbers<[1], [0], [0], [1], [0, 0, 1, 1], [], []>, precision = #tpu.contract_precision<fp32>} : vector<8x32xf32>, vector<32x128xf32>, vector<8x128xf32> -> vector<8x128xf32>
    %c0_66 = arith.constant 0 : index
    %c0_67 = arith.constant 0 : index
    %c0_68 = arith.constant 0 : index
    %157 = vector.load %arg16[%c0_66, %c0_67, %c0_68] : memref<1x1x128xf32, #tpu.memory_space<vmem>>, vector<1x1x128xf32>
    %158 = vector.shape_cast %157 : vector<1x1x128xf32> to vector<1x128xf32>
    %159 = vector.broadcast %158 : vector<1x128xf32> to vector<8x128xf32>
    %160 = arith.addf %156, %159 : vector<8x128xf32>
    %cst_69 = arith.constant 1.702000e+00 : f32
    %161 = vector.broadcast %cst_69 : f32 to vector<8x128xf32>
    %162 = arith.mulf %161, %160 : vector<8x128xf32>
    %163 = arith.negf %162 : vector<8x128xf32>
    %164 = math.exp %163 : vector<8x128xf32>
    %cst_70 = arith.constant 1.000000e+00 : f32
    %165 = vector.broadcast %cst_70 : f32 to vector<8x128xf32>
    %166 = arith.addf %165, %164 : vector<8x128xf32>
    %167 = arith.divf %165, %166 : vector<8x128xf32>
    %168 = arith.mulf %160, %167 : vector<8x128xf32>
    %c0_71 = arith.constant 0 : index
    %c0_72 = arith.constant 0 : index
    %c0_73 = arith.constant 0 : index
    %169 = vector.load %arg17[%c0_71, %c0_72, %c0_73] : memref<1x128x32xf32, #tpu.memory_space<vmem>>, vector<1x128x32xf32>
    %170 = vector.shape_cast %169 : vector<1x128x32xf32> to vector<128x32xf32>
    %cst_74 = arith.constant dense<0.000000e+00> : vector<8x32xf32>
    %171 = tpu.matmul %168, %170, %cst_74 {dimension_numbers = #tpu.dot_dimension_numbers<[1], [0], [0], [1], [0, 0, 1, 1], [], []>, precision = #tpu.contract_precision<fp32>} : vector<8x128xf32>, vector<128x32xf32>, vector<8x32xf32> -> vector<8x32xf32>
    %172 = arith.addf %127, %171 : vector<8x32xf32>
    %c0_75 = arith.constant 0 : index
    %c0_76 = arith.constant 0 : index
    %c0_77 = arith.constant 0 : index
    %173 = vector.load %arg18[%c0_75, %c0_76, %c0_77] : memref<1x1x32xf32, #tpu.memory_space<vmem>>, vector<1x1x32xf32>
    %174 = vector.shape_cast %173 : vector<1x1x32xf32> to vector<1x32xf32>
    %175 = vector.broadcast %174 : vector<1x32xf32> to vector<8x32xf32>
    %176 = arith.addf %172, %175 : vector<8x32xf32>
    %177 = vector.shape_cast %176 : vector<8x32xf32> to vector<1x8x32xf32>
    %c0_78 = arith.constant 0 : index
    %c0_79 = arith.constant 0 : index
    %c0_80 = arith.constant 0 : index
    %178 = vector.load %arg23[%c0_78, %c0_79, %c0_80] : memref<1x8x32xf32, #tpu.memory_space<vmem>>, vector<1x8x32xf32>
    tpu.vector_store %arg23[%c0_78, %c0_79, %c0_80], %177 {strides = array<i32>} : memref<1x8x32xf32, #tpu.memory_space<vmem>>, vector<1x8x32xf32>,
    %c1_i32 = arith.constant 1 : i32
    %179 = arith.cmpi eq, %arg1, %c1_i32 : i32
    %180 = arith.extui %179 : i1 to i32
    %c0_i32_81 = arith.constant 0 : i32
    %181 = arith.cmpi ne, %180, %c0_i32_81 : i32
    scf.if %181 {
      %182 = vector.extract_strided_slice %177 {offsets = [0, 0, 0], sizes = [1, 1, 32], strides = [1, 1, 1]} : vector<1x8x32xf32> to vector<1x1x32xf32>
      %183 = vector.shape_cast %182 : vector<1x1x32xf32> to vector<1x32xf32>
      %c0_82 = arith.constant 0 : index
      %c0_83 = arith.constant 0 : index
      %184 = vector.load %arg19[%c0_82, %c0_83] : memref<1x32xf32, #tpu.memory_space<vmem>>, vector<1x32xf32>
      %c0_84 = arith.constant 0 : index
      %c0_85 = arith.constant 0 : index
      %185 = vector.load %arg20[%c0_84, %c0_85] : memref<1x32xf32, #tpu.memory_space<vmem>>, vector<1x32xf32>
      %cst_86 = arith.constant dense<0.000000e+00> : vector<1xf32>
      %186 = vector.multi_reduction <add>, %183, %cst_86 [1] : vector<1x32xf32> to vector<1xf32>
      %187 = vector.shape_cast %186 : vector<1xf32> to vector<1x1xf32>
      %cst_87 = arith.constant 3.200000e+01 : f32
      %188 = vector.broadcast %cst_87 : f32 to vector<1x1xf32>
      %189 = arith.divf %187, %188 : vector<1x1xf32>
      %190 = vector.broadcast %189 : vector<1x1xf32> to vector<1x32xf32>
      %191 = arith.subf %183, %190 : vector<1x32xf32>
      %192 = arith.mulf %191, %191 : vector<1x32xf32>
      %cst_88 = arith.constant dense<0.000000e+00> : vector<1xf32>
      %193 = vector.multi_reduction <add>, %192, %cst_88 [1] : vector<1x32xf32> to vector<1xf32>
      %194 = vector.shape_cast %193 : vector<1xf32> to vector<1x1xf32>
      %cst_89 = arith.constant 3.200000e+01 : f32
      %195 = vector.broadcast %cst_89 : f32 to vector<1x1xf32>
      %196 = arith.divf %194, %195 : vector<1x1xf32>
      %197 = vector.broadcast %189 : vector<1x1xf32> to vector<1x32xf32>
      %198 = arith.subf %183, %197 : vector<1x32xf32>
      %cst_90 = arith.constant 9.99999974E-6 : f32
      %199 = vector.broadcast %cst_90 : f32 to vector<1x1xf32>
      %200 = arith.addf %196, %199 : vector<1x1xf32>
      %201 = math.rsqrt %200 : vector<1x1xf32>
      %202 = vector.broadcast %201 : vector<1x1xf32> to vector<1x32xf32>
      %203 = arith.mulf %198, %202 : vector<1x32xf32>
      %204 = arith.mulf %203, %184 : vector<1x32xf32>
      %205 = arith.addf %204, %185 : vector<1x32xf32>
      %c0_91 = arith.constant 0 : index
      %c0_92 = arith.constant 0 : index
      %206 = vector.load %arg21[%c0_91, %c0_92] : memref<32x16xf32, #tpu.memory_space<vmem>>, vector<32x16xf32>
      %cst_93 = arith.constant dense<0.000000e+00> : vector<1x16xf32>
      %207 = tpu.matmul %205, %206, %cst_93 {dimension_numbers = #tpu.dot_dimension_numbers<[1], [0], [0], [1], [0, 0, 1, 1], [], []>, precision = #tpu.contract_precision<fp32>} : vector<1x32xf32>, vector<32x16xf32>, vector<1x16xf32> -> vector<1x16xf32>
      %c0_94 = arith.constant 0 : index
      %c0_95 = arith.constant 0 : index
      %c0_96 = arith.constant 0 : index
      %208 = vector.load %arg22[%c0_94, %c0_95, %c0_96] : memref<1x1x16xf32, #tpu.memory_space<vmem>>, vector<1x1x16xf32>
      %209 = vector.shape_cast %208 : vector<1x1x16xf32> to vector<1x16xf32>
      %210 = vector.shape_cast %207 : vector<1x16xf32> to vector<1x1x16xf32>
      tpu.vector_store %arg22[%c0_94, %c0_95, %c0_96], %210 {strides = array<i32>} : memref<1x1x16xf32, #tpu.memory_space<vmem>>, vector<1x1x16xf32>,
    } else {
    }
    return
  }
  func.func @transform_0(%arg0: i32, %arg1: i32) -> (i32, i32, i32) {
    %c0_i32 = arith.constant 0 : i32
    %c0_i32_0 = arith.constant 0 : i32
    %c0_i32_1 = arith.constant 0 : i32
    return %arg0, %c0_i32, %c0_i32_0 : i32, i32, i32
  }
  func.func @transform_1(%arg0: i32, %arg1: i32) -> (i32, i32) {
    %c0_i32 = arith.constant 0 : i32
    %c0_i32_0 = arith.constant 0 : i32
    %c0_i32_1 = arith.constant 0 : i32
    return %c0_i32, %c0_i32_0 : i32, i32
  }
  func.func @transform_2(%arg0: i32, %arg1: i32) -> (i32, i32) {
    %c0_i32 = arith.constant 0 : i32
    %c0_i32_0 = arith.constant 0 : i32
    %c0_i32_1 = arith.constant 0 : i32
    return %c0_i32, %c0_i32_0 : i32, i32
  }
  func.func @transform_3(%arg0: i32, %arg1: i32) -> (i32, i32) {
    %c0_i32 = arith.constant 0 : i32
    %c0_i32_0 = arith.constant 0 : i32
    %c0_i32_1 = arith.constant 0 : i32
    return %c0_i32, %c0_i32_0 : i32, i32
  }
  func.func @transform_4(%arg0: i32, %arg1: i32) -> (i32, i32) {
    %c0_i32 = arith.constant 0 : i32
    %c0_i32_0 = arith.constant 0 : i32
    %c0_i32_1 = arith.constant 0 : i32
    return %c0_i32, %c0_i32_0 : i32, i32
  }
  func.func @transform_5(%arg0: i32, %arg1: i32) -> (i32, i32, i32) {
    %c0_i32 = arith.constant 0 : i32
    %c0_i32_0 = arith.constant 0 : i32
    %c0_i32_1 = arith.constant 0 : i32
    return %arg1, %c0_i32, %c0_i32_0 : i32, i32, i32
  }
  func.func @transform_6(%arg0: i32, %arg1: i32) -> (i32, i32, i32) {
    %c0_i32 = arith.constant 0 : i32
    %c0_i32_0 = arith.constant 0 : i32
    %c0_i32_1 = arith.constant 0 : i32
    return %arg1, %c0_i32, %c0_i32_0 : i32, i32, i32
  }
  func.func @transform_7(%arg0: i32, %arg1: i32) -> (i32, i32, i32) {
    %c0_i32 = arith.constant 0 : i32
    %c0_i32_0 = arith.constant 0 : i32
    %c0_i32_1 = arith.constant 0 : i32
    return %arg1, %c0_i32, %c0_i32_0 : i32, i32, i32
  }
  func.func @transform_8(%arg0: i32, %arg1: i32) -> (i32, i32, i32) {
    %c0_i32 = arith.constant 0 : i32
    %c0_i32_0 = arith.constant 0 : i32
    %c0_i32_1 = arith.constant 0 : i32
    return %arg1, %c0_i32, %c0_i32_0 : i32, i32, i32
  }
  func.func @transform_9(%arg0: i32, %arg1: i32) -> (i32, i32, i32) {
    %c0_i32 = arith.constant 0 : i32
    %c0_i32_0 = arith.constant 0 : i32
    %c0_i32_1 = arith.constant 0 : i32
    return %arg1, %c0_i32, %c0_i32_0 : i32, i32, i32
  }
  func.func @transform_10(%arg0: i32, %arg1: i32) -> (i32, i32, i32) {
    %c0_i32 = arith.constant 0 : i32
    %c0_i32_0 = arith.constant 0 : i32
    %c0_i32_1 = arith.constant 0 : i32
    return %arg1, %c0_i32, %c0_i32_0 : i32, i32, i32
  }
  func.func @transform_11(%arg0: i32, %arg1: i32) -> (i32, i32, i32) {
    %c0_i32 = arith.constant 0 : i32
    %c0_i32_0 = arith.constant 0 : i32
    %c0_i32_1 = arith.constant 0 : i32
    return %arg1, %c0_i32, %c0_i32_0 : i32, i32, i32
  }
  func.func @transform_12(%arg0: i32, %arg1: i32) -> (i32, i32, i32) {
    %c0_i32 = arith.constant 0 : i32
    %c0_i32_0 = arith.constant 0 : i32
    %c0_i32_1 = arith.constant 0 : i32
    return %arg1, %c0_i32, %c0_i32_0 : i32, i32, i32
  }
  func.func @transform_13(%arg0: i32, %arg1: i32) -> (i32, i32, i32) {
    %c0_i32 = arith.constant 0 : i32
    %c0_i32_0 = arith.constant 0 : i32
    %c0_i32_1 = arith.constant 0 : i32
    return %arg1, %c0_i32, %c0_i32_0 : i32, i32, i32
  }
  func.func @transform_14(%arg0: i32, %arg1: i32) -> (i32, i32, i32) {
    %c0_i32 = arith.constant 0 : i32
    %c0_i32_0 = arith.constant 0 : i32
    %c0_i32_1 = arith.constant 0 : i32
    return %arg1, %c0_i32, %c0_i32_0 : i32, i32, i32
  }
  func.func @transform_15(%arg0: i32, %arg1: i32) -> (i32, i32, i32) {
    %c0_i32 = arith.constant 0 : i32
    %c0_i32_0 = arith.constant 0 : i32
    %c0_i32_1 = arith.constant 0 : i32
    return %arg1, %c0_i32, %c0_i32_0 : i32, i32, i32
  }
  func.func @transform_16(%arg0: i32, %arg1: i32) -> (i32, i32, i32) {
    %c0_i32 = arith.constant 0 : i32
    %c0_i32_0 = arith.constant 0 : i32
    %c0_i32_1 = arith.constant 0 : i32
    return %arg1, %c0_i32, %c0_i32_0 : i32, i32, i32
  }
  func.func @transform_17(%arg0: i32, %arg1: i32) -> (i32, i32) {
    %c0_i32 = arith.constant 0 : i32
    %c0_i32_0 = arith.constant 0 : i32
    %c0_i32_1 = arith.constant 0 : i32
    return %c0_i32, %c0_i32_0 : i32, i32
  }
  func.func @transform_18(%arg0: i32, %arg1: i32) -> (i32, i32) {
    %c0_i32 = arith.constant 0 : i32
    %c0_i32_0 = arith.constant 0 : i32
    %c0_i32_1 = arith.constant 0 : i32
    return %c0_i32, %c0_i32_0 : i32, i32
  }
  func.func @transform_19(%arg0: i32, %arg1: i32) -> (i32, i32) {
    %c0_i32 = arith.constant 0 : i32
    %c0_i32_0 = arith.constant 0 : i32
    %c0_i32_1 = arith.constant 0 : i32
    return %c0_i32, %c0_i32_0 : i32, i32
  }
  func.func @transform_20(%arg0: i32, %arg1: i32) -> (i32, i32, i32) {
    %c0_i32 = arith.constant 0 : i32
    %c0_i32_0 = arith.constant 0 : i32
    %c0_i32_1 = arith.constant 0 : i32
    return %arg0, %c0_i32, %c0_i32_0 : i32, i32, i32
  }
}

</mosaic_0001>

<bundles_post_ra>
// kernel: vit_forward.1
= control target key start
LH: loop header
LB: loop body
LE: loop exit
PB: predicated region body
PF: predicated region fallthrough
CT: control target
= control target key end

     0   :  { %s11559_s0 = inlined_call_operand.vmem [shape: f32[2,8,192], index: 0, kind: input, shape index: {}]   ;;  %s11560_s1 = inlined_call_operand.vmem [shape: f32[8,32], index: 1, kind: input, shape index: {}]   ;;  %s11561_s2 = inlined_call_operand.vmem [shape: f32[192,32], index: 2, kind: input, shape index: {}]   ;;  %s11562_s3 = inlined_call_operand.vmem [shape: f32[1,32], index: 3, kind: input, shape index: {}]   ;;  %s11563_s4 = inlined_call_operand.vmem [shape: f32[1,32], index: 4, kind: input, shape index: {}]   ;;  %s11564_s5 = inlined_call_operand.vmem [shape: f32[2,1,32], index: 5, kind: input, shape index: {}]   ;;  %s11565_s6 = inlined_call_operand.vmem [shape: f32[2,1,32], index: 6, kind: input, shape index: {}]   ;;  %s11566_s7 = inlined_call_operand.vmem [shape: f32[2,32,96], index: 7, kind: input, shape index: {}]   ;;  %s11567_s8 = inlined_call_operand.vmem [shape: f32[2,1,96], index: 8, kind: input, shape index: {}]   ;;  %s11568_s9 = inlined_call_operand.vmem [shape: f32[2,32,32], index: 9, kind: input, shape index: {}]   ;;  %s11569_s10 = inlined_call_operand.vmem [shape: f32[2,1,32], index: 10, kind: input, shape index: {}]   ;;  %s11570_s11 = inlined_call_operand.vmem [shape: f32[2,1,32], index: 11, kind: input, shape index: {}]   ;;  %s11571_s12 = inlined_call_operand.vmem [shape: f32[2,1,32], index: 12, kind: input, shape index: {}]   ;;  %s11572_s13 = inlined_call_operand.vmem [shape: f32[2,32,128], index: 13, kind: input, shape index: {}]   ;;  %s11573_s14 = inlined_call_operand.vmem [shape: f32[2,1,128], index: 14, kind: input, shape index: {}]   ;;  %s11574_s15 = inlined_call_operand.vmem [shape: f32[2,128,32], index: 15, kind: input, shape index: {}]   ;;  %s11575_s16 = inlined_call_operand.vmem [shape: f32[2,1,32], index: 16, kind: input, shape index: {}]   ;;  %s11576_s17 = inlined_call_operand.vmem [shape: f32[1,32], index: 17, kind: input, shape index: {}]   ;;  %s11577_s18 = inlined_call_operand.vmem [shape: f32[1,32], index: 18, kind: input, shape index: {}]   ;;  %s11578_s19 = inlined_call_operand.vmem [shape: f32[32,16], index: 19, kind: input, shape index: {}]   ;;  %s11579_s20 = inlined_call_operand.hbm [shape: f32[2,1,16], index: 20, kind: output, shape index: {}]  }
   0x1   :  { %11626 = sst [smem:[#allocation20_spill]] %s11559_s0 }
   0x2   :  { %11627 = sst [smem:[#allocation21_spill]] %s11560_s1 }
   0x3   :  { %11628 = sst [smem:[#allocation22_spill]] %s11561_s2 }
   0x4   :  { %11629 = sst [smem:[#allocation23_spill]] %s11562_s3 }
   0x5   :  { %11630 = sst [smem:[#allocation24_spill]] %s11563_s4 }
   0x6   :  { %11631 = sst [smem:[#allocation25_spill]] %s11565_s6 }
   0x7   :  { %11632 = sst [smem:[#allocation26_spill]] %s11566_s7 }
   0x8   :  { %11633 = sst [smem:[#allocation27_spill]] %s11568_s9 }
   0x9   :  { %11634 = sst [smem:[#allocation28_spill]] %s11576_s17 }
   0xa   :  { %11635 = sst [smem:[#allocation29_spill]] %s11577_s18 }
   0xb   :  { %11636 = sst [smem:[#allocation30_spill]] %s11578_s19 }
   0xc   :  { %11637 = sst [smem:[#allocation31_spill]] %s11579_s20 }
   0xd   :  { %25 = vsyncpa [#allocation4], 0 }
   0xe   :  { %27 = vsyncpa [#allocation4 + $0x1], 0  ;;  %s9707_s1 = smov 0   ;;  %s9709_s22 = smov 0  }
   0xf   :  { %s9711_s23 = smov 0   ;;  %s9713_s24 = smov 0  }
  0x10   :  { %s9715_s2 = smov 0   ;;  %s9717_s25 = smov 0  }
  0x11   :  { %s9719_s3 = smov 0   ;;  %s9721_s26 = smov 0  }
  0x12 LB: > { %11638 = sst [smem:[#allocation6_spill]] %s9552_s1  ;;  %s8301_s27 = sadd.s32 4294967295, %s9580_s26   ;;  %s9580_s26 = sphi %s9721_s26, %s33_s26   ;;  %s9576_s3 = sphi %s9719_s3, %s11729_s3   ;;  %s9572_s25 = sphi %s9717_s25, %s11728_s25   ;;  %s9568_s2 = sphi %s9715_s2, %s11727_s2   ;;  %s9564_s24 = sphi %s9713_s24, %s11726_s24   ;;  %s9560_s23 = sphi %s9711_s23, %s11725_s23   ;;  %s9556_s22 = sphi %s9709_s22, %s11731_s22   ;;  %s9552_s1 = sphi %s9707_s1, %s11730_s1  }
  0x13   : > { %11639 = sst [smem:[#allocation7_spill]] %s9560_s23  ;;  %s8302_s28 = sadd.s32 4294967294, %s9580_s26  }
  0x14   : > { %11640 = sst [smem:[#allocation8_spill]] %s9564_s24  ;;  %s42_s4 = sadd.s32 1, %s9572_s25 }
  0x15   : > { %11641 = sst [smem:[#allocation9_spill]] %s9568_s2  ;;  %p43_p0 = scmp.ge.s32.totalorder %s42_s4, 2 }
  0x16   : > { %11642 = sst [smem:[#allocation10_spill]] %s9572_s25  ;;  %s45_s29 = sadd.s32 1, %s9576_s3 }
  0x17   : > { %11643 = sst [smem:[#allocation11_spill]] %s9576_s3  ;;  %p547_p1 = scmp.ne.s32.totalorder %s9560_s23, %s9556_s22 }
  0x18   : > { %11644 = sst [smem:[#allocation12_spill]] %s9580_s26  ;;  %p548_p2 = scmp.eq.s32.totalorder %s8301_s27, 3 }
  0x19   : > { %s11733_s4 = smov (%p43_p0, %s42_s4), 0  ;;  %s11735_s29 = smov (!%p43_p0, %s45_s29), %s9576_s3 }
  0x1a   : > { %11645 = sst [smem:[#allocation13_spill]] %s11733_s4  ;;  %p9756_p3 = por %p548_p2, %p547_p1 }
  0x1b   : > { %p553_p4 = scmp.ne.s32.totalorder %s9556_s22, %s9552_s1  ;;  %p47_p5 = scmp.ge.s32.totalorder %s11735_s29, 2 }
  0x1c   : > { %s11646_s30 = scalar_select %p9756_p3, 1, 0 }
  0x1d   : > { %p554_p6 = scmp.eq.s32.totalorder %s8302_s28, 3  ;;  %p8305_p7 = scmp.ge.s32.totalorder %s9580_s26, 1 }
  0x1e   : > { %11647 = sst [smem:[#allocation14_spill]] %s11646_s30  ;;  %p681_p8 = scmp.lt.s32.totalorder %s9580_s26, 5 }
  0x1f   : > { %s11737_s29 = smov (%p47_p5, %s11735_s29), 0  ;;  %p9766_p9 = por %p554_p6, %p553_p4 }
  0x20   : > { %11648 = sst [smem:[#allocation15_spill]] %s11737_s29  ;;  %p682_p10 = pnand %p8305_p7, %p681_p8 }
  0x21   : > { %s11649_s0 = scalar_select %p9766_p9, 1, 0 }
  0x22   : > { %s534_s21 = ssub.s32 %s9576_s3, %s11737_s29  ;;  %s537_s27 = sadd.s32 1, %s9560_s23 }
  0x23   : > { %11650 = sst [smem:[#allocation16_spill]] %s11649_s0  ;;  %p535_p11 = scmp.eq.s32.totalorder %s534_s21, 0 }
  0x24   : > { %685 = sbr.rel (%p682_p10) target bundleno = 5511 (0x1587), region = 100  ;;  %p782_p12 = scmp.lt.s32.totalorder (!%p682_p10), %s9568_s2, 1 }
  0x25   : > { %s9774_s4 = scalar_select %p535_p11, %s9560_s23, %s537_s27  }
  0x26   : > { %p787_p13 = scmp.lt.s32.totalorder (!%p682_p10), %s9564_s24, 1  ;;  %s11652_s3 = sld [smem:[#allocation20_spill]] (!%p682_p10) }
  0x27   : > { %11651 = sst [smem:[#allocation17_spill]] %s9774_s4  ;;  %s11656_s17 = sand.u32 (!%p682_p10), 1, %s9556_s22  }
  0x28   : > { %s11654_s7 = sld [smem:[#allocation26_spill]] (!%p682_p10)  ;;  %s9844_s18 = scalar_lea.vmem (!%p682_p10), [#allocation3], %s11656_s17 }
  0x29   : > { %s783_s25 = scalar_select %p782_p12, %s9568_s2, 1 }
  0x2a   : > { %s9781_s1 = scalar_select %p787_p13, %s9564_s24, 1 }
  0x2b   : > { %s8332_s21 = sshll.u32 %s783_s25, 4  ;;  %s11655_s9 = sld [smem:[#allocation27_spill]] }
  0x2c   : > { %s9786_s28 = scalar_lea.vmem %s11652_s3, %s8332_s21  ;;  %s8333_s2 = sshll.u32 %s9781_s1, 5 }
  0x2d   : > { %s9826_s25 = scalar_lea.vmem %s11572_s13, %s8333_s2  ;;  %s830_s20 = scalar_lea.vmem %s11575_s16, %s9781_s1 }
  0x2e   : > { %s9800_s19 = scalar_lea.vmem %s11654_s7, %s8333_s2  ;;  %s11657_s6 = sld [smem:[#allocation8_spill]] }
  0x31   : > { %s9809_s27 = scalar_lea.vmem %s11655_s9, %s8333_s2  ;;  %s8336_s9 = sshll.u32 %s9781_s1, 7 }
  0x32   : > { %s9840_s0 = scalar_lea.vmem %s11574_s15, %s8336_s9 }
  0x34   : > { %p8316_p0 = scmp.ne.s32.totalorder %s11657_s6, 0 }
  0x36   : > { %834 = sbr.rel (%p8316_p0) target bundleno = 730 (0x2da), region = 104 }
  0x3b   : > { %s11658_s3 = sld [smem:[#allocation22_spill]]  ;;  %v9582_v3 = vmov 0.0   ;;  %vm861_vm0 = vcmask 523264   ;;  %vm1627_vm1 = vcmask 261120  }
  0x3c   : > { %865 = vmatprep.subr.mxu0 %v9582_v3  ;;  %969 = vmatprep.subr.mxu1 %v9582_v3  ;;  %s11693_s2 = sld [smem:[#allocation21_spill]] }
  0x3d   : > { %s11694_s23 = sld [smem:[#allocation23_spill]] }
  0x3e   : > { %s11695_s9 = sld [smem:[#allocation24_spill]] }
  0x41   : > { %s11659_s21 = smov %s11658_s3  ;;  %v852_v0 = vld [vmem:[%s11658_s3 + $0x78] sm:$0xff] }
  0x42   : > { %v851_v1 = vld [vmem:[%s11659_s21 + $0x70] sm:$0xff]  ;;  %v850_v2 = vld [vmem:[%s11659_s21 + $0x68] sm:$0xff]  ;;  %v9857_v4 = vand.u32 4294901760, %v852_v0  ;;  %v849_v7 = vld [vmem:[%s11659_s21 + $0x60] sm:$0xff] }
  0x43   : > { %v9859_v5 = vand.u32 4294901760, %v851_v1  ;;  %v9861_v6 = vand.u32 4294901760, %v850_v2  ;;  %v848_v8 = vld [vmem:[%s11659_s21 + $0x58] sm:$0xff]  ;;  %v847_v9 = vld [vmem:[%s11659_s21 + $0x50] sm:$0xff]  ;;  %v9873_v10 = vand.u32 4294901760, %v849_v7  ;;  %v846_v13 = vld [vmem:[%s11659_s21 + $0x48] sm:$0xff] }
  0x44   : > { %v9875_v11 = vand.u32 4294901760, %v848_v8  ;;  %v9877_v12 = vand.u32 4294901760, %v847_v9  ;;  %v845_v14 = vld [vmem:[%s11659_s21 + $0x40] sm:$0xff]  ;;  %867 = vmatpush1.msra.mxu0 %v9857_v4  ;;  %v9887_v15 = vsub.f32 %v852_v0, %v9857_v4  ;;  %v9892_v17 = vand.u32 4294901760, %v846_v13  ;;  %v844_v19 = vld [vmem:[%s11659_s21 + $0x38] sm:$0xff]  ;;  %v843_v26 = vld [vmem:[%s11659_s21 + $0x30] sm:$0xff] }
  0x45   : > { %v9890_v16 = vsub.f32 %v851_v1, %v9859_v5  ;;  %v9895_v18 = vsub.f32 %v850_v2, %v9861_v6  ;;  %868 = vmatprep.subr.mxu0 %v9582_v3  ;;  %v9902_v20 = vsub.f32 %v849_v7, %v9873_v10  ;;  %v9911_v25 = vand.u32 4294901760, %v845_v14  ;;  %v842_v34 = vld [vmem:[%s11659_s21 + $0x28] sm:$0xff]  ;;  %v841_v41 = vld [vmem:[%s11659_s21 + $0x20] sm:$0xff]  ;;  %v840_v47 = vld [vmem:[%s11659_s21 + $0x18] sm:$0xff] }
  0x46   : > { %v9905_v21 = vsub.f32 %v848_v8, %v9875_v11  ;;  %870 = vmatpush1.msra.mxu0 %v9859_v5  ;;  %v11611_v22 = vand.u32 4294901760, %v9887_v15  ;;  %v9918_v28 = vand.u32 4294901760, %v844_v19  ;;  %v9922_v30 = vsub.f32 %v847_v9, %v9877_v12  ;;  %v839_v53 = vld [vmem:[%s11659_s21 + $0x10] sm:$0xff]  ;;  %v838_v61 = vld [vmem:[%s11659_s21 + $0x8] sm:$0xff]  ;;  %v837_v1 = vld [vmem:[%s11659_s21] sm:$0xff] }
  0x47   : > { %v11610_v23 = vand.u32 4294901760, %v9890_v16  ;;  %v11608_v24 = vand.u32 4294901760, %v9895_v18  ;;  %871 = vmatprep.subr.mxu0 %v9582_v3  ;;  %v11607_v27 = vand.u32 4294901760, %v9902_v20  ;;  %v9938_v35 = vsub.f32 %v846_v13, %v9892_v17 }
  0x48   : > { %v11605_v29 = vand.u32 4294901760, %v9905_v21  ;;  %873 = vmatpush1.msra.mxu0 %v9861_v6  ;;  %v973_v31 = vsub.f32 %v9887_v15, %v11611_v22  ;;  %v9941_v36 = vand.u32 4294901760, %v843_v26  ;;  %v11604_v40 = vand.u32 4294901760, %v9922_v30 }
  0x49   : > { %v980_v32 = vsub.f32 %v9890_v16, %v11610_v23  ;;  %v987_v33 = vsub.f32 %v9895_v18, %v11608_v24  ;;  %874 = vmatprep.subr.mxu0 %v9582_v3  ;;  %v994_v39 = vsub.f32 %v9902_v20, %v11607_v27  ;;  %v9952_v42 = vand.u32 4294901760, %v842_v34  ;;  %v853_v27 = vld [vmem:[%s11659_s21 + $0x80] sm:$0xff] }
  0x4a   : > { %876 = vmatpush1.msra.mxu0 %v9873_v10  ;;  %v974_v37 = vand.u32 4294901760, %v973_v31  ;;  %v9955_v43 = vsub.f32 %v845_v14, %v9911_v25  ;;  %v1001_v45 = vsub.f32 %v9905_v21, %v11605_v29  ;;  %v11603_v46 = vand.u32 4294901760, %v9938_v35 }
  0x4b   : > { %v981_v38 = vand.u32 4294901760, %v980_v32  ;;  %877 = vmatprep.subr.mxu0 %v9582_v3  ;;  %v988_v44 = vand.u32 4294901760, %v987_v33  ;;  %v9966_v48 = vsub.f32 %v844_v19, %v9918_v28  ;;  %v9970_v49 = vand.u32 4294901760, %v841_v41 }
  0x4c   : > { %879 = vmatpush1.msra.mxu0 %v9875_v11  ;;  %975 = vmatpush1.msra.mxu1 %v974_v37  ;;  %v995_v50 = vand.u32 4294901760, %v994_v39  ;;  %v1008_v51 = vsub.f32 %v9922_v30, %v11604_v40  ;;  %v11601_v52 = vand.u32 4294901760, %v9955_v43  ;;  %v9981_v54 = vsub.f32 %v843_v26, %v9941_v36  ;;  %v860_v26 = vld [vmem:[%s11659_s21 + $0xb8] sm:$0xff] }
  0x4d   : > { %880 = vmatprep.subr.mxu0 %v9582_v3  ;;  %976 = vmatprep.subr.mxu1 %v9582_v3  ;;  %v9985_v55 = vand.u32 4294901760, %v840_v47  ;;  %v1002_v56 = vand.u32 4294901760, %v1001_v45  ;;  %v1015_v57 = vsub.f32 %v9938_v35, %v11603_v46  ;;  %v11600_v58 = vand.u32 4294901760, %v9966_v48  ;;  %v858_v45 = vld [vmem:[%s11659_s21 + $0xa8] sm:$0xff] }
  0x4e   : > { %882 = vmatpush1.msra.mxu0 %v9877_v12  ;;  %982 = vmatpush1.msra.mxu1 %v981_v38  ;;  %v9993_v59 = vsub.f32 %v842_v34, %v9952_v42  ;;  %v9997_v60 = vand.u32 4294901760, %v839_v53  ;;  %v1009_v62 = vand.u32 4294901760, %v1008_v51  ;;  %v1022_v63 = vsub.f32 %v9955_v43, %v11601_v52  ;;  %v859_v34 = vld [vmem:[%s11659_s21 + $0xb0] sm:$0xff]  ;;  %v836_v51 = vld [vmem:[%s9786_s28 + $0x8] sm:$0xff] }
  0x4f   : > { %883 = vmatprep.subr.mxu0 %v9582_v3  ;;  %983 = vmatprep.subr.mxu1 %v9582_v3  ;;  %v11598_v0 = vand.u32 4294901760, %v9981_v54  ;;  %v10011_v2 = vsub.f32 %v841_v41, %v9970_v49  ;;  %v10016_v7 = vsub.f32 %v840_v47, %v9985_v55  ;;  %v1016_v8 = vand.u32 4294901760, %v1015_v57 }
  0x50   : > { %885 = vmatpush1.msra.mxu0 %v9892_v17  ;;  %989 = vmatpush1.msra.mxu1 %v988_v44  ;;  %v1029_v9 = vsub.f32 %v9966_v48, %v11600_v58  ;;  %v10022_v13 = vand.u32 4294901760, %v838_v61  ;;  %v11597_v14 = vand.u32 4294901760, %v9993_v59  ;;  %v10027_v19 = vand.u32 4294901760, %v837_v1 }
  0x51   : > { %886 = vmatprep.subr.mxu0 %v9582_v3  ;;  %990 = vmatprep.subr.mxu1 %v9582_v3  ;;  %v1023_v31 = vand.u32 4294901760, %v1022_v63  ;;  %v1036_v32 = vsub.f32 %v9981_v54, %v11598_v0  ;;  %v11595_v33 = vand.u32 4294901760, %v10011_v2  ;;  %v10041_v37 = vsub.f32 %v839_v53, %v9997_v60 }
  0x52   : > { %888 = vmatpush1.msra.mxu0 %v9911_v25  ;;  %996 = vmatpush1.msra.mxu1 %v995_v50  ;;  %v11596_v38 = vand.u32 4294901760, %v10016_v7  ;;  %v1030_v39 = vand.u32 4294901760, %v1029_v9  ;;  %v1043_v41 = vsub.f32 %v9993_v59, %v11597_v14  ;;  %v10050_v44 = vand.u32 4294901760, %v860_v26 }
  0x53   : > { %889 = vmatprep.subr.mxu0 %v9582_v3  ;;  %997 = vmatprep.subr.mxu1 %v9582_v3  ;;  %v10056_v47 = vsub.f32 %v838_v61, %v10022_v13  ;;  %v10060_v50 = vand.u32 4294901760, %v859_v34  ;;  %v1037_v53 = vand.u32 4294901760, %v1036_v32  ;;  %v11599_v57 = vand.u32 4294901760, %v10041_v37  ;;  %v857_v61 = vld [vmem:[%s11659_s21 + $0xa0] sm:$0xff] }
  0x54   : > { %891 = vmatpush1.msra.mxu0 %v9918_v28  ;;  %1003 = vmatpush1.msra.mxu1 %v1002_v56  ;;  %v1050_v56 = vsub.f32 %v10011_v2, %v11595_v33  ;;  %v1057_v63 = vsub.f32 %v10016_v7, %v11596_v38  ;;  %v1044_v9 = vand.u32 4294901760, %v1043_v41  ;;  %v10084_v32 = vsub.f32 %v860_v26, %v10050_v44  ;;  %v835_v38 = vld [vmem:[%s9786_s28] sm:$0xff]  ;;  %v856_v41 = vld [vmem:[%s11659_s21 + $0x98] sm:$0xff] }
  0x55   : > { %892 = vmatprep.subr.mxu0 %v9582_v3  ;;  %1004 = vmatprep.subr.mxu1 %v9582_v3  ;;  %v10089_v33 = vand.u32 4294901760, %v857_v61  ;;  %v10118_v52 = vand.u32 4294901760, %v835_v38  ;;  %v10167_v23 = vand.u32 4294901760, %v853_v27 }
  0x56   : > { %894 = vmatpush1.msra.mxu0 %v9941_v36  ;;  %1010 = vmatpush1.msra.mxu1 %v1009_v62  ;;  %v10072_v62 = vsub.f32 %v837_v1, %v10027_v19  ;;  %v863_v1 = vsel %vm861_vm0, %v836_v51, 0  ;;  %v1051_v14 = vand.u32 4294901760, %v1050_v56  ;;  %v10101_v51 = vsub.f32 %v859_v34, %v10060_v50  ;;  %v855_v34 = vld [vmem:[%s11659_s21 + $0x90] sm:$0xff] }
  0x57   : > { %895 = vmatprep.subr.mxu0 %v9582_v3  ;;  %1011 = vmatprep.subr.mxu1 %v9582_v3  ;;  %11660 = vst [vmem:[#allocation18_spill] sm:$0xff] %v10089_v33  ;;  %v1058_v0 = vand.u32 4294901760, %v1057_v63  ;;  %v10122_v63 = vand.u32 4294901760, %v856_v41  ;;  %v10133_v40 = vsub.f32 %v857_v61, %v10089_v33  ;;  %v10137_v29 = vand.u32 4294901760, %v855_v34 }
  0x58   : > { %897 = vmatpush1.msra.mxu0 %v9952_v42  ;;  %1017 = vmatpush1.msra.mxu1 %v1016_v8  ;;  %v10079_v8 = vand.u32 4294901760, %v858_v45  ;;  %v11606_v26 = vand.u32 4294901760, %v10072_v62  ;;  %v11612_v46 = vand.u32 4294901760, %v10101_v51  ;;  %v10151_v24 = vsub.f32 %v835_v38, %v10118_v52 }
  0x59   : > { %898 = vmatprep.subr.mxu0 %v9582_v3  ;;  %1018 = vmatprep.subr.mxu1 %v9582_v3  ;;  %11661 = vst [vmem:[#allocation19_spill] sm:$0xff] %v10122_v63 }
  0x5a   : > { %900 = vmatpush1.msra.mxu0 %v9970_v49  ;;  %1024 = vmatpush1.msra.mxu1 %v1023_v31  ;;  %v11602_v31 = vand.u32 4294901760, %v10056_v47  ;;  %v10116_v58 = vsub.f32 %v858_v45, %v10079_v8  ;;  %v854_v45 = vld [vmem:[%s11659_s21 + $0x88] sm:$0xff] }
  0x5b   : > { %901 = vmatprep.subr.mxu0 %v9582_v3  ;;  %1025 = vmatprep.subr.mxu1 %v9582_v3 }
  0x5c   : > { %903 = vmatpush1.msra.mxu0 %v9985_v55  ;;  %1031 = vmatpush1.msra.mxu1 %v1030_v39  ;;  %v1064_v39 = vsub.f32 %v10041_v37, %v11599_v57  ;;  %v1071_v56 = vsub.f32 %v10056_v47, %v11602_v31  ;;  %v11609_v57 = vand.u32 4294901760, %v10084_v32  ;;  %v1078_v31 = vsub.f32 %v10072_v62, %v11606_v26 }
  0x5d   : > { %904 = vmatprep.subr.mxu0 %v9582_v3  ;;  %1032 = vmatprep.subr.mxu1 %v9582_v3  ;;  %v11613_v61 = vand.u32 4294901760, %v10116_v58 }
  0x5e   : > { %906 = vmatpush1.msra.mxu0 %v9997_v60  ;;  %1038 = vmatpush1.msra.mxu1 %v1037_v53  ;;  %v10105_v53 = vand.u32 4294901760, %v863_v1  ;;  %v1101_v26 = vsub.f32 %v10084_v32, %v11609_v57  ;;  %v1108_v57 = vsub.f32 %v10101_v51, %v11612_v46 }
  0x5f   : > { %907 = vmatprep.subr.mxu0 %v9582_v3  ;;  %1039 = vmatprep.subr.mxu1 %v9582_v3 }
  0x60   : > { %909 = vmatpush1.msra.mxu0 %v10022_v13  ;;  %1045 = vmatpush1.msra.mxu1 %v1044_v9  ;;  %v1065_v9 = vand.u32 4294901760, %v1064_v39  ;;  %v1072_v39 = vand.u32 4294901760, %v1071_v56  ;;  %v1079_v56 = vand.u32 4294901760, %v1078_v31  ;;  %v1102_v31 = vand.u32 4294901760, %v1101_v26 }
  0x61   : > { %910 = vmatprep.subr.mxu0 %v9582_v3  ;;  %1046 = vmatprep.subr.mxu1 %v9582_v3  ;;  %v11662_v26 = vand.u32 4294901760, %v10133_v40 }
  0x62   : > { %912 = vmatpush1.msra.mxu0 %v10027_v19  ;;  %1052 = vmatpush1.msra.mxu1 %v1051_v14  ;;  %v10140_v14 = vsub.f32 %v863_v1, %v10105_v53  ;;  %v10155_v1 = vand.u32 4294901760, %v854_v45 }
  0x63   : > { %929 = vmatprep.subr.mxu0 %v9582_v3  ;;  %1053 = vmatprep.subr.mxu1 %v9582_v3 }
  0x64   : > { %931 = vmatpush2.msra.mxu0 %v10050_v44  ;;  %1059 = vmatpush1.msra.mxu1 %v1058_v0  ;;  %v10158_v0 = vsub.f32 %v856_v41, %v10122_v63  ;;  %v10171_v41 = vsub.f32 %v855_v34, %v10137_v29  ;;  %v10182_v22 = vsub.f32 %v854_v45, %v10155_v1  ;;  %v1109_v34 = vand.u32 4294901760, %v1108_v57 }
  0x65   : > { %932 = vmatprep.subr.mxu0 %v9582_v3  ;;  %1060 = vmatprep.subr.mxu1 %v9582_v3  ;;  %v10195_v45 = vsub.f32 %v853_v27, %v10167_v23 }
  0x66   : > { %934 = vmatpush2.msra.mxu0 %v10060_v50  ;;  %1066 = vmatpush1.msra.mxu1 %v1065_v9  ;;  %v1115_v9 = vsub.f32 %v10116_v58, %v11613_v61  ;;  %v11663_v61 = vand.u32 4294901760, %v10140_v14  ;;  %v1142_v38 = vand.u32 4294901760, %v10182_v22 }
  0x67   : > { %935 = vmatprep.subr.mxu0 %v9582_v3  ;;  %1067 = vmatprep.subr.mxu1 %v9582_v3 }
  0x68   : > { %937 = vmatpush2.msra.mxu0 %v10079_v8  ;;  %1073 = vmatpush1.msra.mxu1 %v1072_v39  ;;  %v1122_v39 = vsub.f32 %v10133_v40, %v11662_v26  ;;  %v956_v46 = vsub.f32 %v10140_v14, %v11663_v61  ;;  %v1116_v57 = vand.u32 4294901760, %v1115_v9  ;;  %v11666_v9 = vand.u32 4294901760, %v10171_v41 }
  0x69   : > { %938 = vmatprep.subr.mxu0 %v9582_v3  ;;  %1074 = vmatprep.subr.mxu1 %v9582_v3 }
  0x6a   : > { %940 = vmatpush2.msra.mxu0 %v10089_v33  ;;  %1080 = vmatpush1.msra.mxu1 %v1079_v56  ;;  %v11664_v56 = vand.u32 4294901760, %v10151_v24  ;;  %v11665_v33 = vand.u32 4294901760, %v10158_v0  ;;  %v1123_v27 = vand.u32 4294901760, %v1122_v39  ;;  %v1143_v39 = vsub.f32 %v10182_v22, %v1142_v38 }
  0x6b   : > { %941 = vmatprep.subr.mxu0 %v9582_v3  ;;  %1097 = vmatprep.subr.mxu1 %v9582_v3 }
  0x6c   : > { %943 = vmatpush2.msra.mxu0 %v10122_v63  ;;  %1103 = vmatpush2.msra.mxu1 %v1102_v31  ;;  %v962_v26 = vsub.f32 %v10151_v24, %v11664_v56  ;;  %v1129_v61 = vsub.f32 %v10158_v0, %v11665_v33  ;;  %v957_v31 = vand.u32 4294901760, %v956_v46  ;;  %v1136_v56 = vsub.f32 %v10171_v41, %v11666_v9 }
  0x6d   : > { %944 = vmatprep.subr.mxu0 %v9582_v3  ;;  %1104 = vmatprep.subr.mxu1 %v9582_v3  ;;  %v1149_v63 = vand.u32 4294901760, %v10195_v45  ;;  %v11669_v9 = vand.u32 4294901760, %v9887_v15 }
  0x6e   : > { %946 = vmatpush2.msra.mxu0 %v10137_v29  ;;  %1110 = vmatpush2.msra.mxu1 %v1109_v34  ;;  %v963_v33 = vand.u32 4294901760, %v962_v26  ;;  %v1130_v34 = vand.u32 4294901760, %v1129_v61  ;;  %v1137_v46 = vand.u32 4294901760, %v1136_v56  ;;  %v1144_v26 = vand.u32 4294901760, %v1143_v39 }
  0x6f   : > { %947 = vmatprep.subr.mxu0 %v9582_v3  ;;  %1111 = vmatprep.subr.mxu1 %v9582_v3  ;;  %v11670_v56 = vand.u32 4294901760, %v9890_v16 }
  0x70   : > { %949 = vmatpush2.msra.mxu0 %v10155_v1  ;;  %1117 = vmatpush2.msra.mxu1 %v1116_v57  ;;  %v1150_v57 = vsub.f32 %v10195_v45, %v1149_v63 }
  0x71   : > { %950 = vmatprep.subr.mxu0 %v9582_v3  ;;  %1118 = vmatprep.subr.mxu1 %v9582_v3 }
  0x72   : > { %952 = vmatpush2.msra.mxu0 %v10167_v23  ;;  %1124 = vmatpush2.msra.mxu1 %v1123_v27  ;;  %v1151_v61 = vand.u32 4294901760, %v1150_v57  ;;  %v11667_v27 = vld [vmem:[#allocation18_spill] sm:$0xff] }
  0x73   : > { %958 = vmatprep.mubr.f32.mxu0 %v957_v31  ;;  %1125 = vmatprep.subr.mxu1 %v9582_v3  ;;  %v11668_v31 = vld [vmem:[#allocation19_spill] sm:$0xff] }
  0x74   : > { %1161 = vmatprep.subr.mxu0 %v9582_v3  ;;  %964 = vmatmul.mubr.f32.vlgmr.msra.gmra.mxu0 %v963_v33  ;;  %v11671_v33 = vand.u32 4294901760, %v9895_v18 }
  0x75   : > { %1131 = vmatpush2.msra.mxu1 %v1130_v34  ;;  %1164 = vmatpush1.msra.mxu0 %v9887_v15  ;;  %v11672_v15 = vand.u32 4294901760, %v10140_v14  ;;  %v11674_v34 = vand.u32 4294901760, %v10151_v24 }
  0x76   : > { %1132 = vmatprep.subr.mxu1 %v9582_v3  ;;  %1165 = vmatprep.subr.mxu0 %v9582_v3 }
  0x77   : > { %1138 = vmatpush2.msra.mxu1 %v1137_v46  ;;  %1168 = vmatpush1.msra.mxu0 %v9890_v16  ;;  %v11673_v16 = vand.u32 4294901760, %v9902_v20 }
  0x78   : > { %1139 = vmatprep.subr.mxu1 %v9582_v3  ;;  %1169 = vmatprep.subr.mxu0 %v9582_v3 }
  0x79   : > { %1145 = vmatpush2.msra.mxu1 %v1144_v26  ;;  %1172 = vmatpush1.msra.mxu0 %v9895_v18  ;;  %v11675_v18 = vand.u32 4294901760, %v9905_v21 }
  0x7a   : > { %1146 = vmatprep.subr.mxu1 %v9582_v3  ;;  %1173 = vmatprep.subr.mxu0 %v9582_v3 }
  0x7b   : > { %1152 = vmatpush2.msra.mxu1 %v1151_v61  ;;  %1154 = vmatprep.mubr.f32.mxu1 %v10105_v53 }
  0x7c   : > { %1176 = vmatpush1.msra.mxu0 %v9902_v20  ;;  %1156 = vmatmul.mubr.f32.vlgmr.msra.gmra.mxu1 %v10118_v52  ;;  %v11677_v20 = vand.u32 4294901760, %v9938_v35 }
  0x7d   : > { %1177 = vmatprep.subr.mxu0 %v9582_v3  ;;  %1283 = vmatprep.subr.mxu1 %v9582_v3 }
  0x7e   : > { %1180 = vmatpush1.msra.mxu0 %v9905_v21  ;;  %1285 = vmatpush1.msra.mxu1 %v9857_v4  ;;  %v11685_v21 = vand.u32 4294901760, %v10056_v47 }
  0x7f   : > { %1181 = vmatprep.subr.mxu0 %v9582_v3  ;;  %1286 = vmatprep.subr.mxu1 %v9582_v3 }
  0x80   : > { %1184 = vmatpush1.msra.mxu0 %v9922_v30  ;;  %1288 = vmatpush1.msra.mxu1 %v9859_v5 }
  0x81   : > { %1185 = vmatprep.subr.mxu0 %v9582_v3  ;;  %1289 = vmatprep.subr.mxu1 %v9582_v3 }
  0x82   : > { %1188 = vmatpush1.msra.mxu0 %v9938_v35  ;;  %1291 = vmatpush1.msra.mxu1 %v9861_v6  ;;  %v11690_v35 = vand.u32 4294901760, %v10133_v40 }
  0x83   : > { %1189 = vmatprep.subr.mxu0 %v9582_v3  ;;  %1292 = vmatprep.subr.mxu1 %v9582_v3 }
  0x84   : > { %1192 = vmatpush1.msra.mxu0 %v9955_v43  ;;  %1294 = vmatpush1.msra.mxu1 %v9873_v10 }
  0x85   : > { %1193 = vmatprep.subr.mxu0 %v9582_v3  ;;  %1295 = vmatprep.subr.mxu1 %v9582_v3 }
  0x86   : > { %1196 = vmatpush1.msra.mxu0 %v9966_v48  ;;  %1297 = vmatpush1.msra.mxu1 %v9875_v11 }
  0x87   : > { %1197 = vmatprep.subr.mxu0 %v9582_v3  ;;  %1298 = vmatprep.subr.mxu1 %v9582_v3 }
  0x88   : > { %1200 = vmatpush1.msra.mxu0 %v9981_v54  ;;  %1300 = vmatpush1.msra.mxu1 %v9877_v12 }
  0x89   : > { %1201 = vmatprep.subr.mxu0 %v9582_v3  ;;  %1301 = vmatprep.subr.mxu1 %v9582_v3 }
  0x8a   : > { %1204 = vmatpush1.msra.mxu0 %v9993_v59  ;;  %1303 = vmatpush1.msra.mxu1 %v9892_v17 }
  0x8b   : > { %1205 = vmatprep.subr.mxu0 %v9582_v3  ;;  %1304 = vmatprep.subr.mxu1 %v9582_v3 }
  0x8c   : > { %1208 = vmatpush1.msra.mxu0 %v10011_v2  ;;  %1306 = vmatpush1.msra.mxu1 %v9911_v25 }
  0x8d   : > { %1209 = vmatprep.subr.mxu0 %v9582_v3  ;;  %1307 = vmatprep.subr.mxu1 %v9582_v3 }
  0x8e   : > { %1212 = vmatpush1.msra.mxu0 %v10016_v7  ;;  %1309 = vmatpush1.msra.mxu1 %v9918_v28 }
  0x8f   : > { %1213 = vmatprep.subr.mxu0 %v9582_v3  ;;  %1310 = vmatprep.subr.mxu1 %v9582_v3 }
  0x90   : > { %1216 = vmatpush1.msra.mxu0 %v10041_v37  ;;  %1312 = vmatpush1.msra.mxu1 %v9941_v36 }
  0x91   : > { %1217 = vmatprep.subr.mxu0 %v9582_v3  ;;  %1313 = vmatprep.subr.mxu1 %v9582_v3 }
  0x92   : > { %1220 = vmatpush1.msra.mxu0 %v10056_v47  ;;  %1315 = vmatpush1.msra.mxu1 %v9952_v42 }
  0x93   : > { %1221 = vmatprep.subr.mxu0 %v9582_v3  ;;  %1316 = vmatprep.subr.mxu1 %v9582_v3 }
  0x94   : > { %1224 = vmatpush1.msra.mxu0 %v10072_v62  ;;  %1318 = vmatpush1.msra.mxu1 %v9970_v49 }
  0x95   : > { %1241 = vmatprep.subr.mxu0 %v9582_v3  ;;  %1319 = vmatprep.subr.mxu1 %v9582_v3 }
  0x96   : > { %1244 = vmatpush2.msra.mxu0 %v10084_v32  ;;  %1321 = vmatpush1.msra.mxu1 %v9985_v55 }
  0x97   : > { %1245 = vmatprep.subr.mxu0 %v9582_v3  ;;  %1322 = vmatprep.subr.mxu1 %v9582_v3 }
  0x98   : > { %1248 = vmatpush2.msra.mxu0 %v10101_v51  ;;  %1324 = vmatpush1.msra.mxu1 %v9997_v60 }
  0x99   : > { %1249 = vmatprep.subr.mxu0 %v9582_v3  ;;  %1325 = vmatprep.subr.mxu1 %v9582_v3 }
  0x9a   : > { %1252 = vmatpush2.msra.mxu0 %v10116_v58  ;;  %1327 = vmatpush1.msra.mxu1 %v10022_v13 }
  0x9b   : > { %1253 = vmatprep.subr.mxu0 %v9582_v3  ;;  %1328 = vmatprep.subr.mxu1 %v9582_v3 }
  0x9c   : > { %1256 = vmatpush2.msra.mxu0 %v10133_v40  ;;  %1330 = vmatpush1.msra.mxu1 %v10027_v19 }
  0x9d   : > { %1257 = vmatprep.subr.mxu0 %v9582_v3  ;;  %1347 = vmatprep.subr.mxu1 %v9582_v3 }
  0x9e   : > { %1260 = vmatpush2.msra.mxu0 %v10158_v0  ;;  %1349 = vmatpush2.msra.mxu1 %v10050_v44 }
  0x9f   : > { %1261 = vmatprep.subr.mxu0 %v9582_v3  ;;  %1350 = vmatprep.subr.mxu1 %v9582_v3 }
  0xa0   : > { %1264 = vmatpush2.msra.mxu0 %v10171_v41  ;;  %1352 = vmatpush2.msra.mxu1 %v10060_v50 }
  0xa1   : > { %1265 = vmatprep.subr.mxu0 %v9582_v3  ;;  %1353 = vmatprep.subr.mxu1 %v9582_v3 }
  0xa2   : > { %1268 = vmatpush2.msra.mxu0 %v10182_v22  ;;  %1355 = vmatpush2.msra.mxu1 %v10079_v8 }
  0xa3   : > { %1269 = vmatprep.subr.mxu0 %v9582_v3  ;;  %1356 = vmatprep.subr.mxu1 %v9582_v3 }
  0xa4   : > { %1272 = vmatpush2.msra.mxu0 %v10195_v45  ;;  %1275 = vmatprep.mubr.f32.mxu0 %v10140_v14  ;;  %v11676_v14 = vand.u32 4294901760, %v9922_v30  ;;  %v11689_v30 = vand.u32 4294901760, %v10116_v58 }
  0xa5   : > { %1358 = vmatpush2.msra.mxu1 %v11667_v27  ;;  %1278 = vmatmul.mubr.f32.vlgmr.msra.gmra.mxu0 %v10151_v24  ;;  %v11686_v24 = vand.u32 4294901760, %v10072_v62 }
  0xa6   : > { %1359 = vmatprep.subr.mxu1 %v9582_v3  ;;  %1383 = vmatprep.subr.mxu0 %v9582_v3 }
  0xa7   : > { %1361 = vmatpush2.msra.mxu1 %v11668_v31  ;;  %1387 = vmatpush1.msra.mxu0 %v11669_v9 }
  0xa8   : > { %1362 = vmatprep.subr.mxu1 %v9582_v3  ;;  %1388 = vmatprep.subr.mxu0 %v9582_v3 }
  0xa9   : > { %1364 = vmatpush2.msra.mxu1 %v10137_v29  ;;  %1392 = vmatpush1.msra.mxu0 %v11670_v56 }
  0xaa   : > { %1365 = vmatprep.subr.mxu1 %v9582_v3  ;;  %1393 = vmatprep.subr.mxu0 %v9582_v3 }
  0xab   : > { %1367 = vmatpush2.msra.mxu1 %v10155_v1  ;;  %1397 = vmatpush1.msra.mxu0 %v11671_v33 }
  0xac   : > { %1368 = vmatprep.subr.mxu1 %v9582_v3  ;;  %1398 = vmatprep.subr.mxu0 %v9582_v3 }
  0xad   : > { %1370 = vmatpush2.msra.mxu1 %v10167_v23  ;;  %1374 = vmatprep.mubr.f32.mxu1 %v11672_v15 }
  0xae   : > { %1402 = vmatpush1.msra.mxu0 %v11673_v16  ;;  %1378 = vmatmul.mubr.f32.vlgmr.msra.gmra.mxu1 %v11674_v34 }
  0xaf   : > { %1403 = vmatprep.subr.mxu0 %v9582_v3  ;;  %1527 = vmatprep.subr.mxu1 %v9582_v3 }
  0xb0   : > { %1407 = vmatpush1.msra.mxu0 %v11675_v18  ;;  %1529 = vmatpush1.msra.mxu1 %v9857_v4  ;;  %v11678_v4 = vand.u32 4294901760, %v9955_v43 }
  0xb1   : > { %1408 = vmatprep.subr.mxu0 %v9582_v3  ;;  %1530 = vmatprep.subr.mxu1 %v9582_v3 }
  0xb2   : > { %1412 = vmatpush1.msra.mxu0 %v11676_v14  ;;  %1532 = vmatpush1.msra.mxu1 %v9859_v5  ;;  %v11679_v5 = vand.u32 4294901760, %v9966_v48 }
  0xb3   : > { %1413 = vmatprep.subr.mxu0 %v9582_v3  ;;  %1533 = vmatprep.subr.mxu1 %v9582_v3 }
  0xb4   : > { %1417 = vmatpush1.msra.mxu0 %v11677_v20  ;;  %1535 = vmatpush1.msra.mxu1 %v9861_v6  ;;  %v11680_v6 = vand.u32 4294901760, %v9981_v54 }
  0xb5   : > { %1418 = vmatprep.subr.mxu0 %v9582_v3  ;;  %1536 = vmatprep.subr.mxu1 %v9582_v3 }
  0xb6   : > { %1422 = vmatpush1.msra.mxu0 %v11678_v4  ;;  %1538 = vmatpush1.msra.mxu1 %v9873_v10  ;;  %v11681_v10 = vand.u32 4294901760, %v9993_v59 }
  0xb7   : > { %1423 = vmatprep.subr.mxu0 %v9582_v3  ;;  %1539 = vmatprep.subr.mxu1 %v9582_v3 }
  0xb8   : > { %1427 = vmatpush1.msra.mxu0 %v11679_v5  ;;  %1541 = vmatpush1.msra.mxu1 %v9875_v11  ;;  %v11682_v11 = vand.u32 4294901760, %v10011_v2 }
  0xb9   : > { %1428 = vmatprep.subr.mxu0 %v9582_v3  ;;  %1542 = vmatprep.subr.mxu1 %v9582_v3 }
  0xba   : > { %1432 = vmatpush1.msra.mxu0 %v11680_v6  ;;  %1544 = vmatpush1.msra.mxu1 %v9877_v12  ;;  %v11683_v12 = vand.u32 4294901760, %v10016_v7 }
  0xbb   : > { %1433 = vmatprep.subr.mxu0 %v9582_v3  ;;  %1545 = vmatprep.subr.mxu1 %v9582_v3 }
  0xbc   : > { %1437 = vmatpush1.msra.mxu0 %v11681_v10  ;;  %1547 = vmatpush1.msra.mxu1 %v9892_v17  ;;  %v11684_v17 = vand.u32 4294901760, %v10041_v37 }
  0xbd   : > { %1438 = vmatprep.subr.mxu0 %v9582_v3  ;;  %1548 = vmatprep.subr.mxu1 %v9582_v3 }
  0xbe   : > { %1442 = vmatpush1.msra.mxu0 %v11682_v11  ;;  %1550 = vmatpush1.msra.mxu1 %v9911_v25  ;;  %v11687_v25 = vand.u32 4294901760, %v10084_v32 }
  0xbf   : > { %1443 = vmatprep.subr.mxu0 %v9582_v3  ;;  %1551 = vmatprep.subr.mxu1 %v9582_v3 }
  0xc0   : > { %1447 = vmatpush1.msra.mxu0 %v11683_v12  ;;  %1553 = vmatpush1.msra.mxu1 %v9918_v28  ;;  %v11688_v28 = vand.u32 4294901760, %v10101_v51 }
  0xc1   : > { %1448 = vmatprep.subr.mxu0 %v9582_v3  ;;  %1554 = vmatprep.subr.mxu1 %v9582_v3 }
  0xc2   : > { %1452 = vmatpush1.msra.mxu0 %v11684_v17  ;;  %1556 = vmatpush1.msra.mxu1 %v9941_v36  ;;  %v11691_v36 = vand.u32 4294901760, %v10158_v0  ;;  %v8317_v0 = vld [vmem:[%s11694_s23] ss:$0 sm:$0xff] }
  0xc3   : > { %1453 = vmatprep.subr.mxu0 %v9582_v3  ;;  %1557 = vmatprep.subr.mxu1 %v9582_v3 }
  0xc4   : > { %1457 = vmatpush1.msra.mxu0 %v11685_v21  ;;  %1559 = vmatpush1.msra.mxu1 %v9952_v42  ;;  %v11692_v42 = vand.u32 4294901760, %v10171_v41  ;;  %v8318_v41 = vld [vmem:[%s11695_s9] ss:$0 sm:$0xff] }
  0xc5   : > { %1458 = vmatprep.subr.mxu0 %v9582_v3  ;;  %1560 = vmatprep.subr.mxu1 %v9582_v3 }
  0xc6   : > { %1462 = vmatpush1.msra.mxu0 %v11686_v24  ;;  %1562 = vmatpush1.msra.mxu1 %v9970_v49 }
  0xc7   : > { %1479 = vmatprep.subr.mxu0 %v9582_v3  ;;  %1563 = vmatprep.subr.mxu1 %v9582_v3 }
  0xc8   : > { %1483 = vmatpush2.msra.mxu0 %v11687_v25  ;;  %1565 = vmatpush1.msra.mxu1 %v9985_v55 }
  0xc9   : > { %1484 = vmatprep.subr.mxu0 %v9582_v3  ;;  %1566 = vmatprep.subr.mxu1 %v9582_v3 }
  0xca   : > { %1488 = vmatpush2.msra.mxu0 %v11688_v28  ;;  %1568 = vmatpush1.msra.mxu1 %v9997_v60 }
  0xcb   : > { %1489 = vmatprep.subr.mxu0 %v9582_v3  ;;  %1569 = vmatprep.subr.mxu1 %v9582_v3 }
  0xcc   : > { %1493 = vmatpush2.msra.mxu0 %v11689_v30  ;;  %1571 = vmatpush1.msra.mxu1 %v10022_v13 }
  0xcd   : > { %1494 = vmatprep.subr.mxu0 %v9582_v3  ;;  %1572 = vmatprep.subr.mxu1 %v9582_v3 }
  0xce   : > { %1498 = vmatpush2.msra.mxu0 %v11690_v35  ;;  %1574 = vmatpush1.msra.mxu1 %v10027_v19 }
  0xcf   : > { %1499 = vmatprep.subr.mxu0 %v9582_v3  ;;  %1591 = vmatprep.subr.mxu1 %v9582_v3 }
  0xd0   : > { %1503 = vmatpush2.msra.mxu0 %v11691_v36  ;;  %1593 = vmatpush2.msra.mxu1 %v10050_v44 }
  0xd1   : > { %1504 = vmatprep.subr.mxu0 %v9582_v3  ;;  %1594 = vmatprep.subr.mxu1 %v9582_v3 }
  0xd2   : > { %1508 = vmatpush2.msra.mxu0 %v11692_v42  ;;  %1596 = vmatpush2.msra.mxu1 %v10060_v50 }
  0xd3   : > { %1509 = vmatprep.subr.mxu0 %v9582_v3  ;;  %1597 = vmatprep.subr.mxu1 %v9582_v3 }
  0xd4   : > { %1513 = vmatpush2.msra.mxu0 %v1142_v38  ;;  %1599 = vmatpush2.msra.mxu1 %v10079_v8 }
  0xd5   : > { %1514 = vmatprep.subr.mxu0 %v9582_v3  ;;  %1600 = vmatprep.subr.mxu1 %v9582_v3 }
  0xd6   : > { %1518 = vmatpush2.msra.mxu0 %v1149_v63  ;;  %1520 = vmatprep.mubr.f32.mxu0 %v10105_v53 }
  0xd7   : > { %1602 = vmatpush2.msra.mxu1 %v11667_v27  ;;  %1522 = vmatmul.mubr.f32.vlgmr.msra.gmra.mxu0 %v10118_v52 }
  0xd8   : > { %1603 = vmatprep.subr.mxu1 %v9582_v3  ;;  %1616 = vmatprep.mubr.f32.mxu1 %v10105_v53 }
  0xd9   : > { %1605 = vmatpush2.msra.mxu1 %v11668_v31 }
  0xda   : > { %1606 = vmatprep.subr.mxu1 %v9582_v3 }
  0xdb   : > { %1608 = vmatpush2.msra.mxu1 %v10137_v29 }
  0xdc   : > { %1609 = vmatprep.subr.mxu1 %v9582_v3 }
  0xdd   : > { %1611 = vmatpush2.msra.mxu1 %v10155_v1 }
  0xde   : > { %1612 = vmatprep.subr.mxu1 %v9582_v3  ;;  %v1623_v3 = vld [vmem:[%s11693_s2] sm:$0xff] }
  0xdf   : > { %1614 = vmatpush2.msra.mxu1 %v10167_v23 }
  0xe0   : > { %1618 = vmatmul.mubr.f32.vlgmr.msra.gmra.mxu1 %v10118_v52 }
 0x134   : > { %v965_v22 = vpop.f32.mrf.mxu0 }
 0x136   : > { %v967_v40 = vpop.f32.mrf.mxu0 }
 0x13c   : > { %v1157_v43 = vpop.f32.mrf.mxu1 }
 0x13d   : > { %v1158_v48 = vadd.f32 %v1157_v43, %v965_v22 }
 0x13e   : > { %v1159_v49 = vpop.f32.mrf.mxu1 }
 0x165   : > { %v1279_v54 = vpop.f32.mrf.mxu0 }
 0x166   : > { %v1280_v2 = vadd.f32 %v1279_v54, %v1158_v48 }
 0x167   : > { %v1281_v55 = vpop.f32.mrf.mxu0 }
 0x16e   : > { %v1379_v58 = vpop.f32.mrf.mxu1 }
 0x16f   : > { %v1380_v7 = vadd.f32 %v1379_v58, %v1280_v2 }
 0x170   : > { %v1381_v59 = vpop.f32.mrf.mxu1 }
 0x197   : > { %v1523_v29 = vpop.f32.mrf.mxu0 }
 0x198   : > { %v1524_v13 = vadd.f32 %v1523_v29, %v1380_v7 }
 0x199   : > { %v1525_v60 = vpop.f32.mrf.mxu0 }
 0x1a0   : > { %v1619_v19 = vpop.f32.mrf.mxu1 }
 0x1a1   : > { %v1620_v23 = vadd.f32 %v1619_v19, %v1524_v13 }
 0x1a2   : > { %v1621_v52 = vpop.f32.mrf.mxu1 }
 0x1a3   : > { %v1624_v37 = vadd.f32 %v1623_v3, %v1620_v23 }
 0x1a5   : > { %v1628_v44 = vsel %vm1627_vm1, %v1624_v37, 0.0 }
 0x1a6   : > { %1629 = vadd.xlane.f32.xlu0 %v1628_v44 }
 0x22f   : > { %v1630_v47 = vpop.xlane.xlu0 %1629 }
 0x230   : > { %v1632_v50 = vmul.f32 0.03125, %v1630_v47 }
 0x232   : > { %v1633_v62 = vsub.f32 %v1624_v37, %v1632_v50 }
 0x234   : > { %v1634_v8 = vmul.f32 %v1633_v62, %v1633_v62 }
 0x236   : > { %v1635_v32 = vsel %vm1627_vm1, %v1634_v8, 0.0 }
 0x237   : > { %1636 = vadd.xlane.f32.xlu0 %v1635_v32 }
 0x2c0   : > { %v1637_v51 = vpop.xlane.xlu0 %1636 }
 0x2c1   : > { %v1638_v53 = vmul.f32 0.03125, %v1637_v51 }
 0x2c3   : > { %v1639_v63 = vadd.f32 1e-05, %v1638_v53 }
 0x2c5   : > { %9459 = vrsqrt.f32 %v1639_v63 }
 0x2d2   : > { %v9460_v1 = vpop.eup %9459 }
 0x2d3   : > { %v1641_v38 = vmul.f32 %v9460_v1, %v1633_v62 }
 0x2d5   : > { %v1648_v45 = vmul.f32 %v8317_v0, %v1641_v38 }
 0x2d7   : > { %v1655_v39 = vadd.f32 %v8318_v41, %v1648_v45 }
 0x2d9   : > { %1656 = vst.msk [vmem:[#allocation2] sm:$0xff] %vm1627_vm1, %v1655_v39 }
 0x2da PF: > { %vm1660_vm2 = vcmask 261120   ;;  %v1692_v56 = vld [vmem:[%s9800_s19 + $0x18] sm:$0xff]  ;;  %v1691_v33 = vld [vmem:[%s9800_s19 + $0x10] sm:$0xff]  ;;  %v1690_v15 = vld [vmem:[%s9800_s19 + $0x8] sm:$0xff]  ;;  %v9583_v16 = vmov 0.0   ;;  %vm9584_vm3 = vmmov 0   ;;  %s11696_s7 = scalar_lea.vmem %s11564_s5, %s9781_s1  ;;  %s11699_s3 = scalar_lea.vmem %s11567_s8, %s9781_s1 }
 0x2db   : > { %8666 = vmatprep.subr.mxu1 %v9583_v16  ;;  %v10474_v34 = vand.u32 4294901760, %v1692_v56  ;;  %v10476_v18 = vand.u32 4294901760, %v1691_v33  ;;  %v10478_v14 = vand.u32 4294901760, %v1690_v15  ;;  %v1689_v20 = vld [vmem:[%s9800_s19] sm:$0xff]  ;;  %8655 = vmatprep.subr.mxu0 %v9583_v16  ;;  %s11697_s17 = sld [smem:[#allocation25_spill]]  ;;  %s9585_s23 = smov 96  }
 0x2dc   : > { %v10482_v4 = vand.u32 4294901760, %v1689_v20  ;;  %8674 = vmatprep.mubr.msk.f32.mxu1 %vm9584_vm3, %v9583_v16  ;;  %8663 = vmatprep.mubr.msk.f32.mxu0 %vm9584_vm3, %v9583_v16  ;;  %v8319_v55 = vld [vmem:[%s11696_s7] ss:$0 sm:$0xff]  ;;  %vm2195_vm4 = vcmask 64512   ;;  %s9586_s4 = smov 64   ;;  %s9587_s28 = smov 88  }
 0x2dd   : > { %v10489_v5 = vsub.f32 %v1692_v56, %v10474_v34  ;;  %v10492_v6 = vsub.f32 %v1691_v33, %v10476_v18  ;;  %v10495_v10 = vsub.f32 %v1690_v15, %v10478_v14  ;;  %8656 = vmatpush3.msra.mxu0 %v10474_v34  ;;  %v8321_v8 = vld [vmem:[%s11699_s3] ss:$0 sm:$0xff]  ;;  %s9588_s9 = smov 120   ;;  %s9589_s19 = smov 56   ;;  %vm5878_vm6 = vcmask 130048  }
 0x2de   : > { %v10499_v11 = vsub.f32 %v1689_v20, %v10482_v4  ;;  %8657 = vmatprep.subr.mxu0 %v9583_v16  ;;  %s9590_s30 = smov 80   ;;  %s9591_s7 = smov 112   ;;  %vm5880_vm7 = vcmask 195584  }
 0x2df   : > { %v1809_v12 = vand.u32 4294901760, %v10489_v5  ;;  %v1816_v17 = vand.u32 4294901760, %v10492_v6  ;;  %v1823_v21 = vand.u32 4294901760, %v10495_v10  ;;  %8658 = vmatpush3.msra.mxu0 %v10476_v18  ;;  %s9592_s29 = smov 48   ;;  %s9593_s26 = smov 72  }
 0x2e0   : > { %v1657_v46 = vld [vmem:[#allocation2] sm:$0xff]  ;;  %v1830_v24 = vand.u32 4294901760, %v10499_v11  ;;  %8659 = vmatprep.subr.mxu0 %v9583_v16  ;;  %s9596_s2 = smov 8   ;;  %s9597_s24 = smov 16  }
 0x2e1   : > { %v1661_v57 = vsel %vm1660_vm2, %v1657_v46, 0.0  ;;  %v1810_v25 = vsub.f32 %v10489_v5, %v1809_v12  ;;  %v1817_v28 = vsub.f32 %v10492_v6, %v1816_v17  ;;  %v1824_v30 = vsub.f32 %v10495_v10, %v1823_v21  ;;  %8660 = vmatpush3.msra.mxu0 %v10478_v14  ;;  %s11698_s6 = scalar_lea.vmem %s11697_s17, %s9781_s1  ;;  %s9594_s17 = smov 104  }
 0x2e2   : > { %1662 = vadd.xlane.f32.xlu0 %v1661_v57  ;;  %8661 = vmatprep.subr.mxu0 %v9583_v16  ;;  %v1831_v42 = vsub.f32 %v10499_v11, %v1830_v24  ;;  %v8320_v59 = vld [vmem:[%s11698_s6] ss:$0 sm:$0xff]  ;;  %s9595_s6 = smov 40  }
 0x2e3   : > { %v1811_v35 = vand.u32 4294901760, %v1810_v25  ;;  %v1818_v36 = vand.u32 4294901760, %v1817_v28  ;;  %8662 = vmatpush3.msra.mxu0 %v10482_v4  ;;  %v1825_v22 = vand.u32 4294901760, %v1824_v30 }
 0x2e4   : > { %8677 = vmatprep.subr.mxu0 %v9583_v16  ;;  %v1832_v40 = vand.u32 4294901760, %v1831_v42 }
 0x2e5   : > { %8667 = vmatpush3.msra.mxu1 %v1811_v35 }
 0x2e6   : > { %8668 = vmatprep.subr.mxu1 %v9583_v16 }
 0x2e7   : > { %8669 = vmatpush3.msra.mxu1 %v1818_v36 }
 0x2e8   : > { %8670 = vmatprep.subr.mxu1 %v9583_v16 }
 0x2e9   : > { %8671 = vmatpush3.msra.mxu1 %v1825_v22 }
 0x2ea   : > { %8672 = vmatprep.subr.mxu1 %v9583_v16 }
 0x2eb   : > { %8673 = vmatpush3.msra.mxu1 %v1832_v40 }
 0x2ec   : > { %8688 = vmatprep.subr.mxu1 %v9583_v16 }
 0x36b   : > { %v1663_v26 = vpop.xlane.xlu0 %1662 }
 0x36c   : > { %v1665_v61 = vmul.f32 0.03125, %v1663_v26 }
 0x36e   : > { %v1666_v27 = vsub.f32 %v1657_v46, %v1665_v61 }
 0x370   : > { %v1667_v31 = vmul.f32 %v1666_v27, %v1666_v27 }
 0x372   : > { %v1668_v9 = vsel %vm1660_vm2, %v1667_v31, 0.0 }
 0x373   : > { %1669 = vadd.xlane.f32.xlu0 %v1668_v9 }
 0x3fc   : > { %v1670_v43 = vpop.xlane.xlu0 %1669 }
 0x3fd   : > { %v1671_v48 = vmul.f32 0.03125, %v1670_v43 }
 0x3ff   : > { %v1672_v49 = vadd.f32 1e-05, %v1671_v48 }
 0x401   : > { %9461 = vrsqrt.f32 %v1672_v49 }
 0x40e   : > { %v9462_v54 = vpop.eup %9461 }
 0x40f   : > { %v1674_v58 = vmul.f32 %v9462_v54, %v1666_v27 }
 0x411   : > { %v1681_v29 = vmul.f32 %v8319_v55, %v1674_v58 }
 0x413   : > { %v1688_v60 = vadd.f32 %v8320_v59, %v1681_v29 }
 0x415   : > { %v1701_v2 = vsel %vm1660_vm2, %v1688_v60, 0 }
 0x416   : > { %v1772_v7 = vand.u32 4294901760, %v1701_v2 }
 0x418   : > { %v1773_v13 = vsub.f32 %v1701_v2, %v1772_v7  ;;  %8675 = vmatmul.mubr.f32.vlgmr.msra.gmra.mxu1 %v1772_v7 }
 0x419   : > { %8689 = vmatpush3.msra.mxu1 %v10474_v34  ;;  %8696 = vmatprep.mubr.msk.f32.mxu1 %vm9584_vm3, %v9583_v16 }
 0x41a   : > { %8690 = vmatprep.subr.mxu1 %v9583_v16  ;;  %v1774_v19 = vand.u32 4294901760, %v1773_v13 }
 0x41b   : > { %8691 = vmatpush3.msra.mxu1 %v10476_v18 }
 0x41c   : > { %8692 = vmatprep.subr.mxu1 %v9583_v16  ;;  %v1775_v3 = vsub.f32 %v1773_v13, %v1774_v19 }
 0x41d   : > { %8693 = vmatpush3.msra.mxu1 %v10478_v14 }
 0x41e   : > { %8694 = vmatprep.subr.mxu1 %v9583_v16  ;;  %v1776_v23 = vand.u32 4294901760, %v1775_v3 }
 0x41f   : > { %8695 = vmatpush3.msra.mxu1 %v10482_v4 }
 0x420   : > { %8697 = vmatmul.mubr.f32.vlgmr.msra.gmra.mxu1 %v1774_v19  ;;  %8710 = vmatprep.subr.mxu1 %v9583_v16 }
 0x421   : > { %8664 = vmatmul.mubr.f32.vlgmr.msra.gmra.mxu0 %v1776_v23  ;;  %8711 = vmatpush3.msra.mxu1 %v10474_v34 }
 0x422   : > { %8678 = vmatpush3.msra.mxu0 %v10489_v5  ;;  %8712 = vmatprep.subr.mxu1 %v9583_v16 }
 0x423   : > { %8679 = vmatprep.subr.mxu0 %v9583_v16  ;;  %8713 = vmatpush3.msra.mxu1 %v10476_v18 }
 0x424   : > { %8680 = vmatpush3.msra.mxu0 %v10492_v6  ;;  %8714 = vmatprep.subr.mxu1 %v9583_v16 }
 0x425   : > { %8681 = vmatprep.subr.mxu0 %v9583_v16  ;;  %8715 = vmatpush3.msra.mxu1 %v10478_v14 }
 0x426   : > { %8682 = vmatpush3.msra.mxu0 %v10495_v10  ;;  %8716 = vmatprep.subr.mxu1 %v9583_v16 }
 0x427   : > { %8683 = vmatprep.subr.mxu0 %v9583_v16  ;;  %8685 = vmatprep.mubr.msk.f32.mxu0 %vm9584_vm3, %v9583_v16 }
 0x428   : > { %8684 = vmatpush3.msra.mxu0 %v10499_v11  ;;  %8717 = vmatpush3.msra.mxu1 %v10482_v4 }
 0x429   : > { %8718 = vmatprep.mubr.msk.f32.mxu1 %vm9584_vm3, %v9583_v16  ;;  %8686 = vmatmul.mubr.f32.vlgmr.msra.gmra.mxu0 %v1773_v13 }
 0x42a   : > { %8699 = vmatprep.subr.mxu0 %v9583_v16  ;;  %8719 = vmatmul.mubr.f32.vlgmr.msra.gmra.mxu1 %v1772_v7 }
 0x42b   : > { %8700 = vmatpush3.msra.mxu0 %v1809_v12  ;;  %8707 = vmatprep.mubr.msk.f32.mxu0 %vm9584_vm3, %v9583_v16 }
 0x42c   : > { %8701 = vmatprep.subr.mxu0 %v9583_v16  ;;  %8726 = vmatprep.subr.mxu1 %v9583_v16 }
 0x42d   : > { %8702 = vmatpush3.msra.mxu0 %v1816_v17  ;;  %8728 = vmatprep.mubr.msk.f32.mxu1 %vm9584_vm3, %v9583_v16 }
 0x42e   : > { %8703 = vmatprep.subr.mxu0 %v9583_v16 }
 0x42f   : > { %8704 = vmatpush3.msra.mxu0 %v1823_v21 }
 0x430   : > { %8705 = vmatprep.subr.mxu0 %v9583_v16 }
 0x431   : > { %8706 = vmatpush3.msra.mxu0 %v1830_v24  ;;  %v2188_v24 = vlaneseq }
 0x432   : > { %8708 = vmatmul.mubr.f32.vlgmr.msra.gmra.mxu0 %v1772_v7  ;;  %8721 = vmatprep.subr.mxu0 %v9583_v16 }
 0x433   : > { %8723 = vmatprep.mubr.msk.f32.mxu0 %vm9584_vm3, %v9583_v16  ;;  %v10619_v42 = vand.u32 127, %v2188_v24 }
 0x435   : > { %vm2190_vm5 = vcmp.lt.s32.totalorder %v10619_v42, 5 }
 0x4d8   : > { %v1869_v52 = vpop.f32.mrf.mxu1 }
 0x4da   : > { %v8676_v37 = vpop.f32.mrf.mxu1 }
 0x4e0   : > { %v2026_v44 = vpop.f32.mrf.mxu1 }
 0x4e1   : > { %v1778_v47 = vpop.f32.mrf.mxu0 }
 0x4e2   : > { %v8698_v50 = vpop.f32.mrf.mxu1  ;;  %v1779_v32 = vadd.f32 %v8321_v8, %v1778_v47 }
 0x4e3   : > { %v8665_v62 = vpop.f32.mrf.mxu0 }
 0x4e4   : > { %v1870_v63 = vadd.f32 %v1869_v52, %v1779_v32 }
 0x4e9   : > { %v1949_v51 = vpop.f32.mrf.mxu0 }
 0x4ea   : > { %v2184_v53 = vpop.f32.mrf.mxu1  ;;  %v1950_v38 = vadd.f32 %v1949_v51, %v1870_v63 }
 0x4eb   : > { %v8687_v1 = vpop.f32.mrf.mxu0 }
 0x4ec   : > { %v8720_v0 = vpop.f32.mrf.mxu1  ;;  %v2027_v41 = vadd.f32 %v2026_v44, %v1950_v38 }
 0x4f2   : > { %v2109_v45 = vpop.f32.mrf.mxu0 }
 0x4f3   : > { %v2110_v39 = vadd.f32 %v2109_v45, %v2027_v41 }
 0x4f4   : > { %v8709_v46 = vpop.f32.mrf.mxu0 }
 0x4f5   : > { %v10592_v57 = vadd.f32 %v2184_v53, %v2110_v39 }
 0x4f7   : > { %2193 = vrot.lane.b32.xlu1 %v10592_v57, %s9585_s23  ;;  %v10596_v26 = vmul.f32 0.35355338, %v10592_v57 }
 0x4f9   : > { %v2197_v61 = vsel %vm2195_vm4, %v10596_v26, 0 }
 0x4fa   : > { %v2267_v27 = vand.u32 4294901760, %v2197_v61 }
 0x4fc   : > { %v2268_v31 = vsub.f32 %v2197_v61, %v2267_v27 }
 0x4fe   : > { %v2269_v9 = vand.u32 4294901760, %v2268_v31 }
 0x500   : > { %v2270_v15 = vsub.f32 %v2268_v31, %v2269_v9 }
 0x502   : > { %v2271_v14 = vand.u32 4294901760, %v2270_v15 }
 0x569   : > { %v2194_v56 = vpop.permute.xlu1 %2193 }
 0x56a   : > { %v2199_v33 = vsel %vm2195_vm4, %v2194_v56, 0 }
 0x56b   : > { %v2232_v34 = vand.u32 4294901760, %v2199_v33 }
 0x56d   : > { %v2309_v18 = vsub.f32 %v2199_v33, %v2232_v34  ;;  %8722 = vmatpush3.xpose.msra.mxu0 %v2232_v34 }
 0x56e   : > { %8731 = vmatprep.subr.mxu0 %v9583_v16 }
 0x56f   : > { %v2310_v20 = vand.u32 4294901760, %v2309_v18 }
 0x570   : > { %8724 = vmatmul.mubr.f32.vlgmr.msra.gmra.mxu0 %v2271_v14 }
 0x571   : > { %v2311_v4 = vsub.f32 %v2309_v18, %v2310_v20  ;;  %8732 = vmatpush3.xpose.msra.mxu0 %v2309_v18  ;;  %8733 = vmatprep.mubr.msk.f32.mxu0 %vm9584_vm3, %v9583_v16 }
 0x572   : > { %8741 = vmatprep.subr.mxu0 %v9583_v16 }
 0x573   : > { %v2312_v5 = vand.u32 4294901760, %v2311_v4 }
 0x574   : > { %8734 = vmatmul.mubr.f32.vlgmr.msra.gmra.mxu0 %v2268_v31 }
 0x575   : > { %8727 = vmatpush3.xpose.msra.mxu1 %v2312_v5  ;;  %8742 = vmatpush3.xpose.msra.mxu0 %v2310_v20 }
 0x576   : > { %8743 = vmatprep.mubr.msk.f32.mxu0 %vm9584_vm3, %v9583_v16  ;;  %8736 = vmatprep.subr.mxu1 %v9583_v16 }
 0x577   : > { %8751 = vmatprep.subr.mxu0 %v9583_v16 }
 0x578   : > { %8729 = vmatmul.mubr.f32.vlgmr.msra.gmra.mxu1 %v2267_v27  ;;  %8744 = vmatmul.mubr.f32.vlgmr.msra.gmra.mxu0 %v2267_v27 }
 0x579   : > { %8737 = vmatpush3.xpose.msra.mxu1 %v2232_v34  ;;  %8738 = vmatprep.mubr.msk.f32.mxu1 %vm9584_vm3, %v9583_v16 }
 0x57a   : > { %8746 = vmatprep.subr.mxu1 %v9583_v16  ;;  %8753 = vmatprep.mubr.msk.f32.mxu0 %vm9584_vm3, %v9583_v16 }
 0x57c   : > { %8739 = vmatmul.mubr.f32.vlgmr.msra.gmra.mxu1 %v2269_v9 }
 0x57d   : > { %8747 = vmatpush3.xpose.msra.mxu1 %v2232_v34  ;;  %8748 = vmatprep.mubr.msk.f32.mxu1 %vm9584_vm3, %v9583_v16 }
 0x57e   : > { %8756 = vmatprep.subr.mxu1 %v9583_v16 }
 0x580   : > { %8749 = vmatmul.mubr.f32.vlgmr.msra.gmra.mxu1 %v2267_v27 }
 0x581   : > { %8758 = vmatprep.mubr.msk.f32.mxu1 %vm9584_vm3, %v9583_v16 }
 0x630   : > { %v2273_v6 = vpop.f32.mrf.mxu0 }
 0x632   : > { %v8725_v10 = vpop.f32.mrf.mxu0 }
 0x634   : > { %v2423_v11 = vpop.f32.mrf.mxu0 }
 0x636   : > { %v8735_v12 = vpop.f32.mrf.mxu0 }
 0x638   : > { %v2349_v17 = vpop.f32.mrf.mxu1  ;;  %v2571_v21 = vpop.f32.mrf.mxu0 }
 0x639   : > { %v2350_v25 = vadd.f32 %v2349_v17, %v2273_v6 }
 0x63a   : > { %v8730_v28 = vpop.f32.mrf.mxu1  ;;  %v8745_v30 = vpop.f32.mrf.mxu0 }
 0x63b   : > { %v2424_v35 = vadd.f32 %v2423_v11, %v2350_v25 }
 0x63c   : > { %v2497_v36 = vpop.f32.mrf.mxu1 }
 0x63d   : > { %v2498_v22 = vadd.f32 %v2497_v36, %v2424_v35 }
 0x63e   : > { %v8740_v40 = vpop.f32.mrf.mxu1 }
 0x63f   : > { %v2572_v43 = vadd.f32 %v2571_v21, %v2498_v22 }
 0x640   : > { %v2643_v48 = vpop.f32.mrf.mxu1 }
 0x641   : > { %v2644_v49 = vadd.f32 %v2643_v48, %v2572_v43 }
 0x642   : > { %v8750_v54 = vpop.f32.mrf.mxu1 }
 0x643   : > { %v2647_v55 = vsel %vm2190_vm5, %v2644_v49, -1e+30 }
 0x644   : > { %v2648_v58 = vsel %vm2195_vm4, %v2647_v55, -inf }
 0x645   : > { %2649 = vmax.xlane.f32.xlu1 %v2648_v58 }
 0x6ce   : > { %v2650_v59 = vpop.xlane.xlu1 %2649 }
 0x6cf   : > { %v2651_v29 = vsub.f32 %v2647_v55, %v2650_v59 }
 0x6d1   : > { %v2652_v60 = vmul.f32 1.442695, %v2651_v29 }
 0x6d3   : > { %9463 = vpow2.f32 %v2652_v60 }
 0x6e0   : > { %v9464_v2 = vpop.eup %9463 }
 0x6e1   : > { %v2654_v7 = vsel %vm2195_vm4, %v9464_v2, 0.0 }
 0x6e2   : > { %2655 = vadd.xlane.f32.xlu0 %v2654_v7 }
 0x6f8   : > { %2659 = vrot.lane.b32.xlu0 %v10592_v57, %s9586_s4  ;;  %s11700_s4 = scalar_lea.vmem %s11569_s10, %s9781_s1 }
 0x6fc   : > { %3113 = vrot.lane.b32.xlu0 %v10592_v57, %s9587_s28 }
 0x700   : > { %3111 = vrot.lane.b32.xlu0 %v10596_v26, %s9588_s9  ;;  %s11701_s9 = scalar_lea.vmem %s11570_s11, %s9781_s1 }
 0x76b   : > { %v2656_v13 = vpop.xlane.xlu0 %2655 }
 0x76c   : > { %9465 = vrcp.f32 %v2656_v13 }
 0x76f   : > { %v2660_v19 = vpop.permute.xlu0 %2659 }
 0x770   : > { %v2696_v3 = vand.u32 4294901760, %v2660_v19 }
 0x772   : > { %v2773_v23 = vsub.f32 %v2660_v19, %v2696_v3  ;;  %8752 = vmatpush3.msra.mxu0 %v2696_v3 }
 0x773   : > { %v3114_v52 = vpop.permute.xlu0 %3113  ;;  %8761 = vmatprep.subr.mxu0 %v9583_v16 }
 0x774   : > { %v2774_v37 = vand.u32 4294901760, %v2773_v23  ;;  %v3117_v44 = vsel %vm2195_vm4, %v3114_v52, 0 }
 0x775   : > { %v3150_v50 = vand.u32 4294901760, %v3117_v44 }
 0x776   : > { %v2775_v47 = vsub.f32 %v2773_v23, %v2774_v37 }
 0x777   : > { %v3227_v32 = vsub.f32 %v3117_v44, %v3150_v50  ;;  %v3112_v53 = vpop.permute.xlu0 %3111 }
 0x778   : > { %v2776_v62 = vand.u32 4294901760, %v2775_v47  ;;  %v3115_v38 = vsel %vm2195_vm4, %v3112_v53, 0 }
 0x779   : > { %v9466_v8 = vpop.eup %9465  ;;  %v3228_v0 = vand.u32 4294901760, %v3227_v32  ;;  %v3185_v45 = vand.u32 4294901760, %v3115_v38 }
 0x77a   : > { %8757 = vmatpush3.msra.mxu1 %v2776_v62  ;;  %v2658_v51 = vmul.f32 %v9466_v8, %v9464_v2 }
 0x77b   : > { %8766 = vmatprep.subr.mxu1 %v9583_v16  ;;  %v3229_v46 = vsub.f32 %v3227_v32, %v3228_v0  ;;  %v3186_v27 = vsub.f32 %v3115_v38, %v3185_v45 }
 0x77c   : > { %v2663_v63 = vsel %vm2195_vm4, %v2658_v51, 0 }
 0x77d   : > { %v2731_v1 = vand.u32 4294901760, %v2663_v63  ;;  %v3230_v9 = vand.u32 4294901760, %v3229_v46  ;;  %v3187_v56 = vand.u32 4294901760, %v3186_v27 }
 0x77f   : > { %v2732_v41 = vsub.f32 %v2663_v63, %v2731_v1  ;;  %8759 = vmatmul.mubr.f32.vlgmr.msra.gmra.mxu1 %v2731_v1  ;;  %v3188_v33 = vsub.f32 %v3186_v27, %v3187_v56 }
 0x780   : > { %8767 = vmatpush3.msra.mxu1 %v2696_v3  ;;  %8768 = vmatprep.mubr.msk.f32.mxu1 %vm9584_vm3, %v9583_v16 }
 0x781   : > { %8776 = vmatprep.subr.mxu1 %v9583_v16  ;;  %v2733_v39 = vand.u32 4294901760, %v2732_v41  ;;  %v3189_v15 = vand.u32 4294901760, %v3188_v33 }
 0x783   : > { %8769 = vmatmul.mubr.f32.vlgmr.msra.gmra.mxu1 %v2733_v39  ;;  %v2734_v61 = vsub.f32 %v2732_v41, %v2733_v39 }
 0x784   : > { %8777 = vmatpush3.msra.mxu1 %v2696_v3  ;;  %8778 = vmatprep.mubr.msk.f32.mxu1 %vm9584_vm3, %v9583_v16 }
 0x785   : > { %8786 = vmatprep.subr.mxu1 %v9583_v16  ;;  %v2735_v31 = vand.u32 4294901760, %v2734_v61 }
 0x787   : > { %8754 = vmatmul.mubr.f32.vlgmr.msra.gmra.mxu0 %v2735_v31  ;;  %8779 = vmatmul.mubr.f32.vlgmr.msra.gmra.mxu1 %v2731_v1 }
 0x788   : > { %8762 = vmatpush3.msra.mxu0 %v2773_v23  ;;  %8787 = vmatpush3.xpose.msra.mxu1 %v3230_v9 }
 0x789   : > { %8763 = vmatprep.mubr.msk.f32.mxu0 %vm9584_vm3, %v9583_v16  ;;  %8771 = vmatprep.subr.mxu0 %v9583_v16 }
 0x78a   : > { %8788 = vmatprep.mubr.msk.f32.mxu1 %vm9584_vm3, %v9583_v16  ;;  %8796 = vmatprep.subr.mxu1 %v9583_v16 }
 0x78b   : > { %8764 = vmatmul.mubr.f32.vlgmr.msra.gmra.mxu0 %v2732_v41  ;;  %8789 = vmatmul.mubr.f32.vlgmr.msra.gmra.mxu1 %v3185_v45 }
 0x78c   : > { %8772 = vmatpush3.msra.mxu0 %v2774_v37  ;;  %8797 = vmatpush3.xpose.msra.mxu1 %v3150_v50 }
 0x78d   : > { %8773 = vmatprep.mubr.msk.f32.mxu0 %vm9584_vm3, %v9583_v16  ;;  %8781 = vmatprep.subr.mxu0 %v9583_v16 }
 0x78e   : > { %8798 = vmatprep.mubr.msk.f32.mxu1 %vm9584_vm3, %v9583_v16  ;;  %8806 = vmatprep.subr.mxu1 %v9583_v16 }
 0x78f   : > { %8774 = vmatmul.mubr.f32.vlgmr.msra.gmra.mxu0 %v2731_v1  ;;  %8799 = vmatmul.mubr.f32.vlgmr.msra.gmra.mxu1 %v3187_v56 }
 0x790   : > { %8782 = vmatpush3.xpose.msra.mxu0 %v3150_v50  ;;  %8807 = vmatpush3.xpose.msra.mxu1 %v3150_v50 }
 0x791   : > { %8783 = vmatprep.mubr.msk.f32.mxu0 %vm9584_vm3, %v9583_v16  ;;  %8791 = vmatprep.subr.mxu0 %v9583_v16 }
 0x792   : > { %8808 = vmatprep.mubr.msk.f32.mxu1 %vm9584_vm3, %v9583_v16  ;;  %8816 = vmatprep.subr.mxu1 %v9583_v16 }
 0x793   : > { %8784 = vmatmul.mubr.f32.vlgmr.msra.gmra.mxu0 %v3189_v15  ;;  %8809 = vmatmul.mubr.f32.vlgmr.msra.gmra.mxu1 %v3185_v45 }
 0x794   : > { %8792 = vmatpush3.xpose.msra.mxu0 %v3227_v32  ;;  %8793 = vmatprep.mubr.msk.f32.mxu0 %vm9584_vm3, %v9583_v16 }
 0x795   : > { %8801 = vmatprep.subr.mxu0 %v9583_v16  ;;  %8818 = vmatprep.mubr.msk.f32.mxu1 %vm9584_vm3, %v9583_v16 }
 0x797   : > { %8794 = vmatmul.mubr.f32.vlgmr.msra.gmra.mxu0 %v3186_v27 }
 0x798   : > { %8802 = vmatpush3.xpose.msra.mxu0 %v3228_v0  ;;  %8803 = vmatprep.mubr.msk.f32.mxu0 %vm9584_vm3, %v9583_v16 }
 0x799   : > { %8811 = vmatprep.subr.mxu0 %v9583_v16 }
 0x79b   : > { %8804 = vmatmul.mubr.f32.vlgmr.msra.gmra.mxu0 %v3185_v45 }
 0x79c   : > { %8813 = vmatprep.mubr.msk.f32.mxu0 %vm9584_vm3, %v9583_v16 }
 0x83f   : > { %v2813_v34 = vpop.f32.mrf.mxu1 }
 0x841   : > { %v8760_v18 = vpop.f32.mrf.mxu1 }
 0x843   : > { %v2961_v14 = vpop.f32.mrf.mxu1 }
 0x845   : > { %v8770_v20 = vpop.f32.mrf.mxu1 }
 0x847   : > { %v2737_v4 = vpop.f32.mrf.mxu0  ;;  %v3107_v5 = vpop.f32.mrf.mxu1 }
 0x848   : > { %v2814_v6 = vadd.f32 %v2813_v34, %v2737_v4 }
 0x849   : > { %v8755_v10 = vpop.f32.mrf.mxu0  ;;  %v8780_v11 = vpop.f32.mrf.mxu1 }
 0x84b   : > { %v2887_v12 = vpop.f32.mrf.mxu0  ;;  %v3267_v17 = vpop.f32.mrf.mxu1 }
 0x84c   : > { %v2888_v21 = vadd.f32 %v2887_v12, %v2814_v6 }
 0x84d   : > { %v8765_v24 = vpop.f32.mrf.mxu0  ;;  %v8790_v25 = vpop.f32.mrf.mxu1 }
 0x84e   : > { %v2962_v28 = vadd.f32 %v2961_v14, %v2888_v21 }
 0x84f   : > { %v3035_v30 = vpop.f32.mrf.mxu0  ;;  %v3415_v35 = vpop.f32.mrf.mxu1 }
 0x850   : > { %v3036_v36 = vadd.f32 %v3035_v30, %v2962_v28 }
 0x851   : > { %v8775_v22 = vpop.f32.mrf.mxu0  ;;  %v8800_v40 = vpop.f32.mrf.mxu1 }
 0x852   : > { %v10668_v43 = vadd.f32 %v3107_v5, %v3036_v36 }
 0x853   : > { %v3191_v48 = vpop.f32.mrf.mxu0  ;;  %v3561_v49 = vpop.f32.mrf.mxu1 }
 0x854   : > { %v3268_v58 = vadd.f32 %v3267_v17, %v3191_v48 }
 0x855   : > { %v8785_v54 = vpop.f32.mrf.mxu0  ;;  %v8810_v55 = vpop.f32.mrf.mxu1 }
 0x857   : > { %v3341_v59 = vpop.f32.mrf.mxu0 }
 0x858   : > { %v3342_v29 = vadd.f32 %v3341_v59, %v3268_v58 }
 0x859   : > { %v8795_v60 = vpop.f32.mrf.mxu0 }
 0x85a   : > { %v3416_v2 = vadd.f32 %v3415_v35, %v3342_v29 }
 0x85b   : > { %v3489_v7 = vpop.f32.mrf.mxu0 }
 0x85c   : > { %v3490_v13 = vadd.f32 %v3489_v7, %v3416_v2 }
 0x85d   : > { %v8805_v19 = vpop.f32.mrf.mxu0 }
 0x85e   : > { %v3562_v3 = vadd.f32 %v3561_v49, %v3490_v13 }
 0x860   : > { %v3565_v23 = vsel %vm2190_vm5, %v3562_v3, -1e+30 }
 0x861   : > { %v3566_v52 = vsel %vm2195_vm4, %v3565_v23, -inf }
 0x862   : > { %3567 = vmax.xlane.f32.xlu1 %v3566_v52 }
 0x873   : > { %3577 = vrot.lane.b32.xlu1 %v10592_v57, %s9589_s19 }
 0x877   : > { %4031 = vrot.lane.b32.xlu1 %v10592_v57, %s9590_s30 }
 0x87b   : > { %4029 = vrot.lane.b32.xlu1 %v10596_v26, %s9591_s7  ;;  %s11702_s7 = scalar_lea.vmem %s11571_s12, %s9781_s1 }
 0x8eb   : > { %v3568_v37 = vpop.xlane.xlu1 %3567 }
 0x8ec   : > { %v3569_v44 = vsub.f32 %v3565_v23, %v3568_v37 }
 0x8ee   : > { %v3570_v47 = vmul.f32 1.442695, %v3569_v44 }
 0x8ef   : > { %v3578_v50 = vpop.permute.xlu1 %3577 }
 0x8f0   : > { %9467 = vpow2.f32 %v3570_v47  ;;  %v3614_v62 = vand.u32 4294901760, %v3578_v50 }
 0x8f2   : > { %v3691_v8 = vsub.f32 %v3578_v50, %v3614_v62  ;;  %8812 = vmatpush3.msra.mxu0 %v3614_v62 }
 0x8f3   : > { %8821 = vmatprep.subr.mxu0 %v9583_v16  ;;  %v4032_v38 = vpop.permute.xlu1 %4031 }
 0x8f4   : > { %v3692_v32 = vand.u32 4294901760, %v3691_v8  ;;  %v4035_v41 = vsel %vm2195_vm4, %v4032_v38, 0 }
 0x8f5   : > { %v4068_v45 = vand.u32 4294901760, %v4035_v41 }
 0x8f6   : > { %v3693_v51 = vsub.f32 %v3691_v8, %v3692_v32 }
 0x8f7   : > { %v4145_v46 = vsub.f32 %v4035_v41, %v4068_v45  ;;  %v4030_v27 = vpop.permute.xlu1 %4029 }
 0x8f8   : > { %v3694_v53 = vand.u32 4294901760, %v3693_v51  ;;  %v4033_v33 = vsel %vm2195_vm4, %v4030_v27, 0 }
 0x8f9   : > { %v4146_v56 = vand.u32 4294901760, %v4145_v46  ;;  %v4103_v34 = vand.u32 4294901760, %v4033_v33 }
 0x8fa   : > { %8817 = vmatpush3.msra.mxu1 %v3694_v53 }
 0x8fb   : > { %8826 = vmatprep.subr.mxu1 %v9583_v16  ;;  %v4147_v14 = vsub.f32 %v4145_v46, %v4146_v56  ;;  %v4104_v4 = vsub.f32 %v4033_v33, %v4103_v34 }
 0x8fd   : > { %v9468_v63 = vpop.eup %9467  ;;  %v4148_v6 = vand.u32 4294901760, %v4147_v14  ;;  %v4105_v10 = vand.u32 4294901760, %v4104_v4 }
 0x8fe   : > { %v3572_v1 = vsel %vm2195_vm4, %v9468_v63, 0.0 }
 0x8ff   : > { %3573 = vadd.xlane.f32.xlu0 %v3572_v1  ;;  %v4106_v11 = vsub.f32 %v4104_v4, %v4105_v10 }
 0x901   : > { %v4107_v12 = vand.u32 4294901760, %v4106_v11 }
 0x988   : > { %v3574_v0 = vpop.xlane.xlu0 %3573 }
 0x989   : > { %9469 = vrcp.f32 %v3574_v0 }
 0x996   : > { %v9470_v39 = vpop.eup %9469 }
 0x997   : > { %v3576_v61 = vmul.f32 %v9470_v39, %v9468_v63 }
 0x999   : > { %v3581_v31 = vsel %vm2195_vm4, %v3576_v61, 0 }
 0x99a   : > { %v3649_v9 = vand.u32 4294901760, %v3581_v31 }
 0x99c   : > { %v3650_v15 = vsub.f32 %v3581_v31, %v3649_v9  ;;  %8819 = vmatmul.mubr.f32.vlgmr.msra.gmra.mxu1 %v3649_v9 }
 0x99d   : > { %8827 = vmatpush3.msra.mxu1 %v3614_v62  ;;  %8828 = vmatprep.mubr.msk.f32.mxu1 %vm9584_vm3, %v9583_v16 }
 0x99e   : > { %8836 = vmatprep.subr.mxu1 %v9583_v16  ;;  %v3651_v18 = vand.u32 4294901760, %v3650_v15 }
 0x9a0   : > { %8829 = vmatmul.mubr.f32.vlgmr.msra.gmra.mxu1 %v3651_v18  ;;  %v3652_v20 = vsub.f32 %v3650_v15, %v3651_v18 }
 0x9a1   : > { %8837 = vmatpush3.msra.mxu1 %v3614_v62  ;;  %8838 = vmatprep.mubr.msk.f32.mxu1 %vm9584_vm3, %v9583_v16 }
 0x9a2   : > { %8846 = vmatprep.subr.mxu1 %v9583_v16  ;;  %v3653_v5 = vand.u32 4294901760, %v3652_v20 }
 0x9a4   : > { %8814 = vmatmul.mubr.f32.vlgmr.msra.gmra.mxu0 %v3653_v5  ;;  %8839 = vmatmul.mubr.f32.vlgmr.msra.gmra.mxu1 %v3649_v9 }
 0x9a5   : > { %8822 = vmatpush3.msra.mxu0 %v3691_v8  ;;  %8847 = vmatpush3.xpose.msra.mxu1 %v4148_v6 }
 0x9a6   : > { %8823 = vmatprep.mubr.msk.f32.mxu0 %vm9584_vm3, %v9583_v16  ;;  %8831 = vmatprep.subr.mxu0 %v9583_v16 }
 0x9a7   : > { %8848 = vmatprep.mubr.msk.f32.mxu1 %vm9584_vm3, %v9583_v16  ;;  %8856 = vmatprep.subr.mxu1 %v9583_v16 }
 0x9a8   : > { %8824 = vmatmul.mubr.f32.vlgmr.msra.gmra.mxu0 %v3650_v15  ;;  %8849 = vmatmul.mubr.f32.vlgmr.msra.gmra.mxu1 %v4103_v34 }
 0x9a9   : > { %8832 = vmatpush3.msra.mxu0 %v3692_v32  ;;  %8857 = vmatpush3.xpose.msra.mxu1 %v4068_v45 }
 0x9aa   : > { %8833 = vmatprep.mubr.msk.f32.mxu0 %vm9584_vm3, %v9583_v16  ;;  %8841 = vmatprep.subr.mxu0 %v9583_v16 }
 0x9ab   : > { %8858 = vmatprep.mubr.msk.f32.mxu1 %vm9584_vm3, %v9583_v16  ;;  %8866 = vmatprep.subr.mxu1 %v9583_v16 }
 0x9ac   : > { %8834 = vmatmul.mubr.f32.vlgmr.msra.gmra.mxu0 %v3649_v9  ;;  %8859 = vmatmul.mubr.f32.vlgmr.msra.gmra.mxu1 %v4105_v10 }
 0x9ad   : > { %8842 = vmatpush3.xpose.msra.mxu0 %v4068_v45  ;;  %8867 = vmatpush3.xpose.msra.mxu1 %v4068_v45 }
 0x9ae   : > { %8843 = vmatprep.mubr.msk.f32.mxu0 %vm9584_vm3, %v9583_v16  ;;  %8851 = vmatprep.subr.mxu0 %v9583_v16 }
 0x9af   : > { %8868 = vmatprep.mubr.msk.f32.mxu1 %vm9584_vm3, %v9583_v16  ;;  %8876 = vmatprep.subr.mxu1 %v9583_v16 }
 0x9b0   : > { %8844 = vmatmul.mubr.f32.vlgmr.msra.gmra.mxu0 %v4107_v12  ;;  %8869 = vmatmul.mubr.f32.vlgmr.msra.gmra.mxu1 %v4103_v34 }
 0x9b1   : > { %8852 = vmatpush3.xpose.msra.mxu0 %v4145_v46  ;;  %8853 = vmatprep.mubr.msk.f32.mxu0 %vm9584_vm3, %v9583_v16 }
 0x9b2   : > { %8861 = vmatprep.subr.mxu0 %v9583_v16  ;;  %8878 = vmatprep.mubr.msk.f32.mxu1 %vm9584_vm3, %v9583_v16 }
 0x9b4   : > { %8854 = vmatmul.mubr.f32.vlgmr.msra.gmra.mxu0 %v4104_v4 }
 0x9b5   : > { %8862 = vmatpush3.xpose.msra.mxu0 %v4146_v56  ;;  %8863 = vmatprep.mubr.msk.f32.mxu0 %vm9584_vm3, %v9583_v16 }
 0x9b6   : > { %8871 = vmatprep.subr.mxu0 %v9583_v16 }
 0x9b8   : > { %8864 = vmatmul.mubr.f32.vlgmr.msra.gmra.mxu0 %v4103_v34 }
 0x9b9   : > { %8873 = vmatprep.mubr.msk.f32.mxu0 %vm9584_vm3, %v9583_v16 }
 0xa5c   : > { %v3731_v17 = vpop.f32.mrf.mxu1 }
 0xa5e   : > { %v8820_v21 = vpop.f32.mrf.mxu1 }
 0xa60   : > { %v3879_v24 = vpop.f32.mrf.mxu1 }
 0xa62   : > { %v8830_v25 = vpop.f32.mrf.mxu1 }
 0xa64   : > { %v3655_v28 = vpop.f32.mrf.mxu0  ;;  %v4025_v30 = vpop.f32.mrf.mxu1 }
 0xa65   : > { %v3732_v35 = vadd.f32 %v3731_v17, %v3655_v28 }
 0xa66   : > { %v8815_v36 = vpop.f32.mrf.mxu0  ;;  %v8840_v22 = vpop.f32.mrf.mxu1 }
 0xa68   : > { %v3805_v40 = vpop.f32.mrf.mxu0  ;;  %v4185_v48 = vpop.f32.mrf.mxu1 }
 0xa69   : > { %v3806_v49 = vadd.f32 %v3805_v40, %v3732_v35 }
 0xa6a   : > { %v8825_v54 = vpop.f32.mrf.mxu0  ;;  %v8850_v55 = vpop.f32.mrf.mxu1 }
 0xa6b   : > { %v3880_v58 = vadd.f32 %v3879_v24, %v3806_v49 }
 0xa6c   : > { %v3953_v59 = vpop.f32.mrf.mxu0  ;;  %v4333_v29 = vpop.f32.mrf.mxu1 }
 0xa6d   : > { %v3954_v60 = vadd.f32 %v3953_v59, %v3880_v58 }
 0xa6e   : > { %v8835_v2 = vpop.f32.mrf.mxu0  ;;  %v8860_v7 = vpop.f32.mrf.mxu1 }
 0xa6f   : > { %v10716_v13 = vadd.f32 %v4025_v30, %v3954_v60 }
 0xa70   : > { %v4109_v19 = vpop.f32.mrf.mxu0  ;;  %v4479_v3 = vpop.f32.mrf.mxu1 }
 0xa71   : > { %v4186_v37 = vadd.f32 %v4185_v48, %v4109_v19 }
 0xa72   : > { %v8845_v23 = vpop.f32.mrf.mxu0  ;;  %v8870_v52 = vpop.f32.mrf.mxu1 }
 0xa74   : > { %v4259_v44 = vpop.f32.mrf.mxu0 }
 0xa75   : > { %v4260_v47 = vadd.f32 %v4259_v44, %v4186_v37 }
 0xa76   : > { %v8855_v50 = vpop.f32.mrf.mxu0 }
 0xa77   : > { %v4334_v62 = vadd.f32 %v4333_v29, %v4260_v47 }
 0xa78   : > { %v4407_v8 = vpop.f32.mrf.mxu0 }
 0xa79   : > { %v4408_v32 = vadd.f32 %v4407_v8, %v4334_v62 }
 0xa7a   : > { %v8865_v51 = vpop.f32.mrf.mxu0 }
 0xa7b   : > { %v4480_v53 = vadd.f32 %v4479_v3, %v4408_v32 }
 0xa7d   : > { %v4483_v63 = vsel %vm2190_vm5, %v4480_v53, -1e+30 }
 0xa7e   : > { %v4484_v1 = vsel %vm2195_vm4, %v4483_v63, -inf }
 0xa7f   : > { %4485 = vmax.xlane.f32.xlu1 %v4484_v1 }
 0xb08   : > { %v4486_v0 = vpop.xlane.xlu1 %4485 }
 0xb09   : > { %v4487_v38 = vsub.f32 %v4483_v63, %v4486_v0 }
 0xb0b   : > { %v4488_v41 = vmul.f32 1.442695, %v4487_v38 }
 0xb0d   : > { %9471 = vpow2.f32 %v4488_v41 }
 0xb1a   : > { %v9472_v45 = vpop.eup %9471 }
 0xb1b   : > { %v4490_v39 = vsel %vm2195_vm4, %v9472_v45, 0.0 }
 0xb1c   : > { %4491 = vadd.xlane.f32.xlu0 %v4490_v39 }
 0xb32   : > { %4495 = vrot.lane.b32.xlu0 %v10592_v57, %s9592_s29 }
 0xb36   : > { %4949 = vrot.lane.b32.xlu0 %v10592_v57, %s9593_s26  ;;  %s11703_s26 = scalar_lea.vmem %s11573_s14, %s9781_s1 }
 0xb3a   : > { %4947 = vrot.lane.b32.xlu0 %v10596_v26, %s9594_s17 }
 0xba5   : > { %v4492_v46 = vpop.xlane.xlu0 %4491 }
 0xba6   : > { %9473 = vrcp.f32 %v4492_v46 }
 0xba9   : > { %v4496_v61 = vpop.permute.xlu0 %4495 }
 0xbaa   : > { %v4532_v27 = vand.u32 4294901760, %v4496_v61 }
 0xbac   : > { %v4609_v31 = vsub.f32 %v4496_v61, %v4532_v27  ;;  %8872 = vmatpush3.msra.mxu0 %v4532_v27 }
 0xbad   : > { %v4950_v9 = vpop.permute.xlu0 %4949  ;;  %8881 = vmatprep.subr.mxu0 %v9583_v16 }
 0xbae   : > { %v4610_v56 = vand.u32 4294901760, %v4609_v31  ;;  %v4953_v33 = vsel %vm2195_vm4, %v4950_v9, 0 }
 0xbaf   : > { %v4986_v34 = vand.u32 4294901760, %v4953_v33 }
 0xbb0   : > { %v4611_v15 = vsub.f32 %v4609_v31, %v4610_v56 }
 0xbb1   : > { %v5063_v20 = vsub.f32 %v4953_v33, %v4986_v34  ;;  %v4948_v26 = vpop.permute.xlu0 %4947 }
 0xbb2   : > { %v4612_v18 = vand.u32 4294901760, %v4611_v15  ;;  %v4951_v11 = vsel %vm2195_vm4, %v4948_v26, 0 }
 0xbb3   : > { %v9474_v14 = vpop.eup %9473  ;;  %v5064_v10 = vand.u32 4294901760, %v5063_v20  ;;  %v5021_v17 = vand.u32 4294901760, %v4951_v11 }
 0xbb4   : > { %8877 = vmatpush3.msra.mxu1 %v4612_v18  ;;  %v4494_v4 = vmul.f32 %v9474_v14, %v9472_v45 }
 0xbb5   : > { %8886 = vmatprep.subr.mxu1 %v9583_v16  ;;  %v5065_v24 = vsub.f32 %v5063_v20, %v5064_v10  ;;  %v5022_v28 = vsub.f32 %v4951_v11, %v5021_v17 }
 0xbb6   : > { %v4499_v5 = vsel %vm2195_vm4, %v4494_v4, 0 }
 0xbb7   : > { %v4567_v6 = vand.u32 4294901760, %v4499_v5  ;;  %v5066_v35 = vand.u32 4294901760, %v5065_v24  ;;  %v5023_v36 = vand.u32 4294901760, %v5022_v28 }
 0xbb9   : > { %v4568_v12 = vsub.f32 %v4499_v5, %v4567_v6  ;;  %8879 = vmatmul.mubr.f32.vlgmr.msra.gmra.mxu1 %v4567_v6  ;;  %v5024_v22 = vsub.f32 %v5022_v28, %v5023_v36 }
 0xbba   : > { %8887 = vmatpush3.msra.mxu1 %v4532_v27  ;;  %8888 = vmatprep.mubr.msk.f32.mxu1 %vm9584_vm3, %v9583_v16 }
 0xbbb   : > { %8896 = vmatprep.subr.mxu1 %v9583_v16  ;;  %v4569_v21 = vand.u32 4294901760, %v4568_v12  ;;  %v5025_v40 = vand.u32 4294901760, %v5024_v22 }
 0xbbd   : > { %8889 = vmatmul.mubr.f32.vlgmr.msra.gmra.mxu1 %v4569_v21  ;;  %v4570_v25 = vsub.f32 %v4568_v12, %v4569_v21 }
 0xbbe   : > { %8897 = vmatpush3.msra.mxu1 %v4532_v27  ;;  %8898 = vmatprep.mubr.msk.f32.mxu1 %vm9584_vm3, %v9583_v16 }
 0xbbf   : > { %8906 = vmatprep.subr.mxu1 %v9583_v16  ;;  %v4571_v30 = vand.u32 4294901760, %v4570_v25 }
 0xbc1   : > { %8874 = vmatmul.mubr.f32.vlgmr.msra.gmra.mxu0 %v4571_v30  ;;  %8899 = vmatmul.mubr.f32.vlgmr.msra.gmra.mxu1 %v4567_v6  ;;  %v5884_v30 = vld [vmem:[%s9809_s27 + $0x10] sm:$0xff] }
 0xbc2   : > { %8882 = vmatpush3.msra.mxu0 %v4609_v31  ;;  %8907 = vmatpush3.xpose.msra.mxu1 %v5066_v35 }
 0xbc3   : > { %8883 = vmatprep.mubr.msk.f32.mxu0 %vm9584_vm3, %v9583_v16  ;;  %8891 = vmatprep.subr.mxu0 %v9583_v16 }
 0xbc4   : > { %8908 = vmatprep.mubr.msk.f32.mxu1 %vm9584_vm3, %v9583_v16  ;;  %8916 = vmatprep.subr.mxu1 %v9583_v16 }
 0xbc5   : > { %8884 = vmatmul.mubr.f32.vlgmr.msra.gmra.mxu0 %v4568_v12  ;;  %8909 = vmatmul.mubr.f32.vlgmr.msra.gmra.mxu1 %v5021_v17 }
 0xbc6   : > { %8892 = vmatpush3.msra.mxu0 %v4610_v56  ;;  %8917 = vmatpush3.xpose.msra.mxu1 %v4986_v34 }
 0xbc7   : > { %8893 = vmatprep.mubr.msk.f32.mxu0 %vm9584_vm3, %v9583_v16  ;;  %8901 = vmatprep.subr.mxu0 %v9583_v16 }
 0xbc8   : > { %8918 = vmatprep.mubr.msk.f32.mxu1 %vm9584_vm3, %v9583_v16  ;;  %8926 = vmatprep.subr.mxu1 %v9583_v16 }
 0xbc9   : > { %8894 = vmatmul.mubr.f32.vlgmr.msra.gmra.mxu0 %v4567_v6  ;;  %8919 = vmatmul.mubr.f32.vlgmr.msra.gmra.mxu1 %v5023_v36  ;;  %v10793_v36 = vand.u32 4294901760, %v5884_v30 }
 0xbca   : > { %8902 = vmatpush3.xpose.msra.mxu0 %v4986_v34  ;;  %8927 = vmatpush3.xpose.msra.mxu1 %v4986_v34 }
 0xbcb   : > { %8903 = vmatprep.mubr.msk.f32.mxu0 %vm9584_vm3, %v9583_v16  ;;  %8911 = vmatprep.subr.mxu0 %v9583_v16 }
 0xbcc   : > { %8928 = vmatprep.mubr.msk.f32.mxu1 %vm9584_vm3, %v9583_v16  ;;  %8936 = vmatprep.subr.mxu1 %v9583_v16 }
 0xbcd   : > { %8904 = vmatmul.mubr.f32.vlgmr.msra.gmra.mxu0 %v5025_v40  ;;  %8929 = vmatmul.mubr.f32.vlgmr.msra.gmra.mxu1 %v5021_v17  ;;  %v10799_v40 = vsub.f32 %v5884_v30, %v10793_v36 }
 0xbce   : > { %8912 = vmatpush3.xpose.msra.mxu0 %v5063_v20  ;;  %8913 = vmatprep.mubr.msk.f32.mxu0 %vm9584_vm3, %v9583_v16 }
 0xbcf   : > { %8921 = vmatprep.subr.mxu0 %v9583_v16  ;;  %8938 = vmatprep.mubr.msk.f32.mxu1 %vm9584_vm3, %v9583_v16 }
 0xbd1   : > { %8914 = vmatmul.mubr.f32.vlgmr.msra.gmra.mxu0 %v5022_v28  ;;  %v5885_v28 = vld [vmem:[%s9809_s27 + $0x18] sm:$0xff] }
 0xbd2   : > { %8922 = vmatpush3.xpose.msra.mxu0 %v5064_v10  ;;  %8923 = vmatprep.mubr.msk.f32.mxu0 %vm9584_vm3, %v9583_v16  ;;  %v10791_v35 = vand.u32 4294901760, %v5885_v28 }
 0xbd3   : > { %8931 = vmatprep.subr.mxu0 %v9583_v16 }
 0xbd4   : > { %v10796_v22 = vsub.f32 %v5885_v28, %v10791_v35 }
 0xbd5   : > { %8924 = vmatmul.mubr.f32.vlgmr.msra.gmra.mxu0 %v5021_v17 }
 0xbd6   : > { %8933 = vmatprep.mubr.msk.f32.mxu0 %vm9584_vm3, %v9583_v16 }
 0xc79   : > { %v4649_v48 = vpop.f32.mrf.mxu1 }
 0xc7b   : > { %v8880_v49 = vpop.f32.mrf.mxu1 }
 0xc7c   : > { %v6002_v49 = vand.u32 4294901760, %v10799_v40 }
 0xc7d   : > { %v4797_v54 = vpop.f32.mrf.mxu1 }
 0xc7f   : > { %v8890_v55 = vpop.f32.mrf.mxu1 }
 0xc80   : > { %v6003_v55 = vsub.f32 %v10799_v40, %v6002_v49 }
 0xc81   : > { %v4573_v58 = vpop.f32.mrf.mxu0  ;;  %v4943_v59 = vpop.f32.mrf.mxu1 }
 0xc82   : > { %v4650_v61 = vadd.f32 %v4649_v48, %v4573_v58  ;;  %v5995_v48 = vand.u32 4294901760, %v10796_v22 }
 0xc83   : > { %v8875_v29 = vpop.f32.mrf.mxu0  ;;  %v8900_v60 = vpop.f32.mrf.mxu1 }
 0xc84   : > { %v5883_v29 = vld [vmem:[%s9809_s27 + $0x8] sm:$0xff] }
 0xc85   : > { %v4723_v2 = vpop.f32.mrf.mxu0  ;;  %v5103_v7 = vpop.f32.mrf.mxu1  ;;  %v10816_v60 = vand.u32 4294901760, %v5883_v29 }
 0xc86   : > { %v4724_v27 = vadd.f32 %v4723_v2, %v4650_v61 }
 0xc87   : > { %v8885_v19 = vpop.f32.mrf.mxu0  ;;  %v8910_v3 = vpop.f32.mrf.mxu1 }
 0xc88   : > { %v4798_v31 = vadd.f32 %v4797_v54, %v4724_v27  ;;  %v5996_v54 = vsub.f32 %v10796_v22, %v5995_v48  ;;  %v10820_v19 = vsub.f32 %v5883_v29, %v10816_v60 }
 0xc89   : > { %v4871_v23 = vpop.f32.mrf.mxu0  ;;  %v5251_v52 = vpop.f32.mrf.mxu1 }
 0xc8a   : > { %v4872_v9 = vadd.f32 %v4871_v23, %v4798_v31  ;;  %v5997_v58 = vand.u32 4294901760, %v5996_v54  ;;  %v9485_v54 = vld [vmem:[#allocation2] sm:$0xff] }
 0xc8b   : > { %v8895_v37 = vpop.f32.mrf.mxu0  ;;  %v8920_v44 = vpop.f32.mrf.mxu1 }
 0xc8c   : > { %v4944_v56 = vadd.f32 %v4943_v59, %v4872_v9  ;;  %v6004_v59 = vand.u32 4294901760, %v6003_v55 }
 0xc8d   : > { %v5027_v47 = vpop.f32.mrf.mxu0  ;;  %v5397_v50 = vpop.f32.mrf.mxu1 }
 0xc8e   : > { %v5104_v32 = vadd.f32 %v5103_v7, %v5027_v47  ;;  %v5882_v7 = vld [vmem:[%s9809_s27] sm:$0xff]  ;;  %s9598_s27 = smov 24  }
 0xc8f   : > { %v8905_v62 = vpop.f32.mrf.mxu0  ;;  %v8930_v8 = vpop.f32.mrf.mxu1  ;;  %v10822_v3 = vand.u32 4294901760, %v5882_v7 }
 0xc91   : > { %v5177_v51 = vpop.f32.mrf.mxu0  ;;  %v10828_v37 = vsub.f32 %v5882_v7, %v10822_v3 }
 0xc92   : > { %v5178_v53 = vadd.f32 %v5177_v51, %v5104_v32 }
 0xc93   : > { %v8915_v63 = vpop.f32.mrf.mxu0 }
 0xc94   : > { %v5252_v1 = vadd.f32 %v5251_v52, %v5178_v53  ;;  %v6009_v52 = vand.u32 4294901760, %v10820_v19 }
 0xc95   : > { %v5325_v0 = vpop.f32.mrf.mxu0 }
 0xc96   : > { %v5326_v38 = vadd.f32 %v5325_v0, %v5252_v1  ;;  %v6010_v47 = vsub.f32 %v10820_v19, %v6009_v52 }
 0xc97   : > { %v8925_v41 = vpop.f32.mrf.mxu0 }
 0xc98   : > { %v5398_v45 = vadd.f32 %v5397_v50, %v5326_v38  ;;  %v6016_v50 = vand.u32 4294901760, %v10828_v37  ;;  %v6011_v8 = vand.u32 4294901760, %v6010_v47 }
 0xc9a   : > { %v5401_v39 = vsel %vm2190_vm5, %v5398_v45, -1e+30  ;;  %v6017_v32 = vsub.f32 %v10828_v37, %v6016_v50 }
 0xc9b   : > { %v5402_v46 = vsel %vm2195_vm4, %v5401_v39, -inf }
 0xc9c   : > { %5403 = vmax.xlane.f32.xlu1 %v5402_v46  ;;  %v6018_v63 = vand.u32 4294901760, %v6017_v32 }
 0xcad   : > { %5413 = vrot.lane.b32.xlu1 %v10592_v57, %s9595_s6 }
 0xcb1   : > { %5866 = vrot.lane.b32.xlu1 %v10716_v13, %s9596_s2  ;;  %s11712_s2 = sld [smem:[#allocation8_spill]] }
 0xcb5   : > { %5870 = vrot.lane.b32.xlu1 %v4944_v56, %s9597_s24 }
 0xcb7   : > { %p8328_p1 = scmp.ne.s32.totalorder %s11712_s2, 1 }
 0xcb8   : > { %s11714_s30 = sld [smem:[#allocation28_spill]] (!%p8328_p1) }
 0xcb9   : > { %s11715_s29 = sld [smem:[#allocation29_spill]] (!%p8328_p1) }
 0xd25   : > { %v5404_v33 = vpop.xlane.xlu1 %5403 }
 0xd26   : > { %v5405_v15 = vsub.f32 %v5401_v39, %v5404_v33 }
 0xd28   : > { %v5406_v42 = vmul.f32 1.442695, %v5405_v15 }
 0xd29   : > { %v5414_v34 = vpop.permute.xlu1 %5413 }
 0xd2a   : > { %9475 = vpow2.f32 %v5406_v42  ;;  %v5450_v18 = vand.u32 4294901760, %v5414_v34 }
 0xd2c   : > { %v5527_v14 = vsub.f32 %v5414_v34, %v5450_v18  ;;  %8932 = vmatpush3.msra.mxu0 %v5450_v18 }
 0xd2d   : > { %8941 = vmatprep.subr.mxu0 %v9583_v16  ;;  %v5867_v56 = vpop.permute.xlu1 %5866 }
 0xd2e   : > { %v5528_v20 = vand.u32 4294901760, %v5527_v14  ;;  %v5877_v15 = vsel %vm2195_vm4, %v10668_v43, %v5867_v56 }
 0xd30   : > { %v5529_v4 = vsub.f32 %v5527_v14, %v5528_v20 }
 0xd31   : > { %v5871_v33 = vpop.permute.xlu1 %5870 }
 0xd32   : > { %v5530_v57 = vand.u32 4294901760, %v5529_v4  ;;  %v5879_v42 = vsel %vm5878_vm6, %v5877_v15, %v5871_v33 }
 0xd34   : > { %8937 = vmatpush3.msra.mxu1 %v5530_v57 }
 0xd35   : > { %8946 = vmatprep.subr.mxu1 %v9583_v16 }
 0xd37   : > { %v9476_v13 = vpop.eup %9475 }
 0xd38   : > { %v5408_v26 = vsel %vm2195_vm4, %v9476_v13, 0.0 }
 0xd39   : > { %5409 = vadd.xlane.f32.xlu0 %v5408_v26 }
 0xdc2   : > { %v5410_v5 = vpop.xlane.xlu0 %5409 }
 0xdc3   : > { %9477 = vrcp.f32 %v5410_v5 }
 0xdd0   : > { %v9478_v6 = vpop.eup %9477 }
 0xdd1   : > { %v5412_v10 = vmul.f32 %v9478_v6, %v9476_v13 }
 0xdd3   : > { %v5417_v11 = vsel %vm2195_vm4, %v5412_v10, 0 }
 0xdd4   : > { %v5485_v12 = vand.u32 4294901760, %v5417_v11 }
 0xdd6   : > { %v5486_v17 = vsub.f32 %v5417_v11, %v5485_v12  ;;  %8939 = vmatmul.mubr.f32.vlgmr.msra.gmra.mxu1 %v5485_v12 }
 0xdd7   : > { %8947 = vmatpush3.msra.mxu1 %v5450_v18  ;;  %8948 = vmatprep.mubr.msk.f32.mxu1 %vm9584_vm3, %v9583_v16 }
 0xdd8   : > { %8956 = vmatprep.subr.mxu1 %v9583_v16  ;;  %v5487_v21 = vand.u32 4294901760, %v5486_v17 }
 0xdda   : > { %8949 = vmatmul.mubr.f32.vlgmr.msra.gmra.mxu1 %v5487_v21  ;;  %v5488_v24 = vsub.f32 %v5486_v17, %v5487_v21 }
 0xddb   : > { %8957 = vmatpush3.msra.mxu1 %v5450_v18  ;;  %8958 = vmatprep.mubr.msk.f32.mxu1 %vm9584_vm3, %v9583_v16 }
 0xddc   : > { %v5489_v25 = vand.u32 4294901760, %v5488_v24  ;;  %8972 = vmatprep.subr.mxu1 %v9583_v16 }
 0xdde   : > { %8934 = vmatmul.mubr.f32.vlgmr.msra.gmra.mxu0 %v5489_v25  ;;  %8959 = vmatmul.mubr.f32.vlgmr.msra.gmra.mxu1 %v5485_v12 }
 0xddf   : > { %8942 = vmatpush3.msra.mxu0 %v5527_v14  ;;  %8943 = vmatprep.mubr.msk.f32.mxu0 %vm9584_vm3, %v9583_v16 }
 0xde0   : > { %8951 = vmatprep.subr.mxu0 %v9583_v16  ;;  %8980 = vmatprep.mubr.msk.f32.mxu1 %vm9584_vm3, %v9583_v16 }
 0xde1   : > { %8973 = vmatpush3.msra.mxu1 %v5997_v58 }
 0xde2   : > { %8944 = vmatmul.mubr.f32.vlgmr.msra.gmra.mxu0 %v5486_v17  ;;  %8974 = vmatprep.subr.mxu1 %v9583_v16 }
 0xde3   : > { %8952 = vmatpush3.msra.mxu0 %v5528_v20  ;;  %8953 = vmatprep.mubr.msk.f32.mxu0 %vm9584_vm3, %v9583_v16 }
 0xde4   : > { %8961 = vmatprep.subr.mxu0 %v9583_v16  ;;  %8975 = vmatpush3.msra.mxu1 %v6004_v59 }
 0xde5   : > { %8976 = vmatprep.subr.mxu1 %v9583_v16 }
 0xde6   : > { %8954 = vmatmul.mubr.f32.vlgmr.msra.gmra.mxu0 %v5485_v12  ;;  %8977 = vmatpush3.msra.mxu1 %v6011_v8 }
 0xde7   : > { %8969 = vmatprep.mubr.msk.f32.mxu0 %vm9584_vm3, %v9583_v16  ;;  %8962 = vmatpush3.msra.mxu0 %v10791_v35 }
 0xde8   : > { %8963 = vmatprep.subr.mxu0 %v9583_v16  ;;  %8978 = vmatprep.subr.mxu1 %v9583_v16 }
 0xde9   : > { %8964 = vmatpush3.msra.mxu0 %v10793_v36  ;;  %8979 = vmatpush3.msra.mxu1 %v6018_v63 }
 0xdea   : > { %8965 = vmatprep.subr.mxu0 %v9583_v16  ;;  %8994 = vmatprep.subr.mxu1 %v9583_v16 }
 0xdeb   : > { %8966 = vmatpush3.msra.mxu0 %v10816_v60 }
 0xdec   : > { %8967 = vmatprep.subr.mxu0 %v9583_v16 }
 0xded   : > { %8968 = vmatpush3.msra.mxu0 %v10822_v3 }
 0xdee   : > { %8983 = vmatprep.subr.mxu0 %v9583_v16 }
 0xe96   : > { %v5567_v2 = vpop.f32.mrf.mxu1 }
 0xe98   : > { %v8940_v23 = vpop.f32.mrf.mxu1 }
 0xe99   : > { %v6414_v23 = vld [vmem:[%s9826_s25 + $0x10] sm:$0xff] }
 0xe9a   : > { %v5715_v44 = vpop.f32.mrf.mxu1 }
 0xe9c   : > { %v8950_v62 = vpop.f32.mrf.mxu1 }
 0xe9e   : > { %v5491_v51 = vpop.f32.mrf.mxu0  ;;  %v5861_v53 = vpop.f32.mrf.mxu1 }
 0xe9f   : > { %v5568_v38 = vadd.f32 %v5567_v2, %v5491_v51 }
 0xea0   : > { %v8935_v1 = vpop.f32.mrf.mxu0  ;;  %v8960_v0 = vpop.f32.mrf.mxu1 }
 0xea2   : > { %v5641_v41 = vpop.f32.mrf.mxu0 }
 0xea3   : > { %v5642_v45 = vadd.f32 %v5641_v41, %v5568_v38 }
 0xea4   : > { %v8945_v39 = vpop.f32.mrf.mxu0 }
 0xea5   : > { %v5716_v46 = vadd.f32 %v5715_v44, %v5642_v45  ;;  %v10908_v44 = vand.u32 4294901760, %v6414_v23 }
 0xea6   : > { %v5789_v61 = vpop.f32.mrf.mxu0 }
 0xea7   : > { %v5790_v27 = vadd.f32 %v5789_v61, %v5716_v46  ;;  %v10919_v32 = vsub.f32 %v6414_v23, %v10908_v44 }
 0xea8   : > { %v8955_v31 = vpop.f32.mrf.mxu0 }
 0xea9   : > { %v5862_v9 = vadd.f32 %v5861_v53, %v5790_v27  ;;  %v6539_v1 = vand.u32 4294901760, %v10919_v32 }
 0xeab   : > { %5874 = vrot.lane.b32.xlu1 %v5862_v9, %s9598_s27  ;;  %v6540_v45 = vsub.f32 %v10919_v32, %v6539_v1 }
 0xead   : > { %v6541_v61 = vand.u32 4294901760, %v6540_v45 }
 0xf1d   : > { %v5875_v34 = vpop.permute.xlu1 %5874 }
 0xf1e   : > { %v5881_v18 = vsel %vm5880_vm7, %v5879_v42, %v5875_v34  ;;  %v8323_v34 = vld [vmem:[%s11701_s9] ss:$0 sm:$0xff] }
 0xf1f   : > { %v5887_v14 = vsel %vm1660_vm2, %v5881_v18, 0 }
 0xf20   : > { %v5958_v20 = vand.u32 4294901760, %v5887_v14 }
 0xf22   : > { %v5959_v4 = vsub.f32 %v5887_v14, %v5958_v20  ;;  %8981 = vmatmul.mubr.f32.vlgmr.msra.gmra.mxu1 %v5958_v20  ;;  %v8324_v14 = vld [vmem:[%s11702_s7] ss:$0 sm:$0xff] }
 0xf23   : > { %8995 = vmatpush3.msra.mxu1 %v10791_v35  ;;  %9002 = vmatprep.mubr.msk.f32.mxu1 %vm9584_vm3, %v9583_v16 }
 0xf24   : > { %8996 = vmatprep.subr.mxu1 %v9583_v16  ;;  %v5960_v57 = vand.u32 4294901760, %v5959_v4 }
 0xf25   : > { %8997 = vmatpush3.msra.mxu1 %v10793_v36 }
 0xf26   : > { %8998 = vmatprep.subr.mxu1 %v9583_v16  ;;  %v5961_v43 = vsub.f32 %v5959_v4, %v5960_v57 }
 0xf27   : > { %8999 = vmatpush3.msra.mxu1 %v10816_v60 }
 0xf28   : > { %9000 = vmatprep.subr.mxu1 %v9583_v16  ;;  %v5962_v13 = vand.u32 4294901760, %v5961_v43 }
 0xf29   : > { %9001 = vmatpush3.msra.mxu1 %v10822_v3 }
 0xf2a   : > { %9003 = vmatmul.mubr.f32.vlgmr.msra.gmra.mxu1 %v5960_v57  ;;  %9016 = vmatprep.subr.mxu1 %v9583_v16 }
 0xf2b   : > { %8970 = vmatmul.mubr.f32.vlgmr.msra.gmra.mxu0 %v5962_v13  ;;  %9017 = vmatpush3.msra.mxu1 %v10791_v35 }
 0xf2c   : > { %8984 = vmatpush3.msra.mxu0 %v10796_v22  ;;  %9018 = vmatprep.subr.mxu1 %v9583_v16 }
 0xf2d   : > { %8985 = vmatprep.subr.mxu0 %v9583_v16  ;;  %9019 = vmatpush3.msra.mxu1 %v10793_v36 }
 0xf2e   : > { %8986 = vmatpush3.msra.mxu0 %v10799_v40  ;;  %9020 = vmatprep.subr.mxu1 %v9583_v16 }
 0xf2f   : > { %8987 = vmatprep.subr.mxu0 %v9583_v16  ;;  %9021 = vmatpush3.msra.mxu1 %v10816_v60 }
 0xf30   : > { %8988 = vmatpush3.msra.mxu0 %v10820_v19  ;;  %9022 = vmatprep.subr.mxu1 %v9583_v16 }
 0xf31   : > { %8989 = vmatprep.subr.mxu0 %v9583_v16  ;;  %8991 = vmatprep.mubr.msk.f32.mxu0 %vm9584_vm3, %v9583_v16 }
 0xf32   : > { %8990 = vmatpush3.msra.mxu0 %v10828_v37  ;;  %9023 = vmatpush3.msra.mxu1 %v10822_v3  ;;  %v6415_v3 = vld [vmem:[%s9826_s25 + $0x18] sm:$0xff] }
 0xf33   : > { %9024 = vmatprep.mubr.msk.f32.mxu1 %vm9584_vm3, %v9583_v16  ;;  %8992 = vmatmul.mubr.f32.vlgmr.msra.gmra.mxu0 %v5959_v4  ;;  %v10906_v37 = vand.u32 4294901760, %v6415_v3 }
 0xf34   : > { %9005 = vmatprep.subr.mxu0 %v9583_v16  ;;  %9025 = vmatmul.mubr.f32.vlgmr.msra.gmra.mxu1 %v5958_v20 }
 0xf35   : > { %9006 = vmatpush3.msra.mxu0 %v5995_v48  ;;  %9013 = vmatprep.mubr.msk.f32.mxu0 %vm9584_vm3, %v9583_v16  ;;  %v10916_v8 = vsub.f32 %v6415_v3, %v10906_v37 }
 0xf36   : > { %9007 = vmatprep.subr.mxu0 %v9583_v16  ;;  %9038 = vmatprep.subr.mxu1 %v9583_v16 }
 0xf37   : > { %9008 = vmatpush3.msra.mxu0 %v6002_v49  ;;  %9046 = vmatprep.mubr.msk.f32.mxu1 %vm9584_vm3, %v9583_v16  ;;  %v8322_v49 = vld [vmem:[%s11700_s4] ss:$0 sm:$0xff]  ;;  %v6532_v63 = vand.u32 4294901760, %v10916_v8 }
 0xf38   : > { %9009 = vmatprep.subr.mxu0 %v9583_v16 }
 0xf39   : > { %9010 = vmatpush3.msra.mxu0 %v6009_v52  ;;  %v6413_v52 = vld [vmem:[%s9826_s25 + $0x8] sm:$0xff]  ;;  %v6533_v41 = vsub.f32 %v10916_v8, %v6532_v63 }
 0xf3a   : > { %9011 = vmatprep.subr.mxu0 %v9583_v16  ;;  %v10910_v47 = vand.u32 4294901760, %v6413_v52 }
 0xf3b   : > { %9012 = vmatpush3.msra.mxu0 %v6016_v50  ;;  %v6412_v50 = vld [vmem:[%s9826_s25] sm:$0xff]  ;;  %v6534_v46 = vand.u32 4294901760, %v6533_v41 }
 0xf3c   : > { %9014 = vmatmul.mubr.f32.vlgmr.msra.gmra.mxu0 %v5958_v20  ;;  %9027 = vmatprep.subr.mxu0 %v9583_v16  ;;  %v10913_v62 = vand.u32 4294901760, %v6412_v50  ;;  %v10922_v51 = vsub.f32 %v6413_v52, %v10910_v47 }
 0xf3d   : > { %9035 = vmatprep.mubr.msk.f32.mxu0 %vm9584_vm3, %v9583_v16  ;;  %9028 = vmatpush3.msra.mxu0 %v10906_v37 }
 0xf3e   : > { %v10926_v53 = vsub.f32 %v6412_v50, %v10913_v62  ;;  %9029 = vmatprep.subr.mxu0 %v9583_v16  ;;  %v6546_v0 = vand.u32 4294901760, %v10922_v51  ;;  %9039 = vmatpush3.msra.mxu1 %v6534_v46 }
 0xf3f   : > { %9030 = vmatpush3.msra.mxu0 %v10908_v44  ;;  %9040 = vmatprep.subr.mxu1 %v9583_v16 }
 0xf40   : > { %v6553_v38 = vand.u32 4294901760, %v10926_v53  ;;  %9031 = vmatprep.subr.mxu0 %v9583_v16  ;;  %v6547_v39 = vsub.f32 %v10922_v51, %v6546_v0  ;;  %9041 = vmatpush3.msra.mxu1 %v6541_v61 }
 0xf41   : > { %9032 = vmatpush3.msra.mxu0 %v10910_v47  ;;  %9042 = vmatprep.subr.mxu1 %v9583_v16 }
 0xf42   : > { %9033 = vmatprep.subr.mxu0 %v9583_v16  ;;  %v6554_v27 = vsub.f32 %v10926_v53, %v6553_v38  ;;  %v6548_v31 = vand.u32 4294901760, %v6547_v39 }
 0xf43   : > { %9034 = vmatpush3.msra.mxu0 %v10913_v62 }
 0xf44   : > { %9049 = vmatprep.subr.mxu0 %v9583_v16  ;;  %v6555_v9 = vand.u32 4294901760, %v6554_v27  ;;  %9043 = vmatpush3.msra.mxu1 %v6548_v31  ;;  %v6925_v27 = vld [vmem:[%s9840_s0 + $0x30] sm:$0xff] }
 0xf45   : > { %9044 = vmatprep.subr.mxu1 %v9583_v16 }
 0xf46   : > { %9045 = vmatpush3.msra.mxu1 %v6555_v9 }
 0xf47   : > { %9060 = vmatprep.subr.mxu1 %v9583_v16 }
 0xfe2   : > { %v6055_v26 = vpop.f32.mrf.mxu1 }
 0xfe4   : > { %v8982_v5 = vpop.f32.mrf.mxu1 }
 0xfea   : > { %v6212_v6 = vpop.f32.mrf.mxu1 }
 0xfeb   : > { %v5964_v10 = vpop.f32.mrf.mxu0 }
 0xfec   : > { %v9004_v11 = vpop.f32.mrf.mxu1  ;;  %v6056_v24 = vadd.f32 %v6055_v26, %v5964_v10  ;;  %v6934_v10 = vld [vmem:[%s9840_s0 + $0x78] sm:$0xff] }
 0xfed   : > { %v8971_v12 = vpop.f32.mrf.mxu0  ;;  %v11015_v11 = vand.u32 4294901760, %v6934_v10 }
 0xfee   : > { %v6933_v12 = vld [vmem:[%s9840_s0 + $0x70] sm:$0xff] }
 0xff3   : > { %v6135_v17 = vpop.f32.mrf.mxu0 }
 0xff4   : > { %v6370_v21 = vpop.f32.mrf.mxu1  ;;  %v6136_v30 = vadd.f32 %v6135_v17, %v6056_v24  ;;  %v11019_v17 = vsub.f32 %v6934_v10, %v11015_v11  ;;  %v6932_v24 = vld [vmem:[%s9840_s0 + $0x68] sm:$0xff]  ;;  %v6922_v10 = vld [vmem:[%s9840_s0 + $0x18] sm:$0xff] }
 0xff5   : > { %v8993_v25 = vpop.f32.mrf.mxu0 }
 0xff6   : > { %v9026_v28 = vpop.f32.mrf.mxu1  ;;  %v6213_v35 = vadd.f32 %v6212_v6, %v6136_v30  ;;  %v7029_v25 = vand.u32 4294901760, %v11019_v17  ;;  %v11030_v30 = vand.u32 4294901760, %v6932_v24 }
 0xffc   : > { %v6295_v36 = vpop.f32.mrf.mxu0 }
 0xffd   : > { %v6296_v22 = vadd.f32 %v6295_v36, %v6213_v35  ;;  %v6931_v35 = vld [vmem:[%s9840_s0 + $0x60] sm:$0xff]  ;;  %v7030_v36 = vsub.f32 %v11019_v17, %v7029_v25 }
 0xffe   : > { %v9015_v40 = vpop.f32.mrf.mxu0 }
 0xfff   : > { %v6371_v48 = vadd.f32 %v6370_v21, %v6296_v22  ;;  %v11021_v21 = vand.u32 4294901760, %v6933_v12  ;;  %v11040_v40 = vsub.f32 %v6932_v24, %v11030_v30 }
0x1001   : > { %v6374_v55 = vadd.f32 %v9485_v54, %v6371_v48  ;;  %v11028_v28 = vsub.f32 %v6933_v12, %v11021_v21  ;;  %v11042_v48 = vand.u32 4294901760, %v6931_v35  ;;  %v7031_v54 = vand.u32 4294901760, %v7030_v36 }
0x1002   : > { %v11153_v36 = vand.u32 4294901760, %v6922_v10 }
0x1003   : > { %v10897_v58 = vadd.f32 %v8322_v49, %v6374_v55  ;;  %v7036_v22 = vand.u32 4294901760, %v11028_v28  ;;  %v6930_v49 = vld [vmem:[%s9840_s0 + $0x58] sm:$0xff] }
0x1005   : > { %v6385_v59 = vsel %vm1660_vm2, %v10897_v58, 0.0  ;;  %v7037_v55 = vsub.f32 %v11028_v28, %v7036_v22 }
0x1006   : > { %6386 = vadd.xlane.f32.xlu0 %v6385_v59  ;;  %v7043_v59 = vand.u32 4294901760, %v11040_v40 }
0x108f   : > { %v6387_v29 = vpop.xlane.xlu0 %6386 }
0x1090   : > { %v6388_v60 = vmul.f32 0.03125, %v6387_v29  ;;  %v11052_v29 = vsub.f32 %v6931_v35, %v11042_v48 }
0x1092   : > { %v6389_v2 = vsub.f32 %v10897_v58, %v6388_v60  ;;  %v11055_v60 = vand.u32 4294901760, %v6930_v49  ;;  %v7050_v3 = vand.u32 4294901760, %v11052_v29 }
0x1094   : > { %v6390_v7 = vmul.f32 %v6389_v2, %v6389_v2  ;;  %v11067_v52 = vsub.f32 %v6930_v49, %v11055_v60 }
0x1096   : > { %v6391_v19 = vsel %vm1660_vm2, %v6390_v7, 0.0  ;;  %v7038_v7 = vand.u32 4294901760, %v7037_v55 }
0x1097   : > { %6392 = vadd.xlane.f32.xlu1 %v6391_v19  ;;  %v7044_v19 = vsub.f32 %v11040_v40, %v7043_v59 }
0x1120   : > { %v6393_v56 = vpop.xlane.xlu1 %6392 }
0x1121   : > { %v6394_v33 = vmul.f32 0.03125, %v6393_v56 }
0x1123   : > { %v6395_v15 = vadd.f32 1e-05, %v6394_v33 }
0x1125   : > { %9479 = vrsqrt.f32 %v6395_v15  ;;  %v11118_v15 = vand.u32 4294901760, %v6925_v27 }
0x1132   : > { %v9480_v42 = vpop.eup %9479 }
0x1133   : > { %v6397_v18 = vmul.f32 %v9480_v42, %v6389_v2  ;;  %v6929_v2 = vld [vmem:[%s9840_s0 + $0x50] sm:$0xff]  ;;  %v6924_v42 = vld [vmem:[%s9840_s0 + $0x28] sm:$0xff] }
0x1134   : > { %v11063_v23 = vand.u32 4294901760, %v6929_v2 }
0x1135   : > { %v6404_v20 = vmul.f32 %v8323_v34, %v6397_v18 }
0x1136   : > { %v11075_v50 = vsub.f32 %v6929_v2, %v11063_v23 }
0x1137   : > { %v6411_v4 = vadd.f32 %v8324_v14, %v6404_v20  ;;  %v11127_v20 = vand.u32 4294901760, %v6924_v42 }
0x1139   : > { %v6424_v57 = vsel %vm1660_vm2, %v6411_v4, 0  ;;  %v11131_v4 = vsub.f32 %v6925_v27, %v11118_v15 }
0x113a   : > { %v6495_v43 = vand.u32 4294901760, %v6424_v57 }
0x113c   : > { %v6496_v13 = vsub.f32 %v6424_v57, %v6495_v43  ;;  %9047 = vmatmul.mubr.f32.vlgmr.msra.gmra.mxu1 %v6495_v43  ;;  %v6923_v57 = vld [vmem:[%s9840_s0 + $0x20] sm:$0xff] }
0x113d   : > { %9061 = vmatpush3.msra.mxu1 %v10906_v37  ;;  %9068 = vmatprep.mubr.msk.f32.mxu1 %vm9584_vm3, %v9583_v16 }
0x113e   : > { %9062 = vmatprep.subr.mxu1 %v9583_v16  ;;  %v6497_v26 = vand.u32 4294901760, %v6496_v13 }
0x113f   : > { %9063 = vmatpush3.msra.mxu1 %v10908_v44 }
0x1140   : > { %9064 = vmatprep.subr.mxu1 %v9583_v16  ;;  %v6498_v5 = vsub.f32 %v6496_v13, %v6497_v26 }
0x1141   : > { %9065 = vmatpush3.msra.mxu1 %v10910_v47 }
0x1142   : > { %9066 = vmatprep.subr.mxu1 %v9583_v16  ;;  %v6499_v6 = vand.u32 4294901760, %v6498_v5  ;;  %v11142_v5 = vand.u32 4294901760, %v6923_v57 }
0x1143   : > { %9067 = vmatpush3.msra.mxu1 %v10913_v62 }
0x1144   : > { %9069 = vmatmul.mubr.f32.vlgmr.msra.gmra.mxu1 %v6497_v26  ;;  %9082 = vmatprep.subr.mxu1 %v9583_v16  ;;  %v11140_v26 = vsub.f32 %v6924_v42, %v11127_v20  ;;  %v11151_v35 = vsub.f32 %v6923_v57, %v11142_v5 }
0x1145   : > { %9036 = vmatmul.mubr.f32.vlgmr.msra.gmra.mxu0 %v6499_v6  ;;  %9083 = vmatpush3.msra.mxu1 %v10906_v37  ;;  %v6928_v37 = vld [vmem:[%s9840_s0 + $0x48] sm:$0xff]  ;;  %v11624_v6 = vand.u32 4294901760, %v11131_v4 }
0x1146   : > { %9050 = vmatpush3.msra.mxu0 %v10916_v8  ;;  %9084 = vmatprep.subr.mxu1 %v9583_v16  ;;  %v7057_v8 = vand.u32 4294901760, %v11067_v52  ;;  %v11623_v24 = vand.u32 4294901760, %v11140_v26  ;;  %v11622_v2 = vand.u32 4294901760, %v11151_v35 }
0x1147   : > { %9051 = vmatprep.subr.mxu0 %v9583_v16  ;;  %9085 = vmatpush3.msra.mxu1 %v10908_v44  ;;  %v7045_v44 = vand.u32 4294901760, %v7044_v19  ;;  %v7093_v49 = vsub.f32 %v11131_v4, %v11624_v6 }
0x1148   : > { %9052 = vmatpush3.msra.mxu0 %v10919_v32  ;;  %9086 = vmatprep.subr.mxu1 %v9583_v16  ;;  %v6927_v32 = vld [vmem:[%s9840_s0 + $0x40] sm:$0xff]  ;;  %v7100_v55 = vsub.f32 %v11140_v26, %v11623_v24 }
0x1149   : > { %9053 = vmatprep.subr.mxu0 %v9583_v16  ;;  %9087 = vmatpush3.msra.mxu1 %v10910_v47  ;;  %v7051_v47 = vsub.f32 %v11052_v29, %v7050_v3 }
0x114a   : > { %9054 = vmatpush3.msra.mxu0 %v10922_v51  ;;  %9088 = vmatprep.subr.mxu1 %v9583_v16 }
0x114b   : > { %9055 = vmatprep.subr.mxu0 %v9583_v16  ;;  %9057 = vmatprep.mubr.msk.f32.mxu0 %vm9584_vm3, %v9583_v16  ;;  %v7052_v51 = vand.u32 4294901760, %v7051_v47  ;;  %v7101_v47 = vand.u32 4294901760, %v7100_v55 }
0x114c   : > { %9056 = vmatpush3.msra.mxu0 %v10926_v53  ;;  %9089 = vmatpush3.msra.mxu1 %v10913_v62  ;;  %v11077_v62 = vand.u32 4294901760, %v6928_v37  ;;  %v7064_v53 = vand.u32 4294901760, %v11075_v50 }
0x114d   : > { %9090 = vmatprep.mubr.msk.f32.mxu1 %vm9584_vm3, %v9583_v16  ;;  %9058 = vmatmul.mubr.f32.vlgmr.msra.gmra.mxu0 %v6496_v13 }
0x114e   : > { %9071 = vmatprep.subr.mxu0 %v9583_v16  ;;  %9091 = vmatmul.mubr.f32.vlgmr.msra.gmra.mxu1 %v6495_v43  ;;  %v7065_v41 = vsub.f32 %v11075_v50, %v7064_v53 }
0x114f   : > { %9072 = vmatpush3.msra.mxu0 %v6532_v63  ;;  %9079 = vmatprep.mubr.msk.f32.mxu0 %vm9584_vm3, %v9583_v16  ;;  %v11086_v63 = vsub.f32 %v6928_v37, %v11077_v62  ;;  %v7094_v37 = vand.u32 4294901760, %v7093_v49 }
0x1150   : > { %9073 = vmatprep.subr.mxu0 %v9583_v16  ;;  %9128 = vmatprep.subr.mxu1 %v9583_v16  ;;  %v7066_v31 = vand.u32 4294901760, %v7065_v41  ;;  %v6919_v41 = vld [vmem:[%s9840_s0] sm:$0xff] }
0x1151   : > { %9074 = vmatpush3.msra.mxu0 %v6539_v1  ;;  %9160 = vmatprep.mubr.msk.f32.mxu1 %vm9584_vm3, %v9583_v16  ;;  %v11088_v1 = vand.u32 4294901760, %v6927_v32  ;;  %v7071_v45 = vand.u32 4294901760, %v11086_v63 }
0x1152   : > { %9075 = vmatprep.subr.mxu0 %v9583_v16  ;;  %9129 = vmatpush3.msra.mxu1 %v7031_v54  ;;  %v6921_v54 = vld [vmem:[%s9840_s0 + $0x10] sm:$0xff] }
0x1153   : > { %9076 = vmatpush3.msra.mxu0 %v6546_v0  ;;  %9130 = vmatprep.subr.mxu1 %v9583_v16  ;;  %v7058_v0 = vsub.f32 %v11067_v52, %v7057_v8  ;;  %v11102_v39 = vsub.f32 %v6927_v32, %v11088_v1  ;;  %v7072_v9 = vsub.f32 %v11086_v63, %v7071_v45  ;;  %v11169_v19 = vand.u32 4294901760, %v6921_v54 }
0x1154   : > { %9077 = vmatprep.subr.mxu0 %v9583_v16  ;;  %9131 = vmatpush3.msra.mxu1 %v7038_v7  ;;  %v11167_v7 = vsub.f32 %v6922_v10, %v11153_v36  ;;  %v7107_v32 = vsub.f32 %v11151_v35, %v11622_v2 }
0x1155   : > { %9078 = vmatpush3.msra.mxu0 %v6553_v38  ;;  %9132 = vmatprep.subr.mxu1 %v9583_v16  ;;  %v6926_v38 = vld [vmem:[%s9840_s0 + $0x38] sm:$0xff]  ;;  %v7059_v61 = vand.u32 4294901760, %v7058_v0  ;;  %v7078_v56 = vand.u32 4294901760, %v11102_v39  ;;  %v7073_v34 = vand.u32 4294901760, %v7072_v9  ;;  %v11180_v0 = vsub.f32 %v6921_v54, %v11169_v19 }
0x1156   : > { %9080 = vmatmul.mubr.f32.vlgmr.msra.gmra.mxu0 %v6495_v43  ;;  %9093 = vmatprep.subr.mxu0 %v9583_v16  ;;  %v11104_v46 = vand.u32 4294901760, %v6926_v38  ;;  %v11192_v9 = vand.u32 4294901760, %v6919_v41 }
0x1157   : > { %9125 = vmatprep.mubr.msk.f32.mxu0 %vm9584_vm3, %v9583_v16  ;;  %9094 = vmatpush3.msra.mxu0 %v11015_v11  ;;  %v7079_v18 = vsub.f32 %v11102_v39, %v7078_v56 }
0x1158   : > { %9095 = vmatprep.subr.mxu0 %v9583_v16  ;;  %9133 = vmatpush3.msra.mxu1 %v7045_v44  ;;  %v11115_v33 = vsub.f32 %v6926_v38, %v11104_v46  ;;  %v6920_v44 = vld [vmem:[%s9840_s0 + $0x8] sm:$0xff]  ;;  %v11204_v57 = vsub.f32 %v6919_v41, %v11192_v9 }
0x1159   : > { %9096 = vmatpush3.msra.mxu0 %v11021_v21  ;;  %9134 = vmatprep.subr.mxu1 %v9583_v16  ;;  %v7080_v43 = vand.u32 4294901760, %v7079_v18  ;;  %v11183_v38 = vand.u32 4294901760, %v6920_v44 }
0x115a   : > { %9097 = vmatprep.subr.mxu0 %v9583_v16  ;;  %9135 = vmatpush3.msra.mxu1 %v7052_v51  ;;  %v11625_v14 = vand.u32 4294901760, %v11115_v33  ;;  %v11621_v51 = vand.u32 4294901760, %v11167_v7  ;;  %v11618_v10 = vand.u32 4294901760, %v11204_v57 }
0x115b   : > { %9098 = vmatpush3.msra.mxu0 %v11030_v30  ;;  %9136 = vmatprep.subr.mxu1 %v9583_v16  ;;  %v11196_v42 = vsub.f32 %v6920_v44, %v11183_v38 }
0x115c   : > { %9099 = vmatprep.subr.mxu0 %v9583_v16  ;;  %9137 = vmatpush3.msra.mxu1 %v7059_v61  ;;  %v7086_v13 = vsub.f32 %v11115_v33, %v11625_v14  ;;  %v7108_v61 = vand.u32 4294901760, %v7107_v32  ;;  %v7114_v27 = vsub.f32 %v11167_v7, %v11621_v51  ;;  %v7135_v49 = vsub.f32 %v11204_v57, %v11618_v10 }
0x115d   : > { %9100 = vmatpush3.msra.mxu0 %v11042_v48  ;;  %9138 = vmatprep.subr.mxu1 %v9583_v16 }
0x115e   : > { %9101 = vmatprep.subr.mxu0 %v9583_v16  ;;  %9139 = vmatpush3.msra.mxu1 %v7066_v31  ;;  %v7087_v12 = vand.u32 4294901760, %v7086_v13  ;;  %v11620_v31 = vand.u32 4294901760, %v11180_v0  ;;  %v7136_v55 = vand.u32 4294901760, %v7135_v49 }
0x115f   : > { %9102 = vmatpush3.msra.mxu0 %v11055_v60  ;;  %9140 = vmatprep.subr.mxu1 %v9583_v16 }
0x1160   : > { %9103 = vmatprep.subr.mxu0 %v9583_v16  ;;  %9141 = vmatpush3.msra.mxu1 %v7073_v34  ;;  %v7115_v34 = vand.u32 4294901760, %v7114_v27  ;;  %v7121_v18 = vsub.f32 %v11180_v0, %v11620_v31  ;;  %v8325_v27 = vld [vmem:[%s11703_s26] ss:$0 sm:$0xff] }
0x1161   : > { %9104 = vmatpush3.msra.mxu0 %v11063_v23  ;;  %9142 = vmatprep.subr.mxu1 %v9583_v16 }
0x1162   : > { %9105 = vmatprep.subr.mxu0 %v9583_v16  ;;  %9143 = vmatpush3.msra.mxu1 %v7080_v43  ;;  %v11619_v43 = vand.u32 4294901760, %v11196_v42  ;;  %v7122_v13 = vand.u32 4294901760, %v7121_v18 }
0x1163   : > { %9106 = vmatpush3.msra.mxu0 %v11077_v62  ;;  %9144 = vmatprep.subr.mxu1 %v9583_v16 }
0x1164   : > { %9107 = vmatprep.subr.mxu0 %v9583_v16  ;;  %9145 = vmatpush3.msra.mxu1 %v7087_v12  ;;  %v7128_v12 = vsub.f32 %v11196_v42, %v11619_v43 }
0x1165   : > { %9108 = vmatpush3.msra.mxu0 %v11088_v1  ;;  %9146 = vmatprep.subr.mxu1 %v9583_v16 }
0x1166   : > { %9109 = vmatprep.subr.mxu0 %v9583_v16  ;;  %9147 = vmatpush3.msra.mxu1 %v7094_v37  ;;  %v7129_v54 = vand.u32 4294901760, %v7128_v12 }
0x1167   : > { %9110 = vmatpush3.msra.mxu0 %v11104_v46  ;;  %9148 = vmatprep.subr.mxu1 %v9583_v16 }
0x1168   : > { %9111 = vmatprep.subr.mxu0 %v9583_v16  ;;  %9149 = vmatpush3.msra.mxu1 %v7101_v47 }
0x1169   : > { %9112 = vmatpush3.msra.mxu0 %v11118_v15  ;;  %9150 = vmatprep.subr.mxu1 %v9583_v16 }
0x116a   : > { %9113 = vmatprep.subr.mxu0 %v9583_v16  ;;  %9151 = vmatpush3.msra.mxu1 %v7108_v61 }
0x116b   : > { %9114 = vmatpush3.msra.mxu0 %v11127_v20  ;;  %9152 = vmatprep.subr.mxu1 %v9583_v16 }
0x116c   : > { %9115 = vmatprep.subr.mxu0 %v9583_v16  ;;  %9153 = vmatpush3.msra.mxu1 %v7115_v34 }
0x116d   : > { %9116 = vmatpush3.msra.mxu0 %v11142_v5  ;;  %9154 = vmatprep.subr.mxu1 %v9583_v16 }
0x116e   : > { %9117 = vmatprep.subr.mxu0 %v9583_v16  ;;  %9155 = vmatpush3.msra.mxu1 %v7122_v13 }
0x116f   : > { %9118 = vmatpush3.msra.mxu0 %v11153_v36  ;;  %9156 = vmatprep.subr.mxu1 %v9583_v16 }
0x1170   : > { %9119 = vmatprep.subr.mxu0 %v9583_v16  ;;  %9157 = vmatpush3.msra.mxu1 %v7129_v54 }
0x1171   : > { %9120 = vmatpush3.msra.mxu0 %v11169_v19  ;;  %9158 = vmatprep.subr.mxu1 %v9583_v16 }
0x1172   : > { %9121 = vmatprep.subr.mxu0 %v9583_v16  ;;  %9159 = vmatpush3.msra.mxu1 %v7136_v55 }
0x1173   : > { %9122 = vmatpush3.msra.mxu0 %v11183_v38  ;;  %9198 = vmatprep.subr.mxu1 %v9583_v16 }
0x1174   : > { %9123 = vmatprep.subr.mxu0 %v9583_v16 }
0x1175   : > { %9124 = vmatpush3.msra.mxu0 %v11192_v9 }
0x1176   : > { %9163 = vmatprep.subr.mxu0 %v9583_v16 }
0x11fc   : > { %v6592_v37 = vpop.f32.mrf.mxu1 }
0x11fe   : > { %v9048_v44 = vpop.f32.mrf.mxu1 }
0x1204   : > { %v6749_v47 = vpop.f32.mrf.mxu1 }
0x1205   : > { %v6501_v32 = vpop.f32.mrf.mxu0 }
0x1206   : > { %v9070_v41 = vpop.f32.mrf.mxu1  ;;  %v6502_v34 = vadd.f32 %v8325_v27, %v6501_v32 }
0x1207   : > { %v9037_v61 = vpop.f32.mrf.mxu0 }
0x1208   : > { %v6593_v12 = vadd.f32 %v6592_v37, %v6502_v34 }
0x120d   : > { %v6672_v18 = vpop.f32.mrf.mxu0 }
0x120e   : > { %v6907_v13 = vpop.f32.mrf.mxu1  ;;  %v6673_v55 = vadd.f32 %v6672_v18, %v6593_v12 }
0x120f   : > { %v9059_v49 = vpop.f32.mrf.mxu0 }
0x1210   : > { %v9092_v54 = vpop.f32.mrf.mxu1  ;;  %v6750_v10 = vadd.f32 %v6749_v47, %v6673_v55 }
0x1216   : > { %v6832_v43 = vpop.f32.mrf.mxu0 }
0x1217   : > { %v6833_v31 = vadd.f32 %v6832_v43, %v6750_v10 }
0x1218   : > { %v9081_v44 = vpop.f32.mrf.mxu0 }
0x1219   : > { %v6908_v51 = vadd.f32 %v6907_v13, %v6833_v31 }
0x121b   : > { %v8326_v2 = vmul.f32 -1.702, %v6908_v51 }
0x121d   : > { %v6913_v41 = vmul.f32 1.442695, %v8326_v2 }
0x121f   : > { %9481 = vpow2.f32 %v6913_v41 }
0x122c   : > { %v9482_v61 = vpop.eup %9481 }
0x122d   : > { %v6915_v24 = vadd.f32 1.0, %v9482_v61 }
0x122f   : > { %9483 = vrcp.f32 %v6915_v24 }
0x123c   : > { %v9484_v6 = vpop.eup %9483 }
0x123d   : > { %v6918_v14 = vmul.f32 %v9484_v6, %v6908_v51 }
0x123f   : > { %v11227_v32 = vand.u32 4294901760, %v6918_v14 }
0x1241   : > { %v11230_v37 = vsub.f32 %v6918_v14, %v11227_v32  ;;  %9161 = vmatmul.mubr.f32.vlgmr.msra.gmra.mxu1 %v11227_v32 }
0x1242   : > { %9199 = vmatpush3.msra.mxu1 %v11015_v11  ;;  %9230 = vmatprep.mubr.msk.f32.mxu1 %vm9584_vm3, %v9583_v16 }
0x1243   : > { %9200 = vmatprep.subr.mxu1 %v9583_v16  ;;  %v7018_v2 = vand.u32 4294901760, %v11230_v37 }
0x1244   : > { %9201 = vmatpush3.msra.mxu1 %v11021_v21 }
0x1245   : > { %9202 = vmatprep.subr.mxu1 %v9583_v16  ;;  %v7019_v6 = vsub.f32 %v11230_v37, %v7018_v2 }
0x1246   : > { %9203 = vmatpush3.msra.mxu1 %v11030_v30 }
0x1247   : > { %9204 = vmatprep.subr.mxu1 %v9583_v16  ;;  %v7020_v14 = vand.u32 4294901760, %v7019_v6 }
0x1248   : > { %9205 = vmatpush3.msra.mxu1 %v11042_v48 }
0x1249   : > { %9206 = vmatprep.subr.mxu1 %v9583_v16  ;;  %9126 = vmatmul.mubr.f32.vlgmr.msra.gmra.mxu0 %v7020_v14 }
0x124a   : > { %9164 = vmatpush3.msra.mxu0 %v11019_v17  ;;  %9207 = vmatpush3.msra.mxu1 %v11055_v60  ;;  %v11705_v17 = vand.u32 4294901760, %v11131_v4 }
0x124b   : > { %9165 = vmatprep.subr.mxu0 %v9583_v16  ;;  %9208 = vmatprep.subr.mxu1 %v9583_v16 }
0x124c   : > { %9166 = vmatpush3.msra.mxu0 %v11028_v28  ;;  %9209 = vmatpush3.msra.mxu1 %v11063_v23  ;;  %v11708_v28 = vand.u32 4294901760, %v11167_v7 }
0x124d   : > { %9167 = vmatprep.subr.mxu0 %v9583_v16  ;;  %9210 = vmatprep.subr.mxu1 %v9583_v16 }
0x124e   : > { %9168 = vmatpush3.msra.mxu0 %v11040_v40  ;;  %9211 = vmatpush3.msra.mxu1 %v11077_v62  ;;  %v11711_v40 = vand.u32 4294901760, %v11204_v57 }
0x124f   : > { %9169 = vmatprep.subr.mxu0 %v9583_v16  ;;  %9212 = vmatprep.subr.mxu1 %v9583_v16 }
0x1250   : > { %9170 = vmatpush3.msra.mxu0 %v11052_v29  ;;  %9213 = vmatpush3.msra.mxu1 %v11088_v1 }
0x1251   : > { %9171 = vmatprep.subr.mxu0 %v9583_v16  ;;  %9214 = vmatprep.subr.mxu1 %v9583_v16 }
0x1252   : > { %9172 = vmatpush3.msra.mxu0 %v11067_v52  ;;  %9215 = vmatpush3.msra.mxu1 %v11104_v46 }
0x1253   : > { %9173 = vmatprep.subr.mxu0 %v9583_v16  ;;  %9216 = vmatprep.subr.mxu1 %v9583_v16 }
0x1254   : > { %9174 = vmatpush3.msra.mxu0 %v11075_v50  ;;  %9217 = vmatpush3.msra.mxu1 %v11118_v15 }
0x1255   : > { %9175 = vmatprep.subr.mxu0 %v9583_v16  ;;  %9218 = vmatprep.subr.mxu1 %v9583_v16 }
0x1256   : > { %9176 = vmatpush3.msra.mxu0 %v11086_v63  ;;  %9219 = vmatpush3.msra.mxu1 %v11127_v20 }
0x1257   : > { %9177 = vmatprep.subr.mxu0 %v9583_v16  ;;  %9220 = vmatprep.subr.mxu1 %v9583_v16 }
0x1258   : > { %9178 = vmatpush3.msra.mxu0 %v11102_v39  ;;  %9221 = vmatpush3.msra.mxu1 %v11142_v5 }
0x1259   : > { %9179 = vmatprep.subr.mxu0 %v9583_v16  ;;  %9222 = vmatprep.subr.mxu1 %v9583_v16 }
0x125a   : > { %9180 = vmatpush3.msra.mxu0 %v11115_v33  ;;  %9223 = vmatpush3.msra.mxu1 %v11153_v36 }
0x125b   : > { %9181 = vmatprep.subr.mxu0 %v9583_v16  ;;  %9224 = vmatprep.subr.mxu1 %v9583_v16 }
0x125c   : > { %9182 = vmatpush3.msra.mxu0 %v11131_v4  ;;  %9225 = vmatpush3.msra.mxu1 %v11169_v19 }
0x125d   : > { %9183 = vmatprep.subr.mxu0 %v9583_v16  ;;  %9226 = vmatprep.subr.mxu1 %v9583_v16 }
0x125e   : > { %9184 = vmatpush3.msra.mxu0 %v11140_v26  ;;  %9227 = vmatpush3.msra.mxu1 %v11183_v38 }
0x125f   : > { %9185 = vmatprep.subr.mxu0 %v9583_v16  ;;  %9228 = vmatprep.subr.mxu1 %v9583_v16 }
0x1260   : > { %9186 = vmatpush3.msra.mxu0 %v11151_v35  ;;  %9229 = vmatpush3.msra.mxu1 %v11192_v9 }
0x1261   : > { %9187 = vmatprep.subr.mxu0 %v9583_v16  ;;  %9231 = vmatmul.mubr.f32.vlgmr.msra.gmra.mxu1 %v7018_v2 }
0x1262   : > { %9268 = vmatprep.subr.mxu1 %v9583_v16  ;;  %9188 = vmatpush3.msra.mxu0 %v11167_v7 }
0x1263   : > { %9269 = vmatpush3.msra.mxu1 %v11015_v11  ;;  %9189 = vmatprep.subr.mxu0 %v9583_v16  ;;  %v11704_v11 = vand.u32 4294901760, %v11115_v33 }
0x1264   : > { %9270 = vmatprep.subr.mxu1 %v9583_v16  ;;  %9190 = vmatpush3.msra.mxu0 %v11180_v0 }
0x1265   : > { %9271 = vmatpush3.msra.mxu1 %v11021_v21  ;;  %9191 = vmatprep.subr.mxu0 %v9583_v16  ;;  %v11706_v21 = vand.u32 4294901760, %v11140_v26 }
0x1266   : > { %9272 = vmatprep.subr.mxu1 %v9583_v16  ;;  %9192 = vmatpush3.msra.mxu0 %v11196_v42 }
0x1267   : > { %9273 = vmatpush3.msra.mxu1 %v11030_v30  ;;  %9193 = vmatprep.subr.mxu0 %v9583_v16  ;;  %v11709_v30 = vand.u32 4294901760, %v11180_v0 }
0x1268   : > { %9274 = vmatprep.subr.mxu1 %v9583_v16  ;;  %9194 = vmatpush3.msra.mxu0 %v11204_v57 }
0x1269   : > { %9195 = vmatprep.mubr.msk.f32.mxu0 %vm9584_vm3, %v9583_v16  ;;  %9275 = vmatpush3.msra.mxu1 %v11042_v48 }
0x126a   : > { %9196 = vmatmul.mubr.f32.vlgmr.msra.gmra.mxu0 %v11230_v37  ;;  %9233 = vmatprep.subr.mxu0 %v9583_v16 }
0x126b   : > { %9276 = vmatprep.subr.mxu1 %v9583_v16  ;;  %9234 = vmatpush3.msra.mxu0 %v7029_v25  ;;  %v11707_v25 = vand.u32 4294901760, %v11151_v35 }
0x126c   : > { %9277 = vmatpush3.msra.mxu1 %v11055_v60  ;;  %9235 = vmatprep.subr.mxu0 %v9583_v16 }
0x126d   : > { %9278 = vmatprep.subr.mxu1 %v9583_v16  ;;  %9236 = vmatpush3.msra.mxu0 %v7036_v22  ;;  %v11710_v22 = vand.u32 4294901760, %v11196_v42 }
0x126e   : > { %9279 = vmatpush3.msra.mxu1 %v11063_v23  ;;  %9237 = vmatprep.subr.mxu0 %v9583_v16 }
0x126f   : > { %9280 = vmatprep.subr.mxu1 %v9583_v16  ;;  %9238 = vmatpush3.msra.mxu0 %v7043_v59 }
0x1270   : > { %9281 = vmatpush3.msra.mxu1 %v11077_v62  ;;  %9239 = vmatprep.subr.mxu0 %v9583_v16 }
0x1271   : > { %9282 = vmatprep.subr.mxu1 %v9583_v16  ;;  %9240 = vmatpush3.msra.mxu0 %v7050_v3 }
0x1272   : > { %9283 = vmatpush3.msra.mxu1 %v11088_v1  ;;  %9241 = vmatprep.subr.mxu0 %v9583_v16 }
0x1273   : > { %9284 = vmatprep.subr.mxu1 %v9583_v16  ;;  %9242 = vmatpush3.msra.mxu0 %v7057_v8 }
0x1274   : > { %9285 = vmatpush3.msra.mxu1 %v11104_v46  ;;  %9243 = vmatprep.subr.mxu0 %v9583_v16 }
0x1275   : > { %9286 = vmatprep.subr.mxu1 %v9583_v16  ;;  %9244 = vmatpush3.msra.mxu0 %v7064_v53 }
0x1276   : > { %9287 = vmatpush3.msra.mxu1 %v11118_v15  ;;  %9245 = vmatprep.subr.mxu0 %v9583_v16 }
0x1277   : > { %9288 = vmatprep.subr.mxu1 %v9583_v16  ;;  %9246 = vmatpush3.msra.mxu0 %v7071_v45 }
0x1278   : > { %9289 = vmatpush3.msra.mxu1 %v11127_v20  ;;  %9247 = vmatprep.subr.mxu0 %v9583_v16 }
0x1279   : > { %9290 = vmatprep.subr.mxu1 %v9583_v16  ;;  %9248 = vmatpush3.msra.mxu0 %v7078_v56  ;;  %v8327_v56 = vld [vmem:[%s830_s20] ss:$0 sm:$0xff]  ;;  %s11713_s20 = sld [smem:[#allocation30_spill]] (!%p8328_p1) }
0x127a   : > { %9291 = vmatpush3.msra.mxu1 %v11142_v5  ;;  %9249 = vmatprep.subr.mxu0 %v9583_v16 }
0x127b   : > { %9292 = vmatprep.subr.mxu1 %v9583_v16  ;;  %9250 = vmatpush3.msra.mxu0 %v11704_v11 }
0x127c   : > { %9293 = vmatpush3.msra.mxu1 %v11153_v36  ;;  %9251 = vmatprep.subr.mxu0 %v9583_v16 }
0x127d   : > { %9294 = vmatprep.subr.mxu1 %v9583_v16  ;;  %9252 = vmatpush3.msra.mxu0 %v11705_v17 }
0x127e   : > { %9295 = vmatpush3.msra.mxu1 %v11169_v19  ;;  %9253 = vmatprep.subr.mxu0 %v9583_v16 }
0x127f   : > { %9296 = vmatprep.subr.mxu1 %v9583_v16  ;;  %9254 = vmatpush3.msra.mxu0 %v11706_v21 }
0x1280   : > { %9297 = vmatpush3.msra.mxu1 %v11183_v38  ;;  %9255 = vmatprep.subr.mxu0 %v9583_v16 }
0x1281   : > { %9298 = vmatprep.subr.mxu1 %v9583_v16  ;;  %9256 = vmatpush3.msra.mxu0 %v11707_v25 }
0x1282   : > { %9299 = vmatpush3.msra.mxu1 %v11192_v9  ;;  %9300 = vmatprep.mubr.msk.f32.mxu1 %vm9584_vm3, %v9583_v16 }
0x1283   : > { %9257 = vmatprep.subr.mxu0 %v9583_v16  ;;  %9301 = vmatmul.mubr.f32.vlgmr.msra.gmra.mxu1 %v11227_v32 }
0x1284   : > { %9258 = vmatpush3.msra.mxu0 %v11708_v28  ;;  %9265 = vmatprep.mubr.msk.f32.mxu0 %vm9584_vm3, %v9583_v16 }
0x1285   : > { %9259 = vmatprep.subr.mxu0 %v9583_v16 }
0x1286   : > { %9260 = vmatpush3.msra.mxu0 %v11709_v30 }
0x1287   : > { %9261 = vmatprep.subr.mxu0 %v9583_v16 }
0x1288   : > { %9262 = vmatpush3.msra.mxu0 %v11710_v22 }
0x1289   : > { %9263 = vmatprep.subr.mxu0 %v9583_v16 }
0x128a   : > { %9264 = vmatpush3.msra.mxu0 %v11711_v40 }
0x128b   : > { %9266 = vmatmul.mubr.f32.vlgmr.msra.gmra.mxu0 %v11227_v32 }
0x1301   : > { %v7173_v48 = vpop.f32.mrf.mxu1 }
0x1303   : > { %v9162_v59 = vpop.f32.mrf.mxu1 }
0x1309   : > { %v7022_v29 = vpop.f32.mrf.mxu0 }
0x130a   : > { %v7174_v8 = vadd.f32 %v7173_v48, %v7022_v29 }
0x130b   : > { %v9127_v60 = vpop.f32.mrf.mxu0 }
0x1321   : > { %v7366_v3 = vpop.f32.mrf.mxu1 }
0x1323   : > { %v9232_v23 = vpop.f32.mrf.mxu1 }
0x132a   : > { %v7277_v52 = vpop.f32.mrf.mxu0 }
0x132b   : > { %v7278_v63 = vadd.f32 %v7277_v52, %v7174_v8 }
0x132c   : > { %v9197_v50 = vpop.f32.mrf.mxu0 }
0x132d   : > { %v7367_v1 = vadd.f32 %v7366_v3, %v7278_v63 }
0x1343   : > { %v7572_v62 = vpop.f32.mrf.mxu1 }
0x1345   : > { %v9302_v53 = vpop.f32.mrf.mxu1 }
0x134b   : > { %v7485_v16 = vpop.f32.mrf.mxu0 }
0x134c   : > { %v7486_v45 = vadd.f32 %v7485_v16, %v7367_v1 }
0x134d   : > { %v9267_v39 = vpop.f32.mrf.mxu0 }
0x134e   : > { %v7573_v46 = vadd.f32 %v7572_v62, %v7486_v45 }
0x1350   : > { %v7576_v33 = vadd.f32 %v7573_v46, %v10897_v58  ;;  %7589 = sbr.rel (%p8328_p1) target bundleno = 5485 (0x156d), region = 108 }
0x1352   : > { %v7584_v15 = vadd.f32 %v8327_v56, %v7576_v33 }
0x1354   : > { %7585 = vst.msk [vmem:[#allocation2] sm:$0xff] %vm1660_vm2, %v7584_v15 }
0x1355   : > { %vm7592_vm8 = vcmask 253952   ;;  %v7611_v36 = vld [vmem:[%s11713_s20 + $0x18] sm:$0xff]  ;;  %v7610_v58 = vld [vmem:[%s11713_s20 + $0x10] sm:$0xff]  ;;  %v7609_v7 = vld [vmem:[%s11713_s20 + $0x8] sm:$0xff]  ;;  %v9599_v19 = vmov 0.0   ;;  %vm9600_vm9 = vmmov 0  }
0x1356   : > { %v7593_v20 = vsel %vm7592_vm8, %v7584_v15, 0.0  ;;  %9314 = vmatprep.subr.mxu1 %v9599_v19  ;;  %v11406_v51 = vand.u32 4294901760, %v7611_v36  ;;  %v11408_v0 = vand.u32 4294901760, %v7610_v58  ;;  %v11410_v38 = vand.u32 4294901760, %v7609_v7  ;;  %v7608_v31 = vld [vmem:[%s11713_s20] sm:$0xff]  ;;  %9303 = vmatprep.subr.mxu0 %v9599_v19 }
0x1357   : > { %7594 = vadd.xlane.f32.xlu0 %v7593_v20  ;;  %v11416_v9 = vand.u32 4294901760, %v7608_v31  ;;  %9322 = vmatprep.mubr.msk.f32.mxu1 %vm9600_vm9, %v9599_v19  ;;  %v7590_v14 = vld [vmem:[%s11714_s30] sm:$0x1]  ;;  %vm8100_vm10 = vcmask 122880  }
0x1358   : > { %9311 = vmatprep.mubr.msk.f32.mxu0 %vm9600_vm9, %v9599_v19  ;;  %v11423_v42 = vsub.f32 %v7611_v36, %v11406_v51  ;;  %v11426_v57 = vsub.f32 %v7610_v58, %v11408_v0  ;;  %v11429_v43 = vsub.f32 %v7609_v7, %v11410_v38  ;;  %9304 = vmatpush3.msra.mxu0 %v11406_v51  ;;  %v7591_v17 = vld [vmem:[%s11715_s29] sm:$0x1] }
0x1359   : > { %v11433_v10 = vsub.f32 %v7608_v31, %v11416_v9  ;;  %9305 = vmatprep.subr.mxu0 %v9599_v19 }
0x135a   : > { %v7721_v47 = vand.u32 4294901760, %v11423_v42  ;;  %v7728_v27 = vand.u32 4294901760, %v11426_v57  ;;  %v7735_v34 = vand.u32 4294901760, %v11429_v43  ;;  %9306 = vmatpush3.msra.mxu0 %v11408_v0 }
0x135b   : > { %v7742_v18 = vand.u32 4294901760, %v11433_v10  ;;  %9307 = vmatprep.subr.mxu0 %v9599_v19 }
0x135c   : > { %v7722_v13 = vsub.f32 %v11423_v42, %v7721_v47  ;;  %v7729_v12 = vsub.f32 %v11426_v57, %v7728_v27  ;;  %v7736_v49 = vsub.f32 %v11429_v43, %v7735_v34  ;;  %9308 = vmatpush3.msra.mxu0 %v11410_v38 }
0x135d   : > { %9309 = vmatprep.subr.mxu0 %v9599_v19  ;;  %v7743_v44 = vsub.f32 %v11433_v10, %v7742_v18 }
0x135e   : > { %v7723_v54 = vand.u32 4294901760, %v7722_v13  ;;  %v7730_v55 = vand.u32 4294901760, %v7729_v12  ;;  %9310 = vmatpush3.msra.mxu0 %v11416_v9  ;;  %v7737_v41 = vand.u32 4294901760, %v7736_v49 }
0x135f   : > { %9325 = vmatprep.subr.mxu0 %v9599_v19  ;;  %v7744_v61 = vand.u32 4294901760, %v7743_v44 }
0x1360   : > { %9315 = vmatpush3.msra.mxu1 %v7723_v54 }
0x1361   : > { %9316 = vmatprep.subr.mxu1 %v9599_v19 }
0x1362   : > { %9317 = vmatpush3.msra.mxu1 %v7730_v55 }
0x1363   : > { %9318 = vmatprep.subr.mxu1 %v9599_v19 }
0x1364   : > { %9319 = vmatpush3.msra.mxu1 %v7737_v41 }
0x1365   : > { %9320 = vmatprep.subr.mxu1 %v9599_v19 }
0x1366   : > { %9321 = vmatpush3.msra.mxu1 %v7744_v61 }
0x1367   : > { %9336 = vmatprep.subr.mxu1 %v9599_v19 }
0x13e0   : > { %v7595_v4 = vpop.xlane.xlu0 %7594 }
0x13e1   : > { %v7596_v26 = vmul.f32 0.03125, %v7595_v4 }
0x13e3   : > { %v7597_v5 = vsub.f32 %v7584_v15, %v7596_v26 }
0x13e5   : > { %v7598_v24 = vmul.f32 %v7597_v5, %v7597_v5 }
0x13e7   : > { %v7599_v35 = vsel %vm7592_vm8, %v7598_v24, 0.0 }
0x13e8   : > { %7600 = vadd.xlane.f32.xlu0 %v7599_v35 }
0x1471   : > { %v7601_v32 = vpop.xlane.xlu0 %7600 }
0x1472   : > { %v7602_v37 = vmul.f32 0.03125, %v7601_v32 }
0x1474   : > { %v7603_v2 = vadd.f32 1e-05, %v7602_v37 }
0x1476   : > { %9486 = vrsqrt.f32 %v7603_v2 }
0x1483   : > { %v9487_v6 = vpop.eup %9486 }
0x1484   : > { %v7605_v11 = vmul.f32 %v9487_v6, %v7597_v5 }
0x1486   : > { %v7606_v21 = vmul.f32 %v7605_v11, %v7590_v14 }
0x1488   : > { %v7607_v25 = vadd.f32 %v7606_v21, %v7591_v17 }
0x148a   : > { %v7613_v28 = vsel %vm1660_vm2, %v7607_v25, 0 }
0x148b   : > { %v7684_v30 = vand.u32 4294901760, %v7613_v28 }
0x148d   : > { %v7685_v22 = vsub.f32 %v7613_v28, %v7684_v30  ;;  %9323 = vmatmul.mubr.f32.vlgmr.msra.gmra.mxu1 %v7684_v30 }
0x148e   : > { %9337 = vmatpush3.msra.mxu1 %v11406_v51  ;;  %9344 = vmatprep.mubr.msk.f32.mxu1 %vm9600_vm9, %v9599_v19 }
0x148f   : > { %9338 = vmatprep.subr.mxu1 %v9599_v19  ;;  %v7686_v40 = vand.u32 4294901760, %v7685_v22 }
0x1490   : > { %9339 = vmatpush3.msra.mxu1 %v11408_v0 }
0x1491   : > { %9340 = vmatprep.subr.mxu1 %v9599_v19  ;;  %v7687_v48 = vsub.f32 %v7685_v22, %v7686_v40 }
0x1492   : > { %9341 = vmatpush3.msra.mxu1 %v11410_v38 }
0x1493   : > { %9342 = vmatprep.subr.mxu1 %v9599_v19  ;;  %v7688_v59 = vand.u32 4294901760, %v7687_v48 }
0x1494   : > { %9343 = vmatpush3.msra.mxu1 %v11416_v9 }
0x1495   : > { %9345 = vmatmul.mubr.f32.vlgmr.msra.gmra.mxu1 %v7686_v40  ;;  %9358 = vmatprep.subr.mxu1 %v9599_v19 }
0x1496   : > { %9312 = vmatmul.mubr.f32.vlgmr.msra.gmra.mxu0 %v7688_v59  ;;  %9359 = vmatpush3.msra.mxu1 %v11406_v51 }
0x1497   : > { %9326 = vmatpush3.msra.mxu0 %v11423_v42  ;;  %9360 = vmatprep.subr.mxu1 %v9599_v19 }
0x1498   : > { %9327 = vmatprep.subr.mxu0 %v9599_v19  ;;  %9361 = vmatpush3.msra.mxu1 %v11408_v0 }
0x1499   : > { %9328 = vmatpush3.msra.mxu0 %v11426_v57  ;;  %9362 = vmatprep.subr.mxu1 %v9599_v19 }
0x149a   : > { %9329 = vmatprep.subr.mxu0 %v9599_v19  ;;  %9363 = vmatpush3.msra.mxu1 %v11410_v38 }
0x149b   : > { %9330 = vmatpush3.msra.mxu0 %v11429_v43  ;;  %9364 = vmatprep.subr.mxu1 %v9599_v19 }
0x149c   : > { %9331 = vmatprep.subr.mxu0 %v9599_v19  ;;  %9333 = vmatprep.mubr.msk.f32.mxu0 %vm9600_vm9, %v9599_v19 }
0x149d   : > { %9332 = vmatpush3.msra.mxu0 %v11433_v10  ;;  %9365 = vmatpush3.msra.mxu1 %v11416_v9 }
0x149e   : > { %9366 = vmatprep.mubr.msk.f32.mxu1 %vm9600_vm9, %v9599_v19  ;;  %9334 = vmatmul.mubr.f32.vlgmr.msra.gmra.mxu0 %v7685_v22 }
0x149f   : > { %9347 = vmatprep.subr.mxu0 %v9599_v19  ;;  %9367 = vmatmul.mubr.f32.vlgmr.msra.gmra.mxu1 %v7684_v30 }
0x14a0   : > { %9348 = vmatpush3.msra.mxu0 %v7721_v47  ;;  %9355 = vmatprep.mubr.msk.f32.mxu0 %vm9600_vm9, %v9599_v19 }
0x14a1   : > { %9349 = vmatprep.subr.mxu0 %v9599_v19 }
0x14a2   : > { %9350 = vmatpush3.msra.mxu0 %v7728_v27 }
0x14a3   : > { %9351 = vmatprep.subr.mxu0 %v9599_v19 }
0x14a4   : > { %9352 = vmatpush3.msra.mxu0 %v7735_v34 }
0x14a5   : > { %9353 = vmatprep.subr.mxu0 %v9599_v19 }
0x14a6   : > { %9354 = vmatpush3.msra.mxu0 %v7742_v18 }
0x14a7   : > { %9356 = vmatmul.mubr.f32.vlgmr.msra.gmra.mxu0 %v7684_v30 }
0x154d   : > { %v7781_v29 = vpop.f32.mrf.mxu1 }
0x154f   : > { %v9324_v60 = vpop.f32.mrf.mxu1 }
0x1555   : > { %v7938_v3 = vpop.f32.mrf.mxu1 }
0x1556   : > { %v7690_v23 = vpop.f32.mrf.mxu0 }
0x1557   : > { %v9346_v52 = vpop.f32.mrf.mxu1  ;;  %v7782_v53 = vadd.f32 %v7781_v29, %v7690_v23 }
0x1558   : > { %v9313_v50 = vpop.f32.mrf.mxu0 }
0x155e   : > { %v7861_v62 = vpop.f32.mrf.mxu0 }
0x155f   : > { %v8096_v8 = vpop.f32.mrf.mxu1  ;;  %v7862_v16 = vadd.f32 %v7861_v62, %v7782_v53 }
0x1560   : > { %v9335_v63 = vpop.f32.mrf.mxu0 }
0x1561   : > { %v9368_v1 = vpop.f32.mrf.mxu1  ;;  %v7939_v45 = vadd.f32 %v7938_v3, %v7862_v16 }
0x1567   : > { %v8021_v39 = vpop.f32.mrf.mxu0 }
0x1568   : > { %v8022_v46 = vadd.f32 %v8021_v39, %v7939_v45 }
0x1569   : > { %v9357_v56 = vpop.f32.mrf.mxu0 }
0x156a   : > { %v8097_v33 = vadd.f32 %v8096_v8, %v8022_v46 }
0x156c   : > { %8101 = vst.msk [vmem:[%s9844_s18] sm:$0x1] %vm8100_vm10, %v8097_v33 }
0x156d PF: > { %s11716_s26 = sld [smem:[#allocation9_spill]]  ;;  %s8115_s23 = sshll.u32 %s9844_s18, 4  ;;  %s8116_s23 = int_to_ptr.vmem [resolvable:$true] %s8115_s23 }
0x156e   : > { %s11718_s1 = sld [smem:[#allocation31_spill]]  ;;  %s11720_s4 = sand.u32 1, %s9556_s22  }
0x156f   : > { %s8103_s25 = scalar_lea.sflag [#allocation4], %s11720_s4  ;;  %s9488_s28 = scalar_lea.vmem %s8116_s23, 16 }
0x1570   : > { %p9489_p2 = scmp.ne.s32.totalorder %s8116_s23, %s9488_s28  ;;  %s9601_s9 = smov [#allocation3]  }
0x1571   : > { %s9492_s19 = sshll.u32 %s9601_s9, 4  ;;  %s9493_s19 = int_to_ptr.vmem [resolvable:$false] %s9492_s19 }
0x1572   : > { %p9490_p4 = pnand %p9489_p2, %p9756_p3  ;;  %s9494_s30 = scalar_lea.vmem %s9493_s19, 32 }
0x1573   : > { %s8329_s6 = sshll.u32 %s11716_s26, 4  ;;  %p9495_p6 = scmp.lt.s32.totalorder %s8116_s23, %s9493_s19 }
0x1574   : > { %s11719_s27 = smov %s11718_s1  ;;  %s8113_s3 = scalar_lea.hbm %s11718_s1, %s8329_s6 }
0x1575   : > { %p9491_p5 = pneg %p9490_p4  ;;  %p9496_p7 = scmp.lt.s32.totalorder %s9494_s30, %s9488_s28 }
0x1577   : > { %p9497_p8 = por %p9496_p7, %p9495_p6 }
0x1579   : > { %p9498_p10 = pnand %p9497_p8, %p9491_p5 }
0x157b   : > { %9501 = shalt.err (!%p9498_p10)
}
0x157c   : > { %s9502_s7 = scalar_lea.hbm %s8113_s3, 16  ;;  %s9506_s29 = scalar_lea.hbm %s11719_s27, 32 }
0x157d   : > { %p9503_p11 = scmp.ne.s32.totalorder %s8113_s3, %s9502_s7  ;;  %p9507_p0 = scmp.lt.s32.totalorder %s8113_s3, %s11719_s27 }
0x157e   : > { %p9508_p1 = scmp.lt.s32.totalorder %s9506_s29, %s9502_s7 }
0x157f   : > { %p9504_p12 = pnand %p9503_p11, %p9756_p3 }
0x1580   : > { %p9509_p2 = por %p9508_p1, %p9507_p0 }
0x1581   : > { %p9505_p13 = pneg %p9504_p12 }
0x1583   : > { %p9510_p4 = pnand %p9509_p2, %p9505_p13 }
0x1585   : > { %9513 = shalt.err (!%p9510_p4)
}
0x1586   : > { %9369 = dma.vmem_to_hbm [thread:$0]  (%p9756_p3), %s8116_s23, 16, %s8113_s3, %s8103_s25  }
0x1587 PF: > { %s11721_s2 = sld [smem:[#allocation12_spill]] }
0x1588   : > { %s11722_s24 = sld [smem:[#allocation6_spill]] }
0x158d   : > { %p9375_p5 = scmp.ge.s32.totalorder %s11721_s2, 2 }
0x158e   : > { %s8127_s4 = sand.u32 1, %s11722_s24  }
0x158f   : > { %p9372_p6 = pnand %p9375_p5, %p9766_p9  ;;  %s8128_s28 = scalar_lea.sflag [#allocation4], %s8127_s4 }
0x1591   : > { %p9373_p7 = pneg %p9372_p6 }
0x1593   : > { %9547 = dma.done.wait (%p9373_p7), %s8128_s28, 16  }
0x1594   : > { %9549 = vsyncadd (%p9373_p7), %s8128_s28, 4294967280  ;;  %s33_s26 = sadd.s32 1, %s11721_s2   ;;  %s11724_s9 = sld [smem:[#allocation7_spill]] }
0x1595   : > { %p30_p8 = scmp.ge.s32.totalorder %s33_s26, 6   ;;  %s11725_s23 = sld [smem:[#allocation17_spill]] }
0x1596   : > { %s11726_s24 = sld [smem:[#allocation10_spill]]  ;;  %s11730_s1 = smov %s9556_s22 }
0x1597   : > { %s11727_s2 = sld [smem:[#allocation11_spill]]  ;;  %32 = sbr.rel (!%p30_p8) target bundleno = 18 (0x12), region = 179 }
0x1598   : > { %s11728_s25 = sld [smem:[#allocation13_spill]] }
0x1599   : > { %s11729_s3 = sld [smem:[#allocation15_spill]] }
0x159a   : > { %s11731_s22 = smov %s11724_s9 }
0x159c   :  { %8132 = vsyncpa [#allocation4], 1 }
0x159d   :  { %8134 = vsyncpa [#allocation4 + $0x1], 1 }

</bundles_post_ra>
